<compile_context>
chip_gen: v6e
topology: v6e:2x2x1
jax: 0.10.0
libtpu: 0.0.40
codegen_flags: <defaults>
</compile_context>

<pallas_src>
import functools

import jax
import jax.numpy as jnp
from jax.experimental import pallas as pl
from jax.experimental.pallas import tpu as pltpu

CHANNEL = 18
JOINTS = 24
LOG_SIG_MAX = 2.0
LOG_SIG_MIN = -20.0
HEAD_OUT = 128                      # lane-dense head output slab: [mean | log_std | mean_stop | log_std_stop | pad]
VMEM_LIMIT = 64 * 1024 * 1024


# --------------------------------------------------------------------------
# Kernel 1: Encoder (fused conv stacks + running masked max/min + global max)
# --------------------------------------------------------------------------
def encoder_kernel(x_ref, mask_ref, w1_ref, b1_ref, w2_ref, b2_ref, w3_ref, b3_ref,
                   out_ref):
    """One (batch-block, point-tile) grid step.

    out_ref columns: [0:768)    running max of masked lx (6 masks x 128)
                     [768:1536) running min of masked lx
                     [1536:2048) running global max of gx
    """
    ni = pl.program_id(1)
    bt = out_ref.shape[0]

    @pl.when(ni == 0)
    def _init():
        out_ref[:, 0:768] = jnp.full((bt, 768), -jnp.inf, jnp.float32)
        out_ref[:, 768:1536] = jnp.full((bt, 768), jnp.inf, jnp.float32)
        out_ref[:, 1536:2048] = jnp.full((bt, 512), -jnp.inf, jnp.float32)

    w1 = w1_ref[...]
    b1 = b1_ref[...]
    w2 = w2_ref[...]
    b2 = b2_ref[...]
    w3 = w3_ref[...]
    b3 = b3_ref[...]

    for b in range(bt):                       # b_tile is small -> unrolled
        xb = x_ref[b]                         # [n_tile, 13] bf16
        h = jnp.dot(xb, w1, preferred_element_type=jnp.float32) + b1
        h = jnp.maximum(h, 0.0)
        h = jnp.dot(h.astype(jnp.bfloat16), w2, preferred_element_type=jnp.float32) + b2
        h = jnp.maximum(h, 0.0)
        h = jnp.dot(h.astype(jnp.bfloat16), w3, preferred_element_type=jnp.float32) + b3
        lx = h[:, 0:128]                      # local branch   [n_tile, 128]
        gx = h[:, 128:640]                    # global branch  [n_tile, 512]

        mk = mask_ref[b]                      # [n_tile, 5] f32

        g_max = jnp.max(gx, axis=0, keepdims=True)                       # [1, 512]
        out_ref[b:b + 1, 1536:2048] = jnp.maximum(out_ref[b:b + 1, 1536:2048], g_max)

        mask0 = jnp.sum(mk, axis=-1, keepdims=True) < 0.9                # [n_tile, 1]
        for j in range(6):
            m = mask0 if j == 0 else (mk[:, j - 1:j] != 0)
            lxm = jnp.where(m, lx, 0.0)                                  # masked_fill(~m, 0)
            tmax = jnp.max(lxm, axis=0, keepdims=True)                   # [1, 128]
            tmin = jnp.min(lxm, axis=0, keepdims=True)
            c = j * 128
            out_ref[b:b + 1, c:c + 128] = jnp.maximum(out_ref[b:b + 1, c:c + 128], tmax)
            out_ref[b:b + 1, 768 + c:768 + c + 128] = jnp.minimum(
                out_ref[b:b + 1, 768 + c:768 + c + 128], tmin)


# --------------------------------------------------------------------------
# Kernel 2: policy head (fused hidden / hidden_stop branches + fused output heads)
# --------------------------------------------------------------------------
def head_kernel(feat_ref, xb_ref, w1f_ref, w1j_ref, b1_ref, w2_ref, b2_ref,
                w3_ref, b3_ref, wh_ref, bh_ref, out_ref, *, num_actions):
    feat = feat_ref[...].astype(jnp.bfloat16)      # [b_tile, 2048]
    xb = xb_ref[...].astype(jnp.bfloat16)          # [b_tile, 24]

    # layer 1: hidden | hidden_stop fused; state_extend (pure Linear) pre-folded into w1j/b1
    h = (jnp.dot(feat, w1f_ref[...], preferred_element_type=jnp.float32)
         + jnp.dot(xb, w1j_ref[...], preferred_element_type=jnp.float32)
         + b1_ref[...])
    h = jnp.maximum(h, 0.0)                        # [b_tile, 4H]
    # layer 2: block-diagonal over the two branches
    h = jnp.dot(h.astype(jnp.bfloat16), w2_ref[...], preferred_element_type=jnp.float32) + b2_ref[...]
    h = jnp.maximum(h, 0.0)                        # [b_tile, 2H] = [act | stop]
    # layer 3: act-branch linear; the (non-negative) stop branch passes through an identity block
    h = jnp.dot(h.astype(jnp.bfloat16), w3_ref[...], preferred_element_type=jnp.float32) + b3_ref[...]
    h = jnp.maximum(h, 0.0)                        # [b_tile, 2H] = [h_act | h_stop]
    # fused output heads -> lane-dense slab
    y = jnp.dot(h.astype(jnp.bfloat16), wh_ref[...], preferred_element_type=jnp.float32) + bh_ref[...]

    a = num_actions
    col = jax.lax.broadcasted_iota(jnp.int32, y.shape, 1)
    is_log_std = jnp.logical_or(jnp.logical_and(col >= a, col < 2 * a), col == 2 * a + 1)
    out_ref[...] = jnp.where(is_log_std, jnp.clip(y, LOG_SIG_MIN, LOG_SIG_MAX), y)


# --------------------------------------------------------------------------
# Wrappers
# --------------------------------------------------------------------------
def _const_spec(a):
    nd = a.ndim
    return pl.BlockSpec(a.shape, lambda *g, nd=nd: (0,) * nd)   # full array, VMEM-resident


def _pick_tiles(B, N, n_tile):
    b_tile = B if B <= 8 else 8
    if B % b_tile != 0:
        b_tile = B                       # fallback: whole batch in one block
    if n_tile is None:
        n_tile = N
        if N > 512:
            for t in range(512, 7, -8):  # largest multiple-of-8 divisor <= 512
                if N % t == 0:
                    n_tile = t
                    break
    assert N % n_tile == 0 and (n_tile == N or n_tile % 8 == 0)
    return b_tile, n_tile


def encoder_forward(x_pts, mask, kp, *, n_tile=None):
    B, N, C = x_pts.shape
    b_tile, n_tile = _pick_tiles(B, N, n_tile)
    grid = (B // b_tile, N // n_tile)

    weights = [kp["we1"], kp["be1"], kp["we2"], kp["be2"], kp["we3"], kp["be3"]]
    flops = 2 * B * N * (13 * 128 + 128 * 256 + 256 * 640)
    bytes_accessed = (x_pts.size * x_pts.dtype.itemsize + mask.size * 4
                      + B * 2048 * 4 + sum(w.size * w.dtype.itemsize for w in weights))

    return pl.pallas_call(
        encoder_kernel,
        out_shape=jax.ShapeDtypeStruct((B, 2048), jnp.float32),
        grid=grid,
        in_specs=[
            pl.BlockSpec((b_tile, n_tile, C), lambda bi, ni: (bi, ni, 0)),
            pl.BlockSpec((b_tile, n_tile, mask.shape[-1]), lambda bi, ni: (bi, ni, 0)),
            *[_const_spec(w) for w in weights],
        ],
        out_specs=pl.BlockSpec((b_tile, 2048), lambda bi, ni: (bi, 0)),
        compiler_params=pltpu.CompilerParams(
            dimension_semantics=("parallel", "arbitrary"),
            vmem_limit_bytes=VMEM_LIMIT),
        cost_estimate=pl.CostEstimate(flops=flops, transcendentals=0,
                                      bytes_accessed=bytes_accessed),
    )(x_pts, mask, *weights)


def head_forward(feat, xb, kp, num_actions):
    B = feat.shape[0]
    b_tile = B if B <= 8 else 8
    if B % b_tile != 0:
        b_tile = B

    weights = [kp["w1f"], kp["w1j"], kp["b1h"], kp["w2h"], kp["b2h"],
               kp["w3h"], kp["b3h"], kp["wh"], kp["bh"]]
    y = pl.pallas_call(
        functools.partial(head_kernel, num_actions=num_actions),
        out_shape=jax.ShapeDtypeStruct((B, HEAD_OUT), jnp.float32),
        grid=(B // b_tile,),
        in_specs=[
            pl.BlockSpec((b_tile, feat.shape[1]), lambda bi: (bi, 0)),
            pl.BlockSpec((b_tile, JOINTS), lambda bi: (bi, 0)),
            *[_const_spec(w) for w in weights],
        ],
        out_specs=pl.BlockSpec((b_tile, HEAD_OUT), lambda bi: (bi, 0)),
        compiler_params=pltpu.CompilerParams(
            dimension_semantics=("parallel",),
            vmem_limit_bytes=VMEM_LIMIT),
    )(feat, xb, *weights)

    a = num_actions
    mean = y[:, :a]
    log_std = y[:, a:2 * a]
    mean_stop = y[:, 2 * a:2 * a + 1]
    log_std_stop = y[:, 2 * a + 1:2 * a + 2]
    return mean, log_std, mean_stop, log_std_stop


def gaussian_policy_forward(state, kp, num_actions, *, n_tile=None):
    """state: [B, CHANNEL*num_points + JOINTS] (same layout as the PyTorch module)."""
    B = state.shape[0]
    x_a = state[:, :-JOINTS]
    x_b = state[:, -JOINTS:]
    num = x_a.shape[1] // CHANNEL
    pts = x_a.reshape(B, CHANNEL, num)                                               # NCW, as in PyTorch
    x_pts = jnp.transpose(pts[:, :CHANNEL - 5, :], (0, 2, 1)).astype(jnp.bfloat16)   # [B, N, 13]
    mask = jnp.transpose(pts[:, CHANNEL - 5:, :], (0, 2, 1))                          # [B, N, 5]
    feat = encoder_forward(x_pts, mask, kp, n_tile=n_tile)
    return head_forward(feat, x_b, kp, num_actions)


# --------------------------------------------------------------------------
# Parameters: raw (PyTorch-equivalent, [in,out] layout) + kernel-ready fused bf16
# --------------------------------------------------------------------------
def _xavier(key, fin, fout):
    lim = (6.0 / (fin + fout)) ** 0.5
    return jax.random.uniform(key, (fin, fout), jnp.float32, -lim, lim)


def init_params(key, hidden_dim, num_actions):
    ks = iter(jax.random.split(key, 64))
    p = {}

    def conv(prefix, fin, fout):
        p["w" + prefix] = _xavier(next(ks), fin, fout)
        p["b" + prefix] = 0.01 * jax.random.normal(next(ks), (1, fout), jnp.float32)

    def lin(prefix, fin, fout):
        p["w" + prefix] = _xavier(next(ks), fin, fout)        # xavier_uniform_, gain=1
        p["b" + prefix] = jnp.zeros((1, fout), jnp.float32)   # constant_(bias, 0)

    # Encoder local_net: Conv1d(13,64,1) -> Conv1d(64,128,1) -> Conv1d(128,128,1)
    conv("1l", CHANNEL - 5, 64); conv("2l", 64, 128); conv("3l", 128, 128)
    # Encoder global_net: Conv1d(13,64,1) -> Conv1d(64,128,1) -> Conv1d(128,512,1)
    conv("1g", CHANNEL - 5, 64); conv("2g", 64, 128); conv("3g", 128, 512)
    # state_extend: Linear(24, 256)
    lin("se", JOINTS, 256)
    # hidden: Linear(2304, 2H), Linear(2H, H), Linear(H, H)
    lin("1", 2048 + 256, 2 * hidden_dim)
    lin("2", 2 * hidden_dim, hidden_dim)
    lin("3", hidden_dim, hidden_dim)
    # hidden_stop: Linear(2304, 2H), Linear(2H, H)
    lin("s1", 2048 + 256, 2 * hidden_dim)
    lin("s2", 2 * hidden_dim, hidden_dim)
    # heads
    lin("m", hidden_dim, num_actions)    # mean_linear
    lin("l", hidden_dim, num_actions)    # log_std_linear
    lin("ms", hidden_dim, 1)             # mean_stop
    lin("ls", hidden_dim, 1)             # log_std_stop
    return p


def prepare_params(p, hidden_dim, num_actions):
    """Fuse raw parameters into kernel-ready, lane-dense bf16 matrices (exact algebra in f32)."""
    H, A = hidden_dim, num_actions
    assert 2 * A + 2 <= HEAD_OUT
    f32, bf16 = jnp.float32, jnp.bfloat16
    kp = {}

    # --- encoder: local|global conv stacks fused (concat / block-diagonal) ---
    kp["we1"] = jnp.concatenate([p["w1l"], p["w1g"]], axis=1).astype(bf16)          # [13, 128]
    kp["be1"] = jnp.concatenate([p["b1l"], p["b1g"]], axis=1).astype(f32)           # [1, 128]
    we2 = jnp.zeros((128, 256), f32).at[:64, :128].set(p["w2l"]).at[64:, 128:].set(p["w2g"])
    kp["we2"] = we2.astype(bf16)
    kp["be2"] = jnp.concatenate([p["b2l"], p["b2g"]], axis=1).astype(f32)           # [1, 256]
    we3 = jnp.zeros((256, 640), f32).at[:128, :128].set(p["w3l"]).at[128:, 128:].set(p["w3g"])
    kp["we3"] = we3.astype(bf16)
    kp["be3"] = jnp.concatenate([p["b3l"], p["b3g"]], axis=1).astype(f32)           # [1, 640]

    # --- head: hidden|hidden_stop fused; state_extend (pure Linear, no ReLU) folded into layer 1 ---
    w1cat = jnp.concatenate([p["w1"], p["ws1"]], axis=1)                            # [2304, 4H]
    b1cat = jnp.concatenate([p["b1"], p["bs1"]], axis=1)                            # [1, 4H]
    w1_feat, w1_se = w1cat[:2048], w1cat[2048:]                                     # [2048,4H], [256,4H]
    kp["w1f"] = w1_feat.astype(bf16)
    kp["w1j"] = (p["wse"] @ w1_se).astype(bf16)                                     # [24, 4H]
    kp["b1h"] = (b1cat + p["bse"] @ w1_se).astype(f32)                              # [1, 4H]

    w2bd = jnp.zeros((4 * H, 2 * H), f32).at[:2 * H, :H].set(p["w2"]).at[2 * H:, H:].set(p["ws2"])
    kp["w2h"] = w2bd.astype(bf16)
    kp["b2h"] = jnp.concatenate([p["b2"], p["bs2"]], axis=1).astype(f32)            # [1, 2H]

    # third act-branch layer; stop branch (already >=0 after ReLU) passes through an identity block
    w3bd = jnp.zeros((2 * H, 2 * H), f32).at[:H, :H].set(p["w3"]).at[H:, H:].set(jnp.eye(H, dtype=f32))
    kp["w3h"] = w3bd.astype(bf16)
    kp["b3h"] = jnp.concatenate([p["b3"], jnp.zeros((1, H), f32)], axis=1)          # [1, 2H]

    wh = jnp.zeros((2 * H, HEAD_OUT), f32)
    wh = wh.at[:H, :A].set(p["wm"]).at[:H, A:2 * A].set(p["wl"])
    wh = wh.at[H:, 2 * A:2 * A + 1].set(p["wms"]).at[H:, 2 * A + 1:2 * A + 2].set(p["wls"])
    kp["wh"] = wh.astype(bf16)
    bh = jnp.zeros((1, HEAD_OUT), f32)
    bh = bh.at[:, :A].set(p["bm"]).at[:, A:2 * A].set(p["bl"])
    bh = bh.at[:, 2 * A:2 * A + 1].set(p["bms"]).at[:, 2 * A + 1:2 * A + 2].set(p["bls"])
    kp["bh"] = bh
    return kp


# --------------------------------------------------------------------------
# Pure-JAX f32 reference (mirrors the PyTorch forward exactly, unfused)
# --------------------------------------------------------------------------
def reference_forward(state, p):
    B = state.shape[0]
    x_a = state[:, :-JOINTS]
    x_b = state[:, -JOINTS:]
    num = x_a.shape[1] // CHANNEL
    pts = x_a.reshape(B, CHANNEL, num)
    x = jnp.transpose(pts[:, :CHANNEL - 5, :], (0, 2, 1))     # [B, N, 13]
    mask = jnp.transpose(pts[:, CHANNEL - 5:, :], (0, 2, 1))  # [B, N, 5]

    def mlp3(h, w1, b1, w2, b2, w3, b3):
        h = jnp.maximum(h @ w1 + b1, 0.0)
        h = jnp.maximum(h @ w2 + b2, 0.0)
        return h @ w3 + b3

    lx = mlp3(x, p["w1l"], p["b1l"], p["w2l"], p["b2l"], p["w3l"], p["b3l"])   # [B, N, 128]
    gx = mlp3(x, p["w1g"], p["b1g"], p["w2g"], p["b2g"], p["w3g"], p["b3g"])   # [B, N, 512]
    g = jnp.max(gx, axis=1)
    masks = [jnp.sum(mask, axis=-1) < 0.9] + [mask[..., i] != 0 for i in range(5)]
    pooled = [jnp.max(jnp.where(m[..., None], lx, 0.0), axis=1) for m in masks]
    pooled += [jnp.min(jnp.where(m[..., None], lx, 0.0), axis=1) for m in masks]
    feat = jnp.concatenate(pooled + [g], axis=-1)

    se = x_b @ p["wse"] + p["bse"]
    xx = jnp.concatenate([feat, se], axis=-1)
    h = jnp.maximum(xx @ p["w1"] + p["b1"], 0.0)
    h = jnp.maximum(h @ p["w2"] + p["b2"], 0.0)
    h = jnp.maximum(h @ p["w3"] + p["b3"], 0.0)
    hs = jnp.maximum(xx @ p["ws1"] + p["bs1"], 0.0)
    hs = jnp.maximum(hs @ p["ws2"] + p["bs2"], 0.0)
    mean = h @ p["wm"] + p["bm"]
    log_std = jnp.clip(h @ p["wl"] + p["bl"], LOG_SIG_MIN, LOG_SIG_MAX)
    mean_stop = hs @ p["wms"] + p["bms"]
    log_std_stop = jnp.clip(hs @ p["wls"] + p["bls"], LOG_SIG_MIN, LOG_SIG_MAX)
    return mean, log_std, mean_stop, log_std_stop


# --------------------------------------------------------------------------
if __name__ == "__main__":
    B = 2
    N_POINTS = 256          # small, but > N_TILE so the running-pool grid path is exercised
    HIDDEN = 32
    NUM_ACTIONS = 4
    N_TILE = 64             # grid = (1 batch block, 4 point tiles)

    key = jax.random.PRNGKey(0)
    k_params, k_feat, k_mask, k_joint = jax.random.split(key, 4)

    raw = init_params(k_params, HIDDEN, NUM_ACTIONS)
    kp = prepare_params(raw, HIDDEN, NUM_ACTIONS)

    # Build a state vector: per-point [13 features + 5 binary mask channels], plus 24 joints.
    feat_part = jax.random.normal(k_feat, (B, CHANNEL - 5, N_POINTS), jnp.float32)
    mask_part = jax.random.bernoulli(k_mask, 0.4, (B, 5, N_POINTS)).astype(jnp.float32)
    pts = jnp.concatenate([feat_part, mask_part], axis=1)                 # [B, 18, N]
    joint_part = jax.random.normal(k_joint, (B, JOINTS), jnp.float32)
    state = jnp.concatenate([pts.reshape(B, CHANNEL * N_POINTS), joint_part], axis=1)

    fwd = jax.jit(functools.partial(gaussian_policy_forward,
                                    num_actions=NUM_ACTIONS, n_tile=N_TILE))
    outs = jax.block_until_ready(fwd(state, kp))
    mean, log_std, mean_stop, log_std_stop = outs

    assert mean.shape == (B, NUM_ACTIONS)
    assert log_std.shape == (B, NUM_ACTIONS)
    assert mean_stop.shape == (B, 1)
    assert log_std_stop.shape == (B, 1)
    for t in outs:
        assert bool(jnp.all(jnp.isfinite(t)))
    assert bool(jnp.all(log_std >= LOG_SIG_MIN)) and bool(jnp.all(log_std <= LOG_SIG_MAX))
    assert bool(jnp.all(log_std_stop >= LOG_SIG_MIN)) and bool(jnp.all(log_std_stop <= LOG_SIG_MAX))

    # Loose check vs. the f32 pure-JAX reference (kernel matmuls run in bf16 with f32 accumulation).
    refs = reference_forward(state, raw)
    for got, ref in zip(outs, refs):
        assert got.shape == ref.shape
        err = float(jnp.max(jnp.abs(got - ref.astype(jnp.float32))))
        assert err < 0.3, f"mismatch vs reference: max abs err = {err}"

    print("KERNEL_OK")
</pallas_src>

<mosaic_0001>
module attributes {stable_mosaic.version = 11 : i64} {
  func.func @encoder_kernel(%arg0: i32, %arg1: i32, %arg2: memref<2x64x13xbf16, #tpu.memory_space<vmem>>, %arg3: memref<2x64x5xf32, #tpu.memory_space<vmem>>, %arg4: memref<13x128xbf16, #tpu.memory_space<vmem>>, %arg5: memref<1x128xf32, #tpu.memory_space<vmem>>, %arg6: memref<128x256xbf16, #tpu.memory_space<vmem>>, %arg7: memref<1x256xf32, #tpu.memory_space<vmem>>, %arg8: memref<256x640xbf16, #tpu.memory_space<vmem>>, %arg9: memref<1x640xf32, #tpu.memory_space<vmem>>, %arg10: memref<2x2048xf32, #tpu.memory_space<vmem>>) attributes {dimension_semantics = [#tpu.dimension_semantics<parallel>, #tpu.dimension_semantics<arbitrary>], iteration_bounds = array<i64: 1, 4>, scalar_prefetch = 0 : i64, scratch_operands = 0 : i64, tpu.core_type = #tpu.core_type<tc>, window_params = [{transform_indices = @transform_0, window_bounds = array<i64: 2, 64, 13>}, {transform_indices = @transform_1, window_bounds = array<i64: 2, 64, 5>}, {pipeline_mode = #tpu.pipeline_mode<synchronous>, transform_indices = @transform_2, window_bounds = array<i64: 13, 128>}, {pipeline_mode = #tpu.pipeline_mode<synchronous>, transform_indices = @transform_3, window_bounds = array<i64: 1, 128>}, {pipeline_mode = #tpu.pipeline_mode<synchronous>, transform_indices = @transform_4, window_bounds = array<i64: 128, 256>}, {pipeline_mode = #tpu.pipeline_mode<synchronous>, transform_indices = @transform_5, window_bounds = array<i64: 1, 256>}, {pipeline_mode = #tpu.pipeline_mode<synchronous>, transform_indices = @transform_6, window_bounds = array<i64: 256, 640>}, {pipeline_mode = #tpu.pipeline_mode<synchronous>, transform_indices = @transform_7, window_bounds = array<i64: 1, 640>}, {transform_indices = @transform_8, window_bounds = array<i64: 2, 2048>}]} {
    %c0_i32 = arith.constant 0 : i32
    %0 = arith.cmpi eq, %arg1, %c0_i32 : i32
    %1 = arith.extui %0 : i1 to i32
    %c0_i32_0 = arith.constant 0 : i32
    %2 = arith.cmpi ne, %1, %c0_i32_0 : i32
    scf.if %2 {
      %cst_176 = arith.constant 0xFF800000 : f32
      %267 = vector.broadcast %cst_176 : f32 to vector<2x768xf32>
      %c0_177 = arith.constant 0 : index
      %c0_178 = arith.constant 0 : index
      %268 = vector.load %arg10[%c0_177, %c0_178] : memref<2x2048xf32, #tpu.memory_space<vmem>>, vector<2x768xf32>
      tpu.vector_store %arg10[%c0_177, %c0_178], %267 {strides = array<i32>} : memref<2x2048xf32, #tpu.memory_space<vmem>>, vector<2x768xf32>,
      %cst_179 = arith.constant 0x7F800000 : f32
      %269 = vector.broadcast %cst_179 : f32 to vector<2x768xf32>
      %c0_180 = arith.constant 0 : index
      %c768_181 = arith.constant 768 : index
      %270 = vector.load %arg10[%c0_180, %c768_181] : memref<2x2048xf32, #tpu.memory_space<vmem>>, vector<2x768xf32>
      tpu.vector_store %arg10[%c0_180, %c768_181], %269 {strides = array<i32>} : memref<2x2048xf32, #tpu.memory_space<vmem>>, vector<2x768xf32>,
      %cst_182 = arith.constant 0xFF800000 : f32
      %271 = vector.broadcast %cst_182 : f32 to vector<2x512xf32>
      %c0_183 = arith.constant 0 : index
      %c1536_184 = arith.constant 1536 : index
      %272 = vector.load %arg10[%c0_183, %c1536_184] : memref<2x2048xf32, #tpu.memory_space<vmem>>, vector<2x512xf32>
      tpu.vector_store %arg10[%c0_183, %c1536_184], %271 {strides = array<i32>} : memref<2x2048xf32, #tpu.memory_space<vmem>>, vector<2x512xf32>,
    } else {
    }
    %c0 = arith.constant 0 : index
    %c0_1 = arith.constant 0 : index
    %3 = vector.load %arg4[%c0, %c0_1] : memref<13x128xbf16, #tpu.memory_space<vmem>>, vector<13x128xbf16>
    %c0_2 = arith.constant 0 : index
    %c0_3 = arith.constant 0 : index
    %4 = vector.load %arg5[%c0_2, %c0_3] : memref<1x128xf32, #tpu.memory_space<vmem>>, vector<1x128xf32>
    %c0_4 = arith.constant 0 : index
    %c0_5 = arith.constant 0 : index
    %5 = vector.load %arg6[%c0_4, %c0_5] : memref<128x256xbf16, #tpu.memory_space<vmem>>, vector<128x256xbf16>
    %c0_6 = arith.constant 0 : index
    %c0_7 = arith.constant 0 : index
    %6 = vector.load %arg7[%c0_6, %c0_7] : memref<1x256xf32, #tpu.memory_space<vmem>>, vector<1x256xf32>
    %c0_8 = arith.constant 0 : index
    %c0_9 = arith.constant 0 : index
    %7 = vector.load %arg8[%c0_8, %c0_9] : memref<256x640xbf16, #tpu.memory_space<vmem>>, vector<256x640xbf16>
    %c0_10 = arith.constant 0 : index
    %c0_11 = arith.constant 0 : index
    %8 = vector.load %arg9[%c0_10, %c0_11] : memref<1x640xf32, #tpu.memory_space<vmem>>, vector<1x640xf32>
    %c0_12 = arith.constant 0 : index
    %c0_13 = arith.constant 0 : index
    %c0_14 = arith.constant 0 : index
    %9 = vector.load %arg2[%c0_12, %c0_13, %c0_14] : memref<2x64x13xbf16, #tpu.memory_space<vmem>>, vector<1x64x13xbf16>
    %10 = vector.shape_cast %9 : vector<1x64x13xbf16> to vector<64x13xbf16>
    %cst = arith.constant dense<0.000000e+00> : vector<64x128xf32>
    %11 = tpu.matmul %10, %3, %cst {dimension_numbers = #tpu.dot_dimension_numbers<[1], [0], [0], [1], [0, 0, 1, 1], [], []>} : vector<64x13xbf16>, vector<13x128xbf16>, vector<64x128xf32> -> vector<64x128xf32>
    %12 = vector.broadcast %4 : vector<1x128xf32> to vector<64x128xf32>
    %13 = arith.addf %11, %12 : vector<64x128xf32>
    %cst_15 = arith.constant 0.000000e+00 : f32
    %14 = vector.broadcast %cst_15 : f32 to vector<64x128xf32>
    %15 = arith.maximumf %13, %14 : vector<64x128xf32>
    %16 = arith.truncf %15 : vector<64x128xf32> to vector<64x128xbf16>
    %cst_16 = arith.constant dense<0.000000e+00> : vector<64x256xf32>
    %17 = tpu.matmul %16, %5, %cst_16 {dimension_numbers = #tpu.dot_dimension_numbers<[1], [0], [0], [1], [0, 0, 1, 1], [], []>} : vector<64x128xbf16>, vector<128x256xbf16>, vector<64x256xf32> -> vector<64x256xf32>
    %18 = vector.broadcast %6 : vector<1x256xf32> to vector<64x256xf32>
    %19 = arith.addf %17, %18 : vector<64x256xf32>
    %cst_17 = arith.constant 0.000000e+00 : f32
    %20 = vector.broadcast %cst_17 : f32 to vector<64x256xf32>
    %21 = arith.maximumf %19, %20 : vector<64x256xf32>
    %22 = arith.truncf %21 : vector<64x256xf32> to vector<64x256xbf16>
    %cst_18 = arith.constant dense<0.000000e+00> : vector<64x640xf32>
    %23 = tpu.matmul %22, %7, %cst_18 {dimension_numbers = #tpu.dot_dimension_numbers<[1], [0], [0], [1], [0, 0, 1, 1], [], []>} : vector<64x256xbf16>, vector<256x640xbf16>, vector<64x640xf32> -> vector<64x640xf32>
    %24 = vector.broadcast %8 : vector<1x640xf32> to vector<64x640xf32>
    %25 = arith.addf %23, %24 : vector<64x640xf32>
    %26 = vector.extract_strided_slice %25 {offsets = [0, 0], sizes = [64, 128], strides = [1, 1]} : vector<64x640xf32> to vector<64x128xf32>
    %27 = vector.extract_strided_slice %25 {offsets = [0, 128], sizes = [64, 512], strides = [1, 1]} : vector<64x640xf32> to vector<64x512xf32>
    %c0_19 = arith.constant 0 : index
    %c0_20 = arith.constant 0 : index
    %c0_21 = arith.constant 0 : index
    %28 = vector.load %arg3[%c0_19, %c0_20, %c0_21] : memref<2x64x5xf32, #tpu.memory_space<vmem>>, vector<1x64x5xf32>
    %29 = vector.shape_cast %28 : vector<1x64x5xf32> to vector<64x5xf32>
    %cst_22 = arith.constant dense<0xFF800000> : vector<512xf32>
    %30 = vector.multi_reduction <maximumf>, %27, %cst_22 [0] : vector<64x512xf32> to vector<512xf32>
    %31 = vector.shape_cast %30 : vector<512xf32> to vector<1x512xf32>
    %c0_23 = arith.constant 0 : index
    %c1536 = arith.constant 1536 : index
    %32 = vector.load %arg10[%c0_23, %c1536] : memref<2x2048xf32, #tpu.memory_space<vmem>>, vector<1x512xf32>
    %33 = arith.maximumf %32, %31 : vector<1x512xf32>
    %c0_24 = arith.constant 0 : index
    %c1536_25 = arith.constant 1536 : index
    %34 = vector.load %arg10[%c0_24, %c1536_25] : memref<2x2048xf32, #tpu.memory_space<vmem>>, vector<1x512xf32>
    tpu.vector_store %arg10[%c0_24, %c1536_25], %33 {strides = array<i32>} : memref<2x2048xf32, #tpu.memory_space<vmem>>, vector<1x512xf32>,
    %cst_26 = arith.constant dense<0.000000e+00> : vector<64xf32>
    %35 = vector.multi_reduction <add>, %29, %cst_26 [1] : vector<64x5xf32> to vector<64xf32>
    %36 = vector.shape_cast %35 : vector<64xf32> to vector<64x1xf32>
    %cst_27 = arith.constant 0.899999976 : f32
    %37 = vector.broadcast %cst_27 : f32 to vector<64x1xf32>
    %38 = arith.cmpf olt, %36, %37 : vector<64x1xf32>
    %cst_28 = arith.constant 0.000000e+00 : f32
    %39 = vector.shape_cast %38 : vector<64x1xi1> to vector<64x1xi1>
    %40 = vector.broadcast %39 : vector<64x1xi1> to vector<64x128xi1>
    %41 = vector.broadcast %cst_28 : f32 to vector<64x128xf32>
    %42 = arith.select %40, %26, %41 : vector<64x128xi1>, vector<64x128xf32>
    %cst_29 = arith.constant dense<0xFF800000> : vector<128xf32>
    %43 = vector.multi_reduction <maximumf>, %42, %cst_29 [0] : vector<64x128xf32> to vector<128xf32>
    %44 = vector.shape_cast %43 : vector<128xf32> to vector<1x128xf32>
    %cst_30 = arith.constant dense<0x7F800000> : vector<128xf32>
    %45 = vector.multi_reduction <minimumf>, %42, %cst_30 [0] : vector<64x128xf32> to vector<128xf32>
    %46 = vector.shape_cast %45 : vector<128xf32> to vector<1x128xf32>
    %c0_31 = arith.constant 0 : index
    %c0_32 = arith.constant 0 : index
    %47 = vector.load %arg10[%c0_31, %c0_32] : memref<2x2048xf32, #tpu.memory_space<vmem>>, vector<1x128xf32>
    %48 = arith.maximumf %47, %44 : vector<1x128xf32>
    %c0_33 = arith.constant 0 : index
    %c0_34 = arith.constant 0 : index
    %49 = vector.load %arg10[%c0_33, %c0_34] : memref<2x2048xf32, #tpu.memory_space<vmem>>, vector<1x128xf32>
    tpu.vector_store %arg10[%c0_33, %c0_34], %48 {strides = array<i32>} : memref<2x2048xf32, #tpu.memory_space<vmem>>, vector<1x128xf32>,
    %c0_35 = arith.constant 0 : index
    %c768 = arith.constant 768 : index
    %50 = vector.load %arg10[%c0_35, %c768] : memref<2x2048xf32, #tpu.memory_space<vmem>>, vector<1x128xf32>
    %51 = arith.minimumf %50, %46 : vector<1x128xf32>
    %c0_36 = arith.constant 0 : index
    %c768_37 = arith.constant 768 : index
    %52 = vector.load %arg10[%c0_36, %c768_37] : memref<2x2048xf32, #tpu.memory_space<vmem>>, vector<1x128xf32>
    tpu.vector_store %arg10[%c0_36, %c768_37], %51 {strides = array<i32>} : memref<2x2048xf32, #tpu.memory_space<vmem>>, vector<1x128xf32>,
    %53 = vector.extract_strided_slice %29 {offsets = [0, 0], sizes = [64, 1], strides = [1, 1]} : vector<64x5xf32> to vector<64x1xf32>
    %cst_38 = arith.constant 0.000000e+00 : f32
    %54 = vector.broadcast %cst_38 : f32 to vector<64x1xf32>
    %55 = arith.cmpf one, %53, %54 : vector<64x1xf32>
    %cst_39 = arith.constant 0.000000e+00 : f32
    %56 = vector.shape_cast %55 : vector<64x1xi1> to vector<64x1xi1>
    %57 = vector.broadcast %56 : vector<64x1xi1> to vector<64x128xi1>
    %58 = vector.broadcast %cst_39 : f32 to vector<64x128xf32>
    %59 = arith.select %57, %26, %58 : vector<64x128xi1>, vector<64x128xf32>
    %cst_40 = arith.constant dense<0xFF800000> : vector<128xf32>
    %60 = vector.multi_reduction <maximumf>, %59, %cst_40 [0] : vector<64x128xf32> to vector<128xf32>
    %61 = vector.shape_cast %60 : vector<128xf32> to vector<1x128xf32>
    %cst_41 = arith.constant dense<0x7F800000> : vector<128xf32>
    %62 = vector.multi_reduction <minimumf>, %59, %cst_41 [0] : vector<64x128xf32> to vector<128xf32>
    %63 = vector.shape_cast %62 : vector<128xf32> to vector<1x128xf32>
    %c0_42 = arith.constant 0 : index
    %c128 = arith.constant 128 : index
    %64 = vector.load %arg10[%c0_42, %c128] : memref<2x2048xf32, #tpu.memory_space<vmem>>, vector<1x128xf32>
    %65 = arith.maximumf %64, %61 : vector<1x128xf32>
    %c0_43 = arith.constant 0 : index
    %c128_44 = arith.constant 128 : index
    %66 = vector.load %arg10[%c0_43, %c128_44] : memref<2x2048xf32, #tpu.memory_space<vmem>>, vector<1x128xf32>
    tpu.vector_store %arg10[%c0_43, %c128_44], %65 {strides = array<i32>} : memref<2x2048xf32, #tpu.memory_space<vmem>>, vector<1x128xf32>,
    %c0_45 = arith.constant 0 : index
    %c896 = arith.constant 896 : index
    %67 = vector.load %arg10[%c0_45, %c896] : memref<2x2048xf32, #tpu.memory_space<vmem>>, vector<1x128xf32>
    %68 = arith.minimumf %67, %63 : vector<1x128xf32>
    %c0_46 = arith.constant 0 : index
    %c896_47 = arith.constant 896 : index
    %69 = vector.load %arg10[%c0_46, %c896_47] : memref<2x2048xf32, #tpu.memory_space<vmem>>, vector<1x128xf32>
    tpu.vector_store %arg10[%c0_46, %c896_47], %68 {strides = array<i32>} : memref<2x2048xf32, #tpu.memory_space<vmem>>, vector<1x128xf32>,
    %70 = vector.extract_strided_slice %29 {offsets = [0, 1], sizes = [64, 1], strides = [1, 1]} : vector<64x5xf32> to vector<64x1xf32>
    %cst_48 = arith.constant 0.000000e+00 : f32
    %71 = vector.broadcast %cst_48 : f32 to vector<64x1xf32>
    %72 = arith.cmpf one, %70, %71 : vector<64x1xf32>
    %cst_49 = arith.constant 0.000000e+00 : f32
    %73 = vector.shape_cast %72 : vector<64x1xi1> to vector<64x1xi1>
    %74 = vector.broadcast %73 : vector<64x1xi1> to vector<64x128xi1>
    %75 = vector.broadcast %cst_49 : f32 to vector<64x128xf32>
    %76 = arith.select %74, %26, %75 : vector<64x128xi1>, vector<64x128xf32>
    %cst_50 = arith.constant dense<0xFF800000> : vector<128xf32>
    %77 = vector.multi_reduction <maximumf>, %76, %cst_50 [0] : vector<64x128xf32> to vector<128xf32>
    %78 = vector.shape_cast %77 : vector<128xf32> to vector<1x128xf32>
    %cst_51 = arith.constant dense<0x7F800000> : vector<128xf32>
    %79 = vector.multi_reduction <minimumf>, %76, %cst_51 [0] : vector<64x128xf32> to vector<128xf32>
    %80 = vector.shape_cast %79 : vector<128xf32> to vector<1x128xf32>
    %c0_52 = arith.constant 0 : index
    %c256 = arith.constant 256 : index
    %81 = vector.load %arg10[%c0_52, %c256] : memref<2x2048xf32, #tpu.memory_space<vmem>>, vector<1x128xf32>
    %82 = arith.maximumf %81, %78 : vector<1x128xf32>
    %c0_53 = arith.constant 0 : index
    %c256_54 = arith.constant 256 : index
    %83 = vector.load %arg10[%c0_53, %c256_54] : memref<2x2048xf32, #tpu.memory_space<vmem>>, vector<1x128xf32>
    tpu.vector_store %arg10[%c0_53, %c256_54], %82 {strides = array<i32>} : memref<2x2048xf32, #tpu.memory_space<vmem>>, vector<1x128xf32>,
    %c0_55 = arith.constant 0 : index
    %c1024 = arith.constant 1024 : index
    %84 = vector.load %arg10[%c0_55, %c1024] : memref<2x2048xf32, #tpu.memory_space<vmem>>, vector<1x128xf32>
    %85 = arith.minimumf %84, %80 : vector<1x128xf32>
    %c0_56 = arith.constant 0 : index
    %c1024_57 = arith.constant 1024 : index
    %86 = vector.load %arg10[%c0_56, %c1024_57] : memref<2x2048xf32, #tpu.memory_space<vmem>>, vector<1x128xf32>
    tpu.vector_store %arg10[%c0_56, %c1024_57], %85 {strides = array<i32>} : memref<2x2048xf32, #tpu.memory_space<vmem>>, vector<1x128xf32>,
    %87 = vector.extract_strided_slice %29 {offsets = [0, 2], sizes = [64, 1], strides = [1, 1]} : vector<64x5xf32> to vector<64x1xf32>
    %cst_58 = arith.constant 0.000000e+00 : f32
    %88 = vector.broadcast %cst_58 : f32 to vector<64x1xf32>
    %89 = arith.cmpf one, %87, %88 : vector<64x1xf32>
    %cst_59 = arith.constant 0.000000e+00 : f32
    %90 = vector.shape_cast %89 : vector<64x1xi1> to vector<64x1xi1>
    %91 = vector.broadcast %90 : vector<64x1xi1> to vector<64x128xi1>
    %92 = vector.broadcast %cst_59 : f32 to vector<64x128xf32>
    %93 = arith.select %91, %26, %92 : vector<64x128xi1>, vector<64x128xf32>
    %cst_60 = arith.constant dense<0xFF800000> : vector<128xf32>
    %94 = vector.multi_reduction <maximumf>, %93, %cst_60 [0] : vector<64x128xf32> to vector<128xf32>
    %95 = vector.shape_cast %94 : vector<128xf32> to vector<1x128xf32>
    %cst_61 = arith.constant dense<0x7F800000> : vector<128xf32>
    %96 = vector.multi_reduction <minimumf>, %93, %cst_61 [0] : vector<64x128xf32> to vector<128xf32>
    %97 = vector.shape_cast %96 : vector<128xf32> to vector<1x128xf32>
    %c0_62 = arith.constant 0 : index
    %c384 = arith.constant 384 : index
    %98 = vector.load %arg10[%c0_62, %c384] : memref<2x2048xf32, #tpu.memory_space<vmem>>, vector<1x128xf32>
    %99 = arith.maximumf %98, %95 : vector<1x128xf32>
    %c0_63 = arith.constant 0 : index
    %c384_64 = arith.constant 384 : index
    %100 = vector.load %arg10[%c0_63, %c384_64] : memref<2x2048xf32, #tpu.memory_space<vmem>>, vector<1x128xf32>
    tpu.vector_store %arg10[%c0_63, %c384_64], %99 {strides = array<i32>} : memref<2x2048xf32, #tpu.memory_space<vmem>>, vector<1x128xf32>,
    %c0_65 = arith.constant 0 : index
    %c1152 = arith.constant 1152 : index
    %101 = vector.load %arg10[%c0_65, %c1152] : memref<2x2048xf32, #tpu.memory_space<vmem>>, vector<1x128xf32>
    %102 = arith.minimumf %101, %97 : vector<1x128xf32>
    %c0_66 = arith.constant 0 : index
    %c1152_67 = arith.constant 1152 : index
    %103 = vector.load %arg10[%c0_66, %c1152_67] : memref<2x2048xf32, #tpu.memory_space<vmem>>, vector<1x128xf32>
    tpu.vector_store %arg10[%c0_66, %c1152_67], %102 {strides = array<i32>} : memref<2x2048xf32, #tpu.memory_space<vmem>>, vector<1x128xf32>,
    %104 = vector.extract_strided_slice %29 {offsets = [0, 3], sizes = [64, 1], strides = [1, 1]} : vector<64x5xf32> to vector<64x1xf32>
    %cst_68 = arith.constant 0.000000e+00 : f32
    %105 = vector.broadcast %cst_68 : f32 to vector<64x1xf32>
    %106 = arith.cmpf one, %104, %105 : vector<64x1xf32>
    %cst_69 = arith.constant 0.000000e+00 : f32
    %107 = vector.shape_cast %106 : vector<64x1xi1> to vector<64x1xi1>
    %108 = vector.broadcast %107 : vector<64x1xi1> to vector<64x128xi1>
    %109 = vector.broadcast %cst_69 : f32 to vector<64x128xf32>
    %110 = arith.select %108, %26, %109 : vector<64x128xi1>, vector<64x128xf32>
    %cst_70 = arith.constant dense<0xFF800000> : vector<128xf32>
    %111 = vector.multi_reduction <maximumf>, %110, %cst_70 [0] : vector<64x128xf32> to vector<128xf32>
    %112 = vector.shape_cast %111 : vector<128xf32> to vector<1x128xf32>
    %cst_71 = arith.constant dense<0x7F800000> : vector<128xf32>
    %113 = vector.multi_reduction <minimumf>, %110, %cst_71 [0] : vector<64x128xf32> to vector<128xf32>
    %114 = vector.shape_cast %113 : vector<128xf32> to vector<1x128xf32>
    %c0_72 = arith.constant 0 : index
    %c512 = arith.constant 512 : index
    %115 = vector.load %arg10[%c0_72, %c512] : memref<2x2048xf32, #tpu.memory_space<vmem>>, vector<1x128xf32>
    %116 = arith.maximumf %115, %112 : vector<1x128xf32>
    %c0_73 = arith.constant 0 : index
    %c512_74 = arith.constant 512 : index
    %117 = vector.load %arg10[%c0_73, %c512_74] : memref<2x2048xf32, #tpu.memory_space<vmem>>, vector<1x128xf32>
    tpu.vector_store %arg10[%c0_73, %c512_74], %116 {strides = array<i32>} : memref<2x2048xf32, #tpu.memory_space<vmem>>, vector<1x128xf32>,
    %c0_75 = arith.constant 0 : index
    %c1280 = arith.constant 1280 : index
    %118 = vector.load %arg10[%c0_75, %c1280] : memref<2x2048xf32, #tpu.memory_space<vmem>>, vector<1x128xf32>
    %119 = arith.minimumf %118, %114 : vector<1x128xf32>
    %c0_76 = arith.constant 0 : index
    %c1280_77 = arith.constant 1280 : index
    %120 = vector.load %arg10[%c0_76, %c1280_77] : memref<2x2048xf32, #tpu.memory_space<vmem>>, vector<1x128xf32>
    tpu.vector_store %arg10[%c0_76, %c1280_77], %119 {strides = array<i32>} : memref<2x2048xf32, #tpu.memory_space<vmem>>, vector<1x128xf32>,
    %121 = vector.extract_strided_slice %29 {offsets = [0, 4], sizes = [64, 1], strides = [1, 1]} : vector<64x5xf32> to vector<64x1xf32>
    %cst_78 = arith.constant 0.000000e+00 : f32
    %122 = vector.broadcast %cst_78 : f32 to vector<64x1xf32>
    %123 = arith.cmpf one, %121, %122 : vector<64x1xf32>
    %cst_79 = arith.constant 0.000000e+00 : f32
    %124 = vector.shape_cast %123 : vector<64x1xi1> to vector<64x1xi1>
    %125 = vector.broadcast %124 : vector<64x1xi1> to vector<64x128xi1>
    %126 = vector.broadcast %cst_79 : f32 to vector<64x128xf32>
    %127 = arith.select %125, %26, %126 : vector<64x128xi1>, vector<64x128xf32>
    %cst_80 = arith.constant dense<0xFF800000> : vector<128xf32>
    %128 = vector.multi_reduction <maximumf>, %127, %cst_80 [0] : vector<64x128xf32> to vector<128xf32>
    %129 = vector.shape_cast %128 : vector<128xf32> to vector<1x128xf32>
    %cst_81 = arith.constant dense<0x7F800000> : vector<128xf32>
    %130 = vector.multi_reduction <minimumf>, %127, %cst_81 [0] : vector<64x128xf32> to vector<128xf32>
    %131 = vector.shape_cast %130 : vector<128xf32> to vector<1x128xf32>
    %c0_82 = arith.constant 0 : index
    %c640 = arith.constant 640 : index
    %132 = vector.load %arg10[%c0_82, %c640] : memref<2x2048xf32, #tpu.memory_space<vmem>>, vector<1x128xf32>
    %133 = arith.maximumf %132, %129 : vector<1x128xf32>
    %c0_83 = arith.constant 0 : index
    %c640_84 = arith.constant 640 : index
    %134 = vector.load %arg10[%c0_83, %c640_84] : memref<2x2048xf32, #tpu.memory_space<vmem>>, vector<1x128xf32>
    tpu.vector_store %arg10[%c0_83, %c640_84], %133 {strides = array<i32>} : memref<2x2048xf32, #tpu.memory_space<vmem>>, vector<1x128xf32>,
    %c0_85 = arith.constant 0 : index
    %c1408 = arith.constant 1408 : index
    %135 = vector.load %arg10[%c0_85, %c1408] : memref<2x2048xf32, #tpu.memory_space<vmem>>, vector<1x128xf32>
    %136 = arith.minimumf %135, %131 : vector<1x128xf32>
    %c0_86 = arith.constant 0 : index
    %c1408_87 = arith.constant 1408 : index
    %137 = vector.load %arg10[%c0_86, %c1408_87] : memref<2x2048xf32, #tpu.memory_space<vmem>>, vector<1x128xf32>
    tpu.vector_store %arg10[%c0_86, %c1408_87], %136 {strides = array<i32>} : memref<2x2048xf32, #tpu.memory_space<vmem>>, vector<1x128xf32>,
    %c1 = arith.constant 1 : index
    %c0_88 = arith.constant 0 : index
    %c0_89 = arith.constant 0 : index
    %138 = vector.load %arg2[%c1, %c0_88, %c0_89] : memref<2x64x13xbf16, #tpu.memory_space<vmem>>, vector<1x64x13xbf16>
    %139 = vector.shape_cast %138 : vector<1x64x13xbf16> to vector<64x13xbf16>
    %cst_90 = arith.constant dense<0.000000e+00> : vector<64x128xf32>
    %140 = tpu.matmul %139, %3, %cst_90 {dimension_numbers = #tpu.dot_dimension_numbers<[1], [0], [0], [1], [0, 0, 1, 1], [], []>} : vector<64x13xbf16>, vector<13x128xbf16>, vector<64x128xf32> -> vector<64x128xf32>
    %141 = vector.broadcast %4 : vector<1x128xf32> to vector<64x128xf32>
    %142 = arith.addf %140, %141 : vector<64x128xf32>
    %cst_91 = arith.constant 0.000000e+00 : f32
    %143 = vector.broadcast %cst_91 : f32 to vector<64x128xf32>
    %144 = arith.maximumf %142, %143 : vector<64x128xf32>
    %145 = arith.truncf %144 : vector<64x128xf32> to vector<64x128xbf16>
    %cst_92 = arith.constant dense<0.000000e+00> : vector<64x256xf32>
    %146 = tpu.matmul %145, %5, %cst_92 {dimension_numbers = #tpu.dot_dimension_numbers<[1], [0], [0], [1], [0, 0, 1, 1], [], []>} : vector<64x128xbf16>, vector<128x256xbf16>, vector<64x256xf32> -> vector<64x256xf32>
    %147 = vector.broadcast %6 : vector<1x256xf32> to vector<64x256xf32>
    %148 = arith.addf %146, %147 : vector<64x256xf32>
    %cst_93 = arith.constant 0.000000e+00 : f32
    %149 = vector.broadcast %cst_93 : f32 to vector<64x256xf32>
    %150 = arith.maximumf %148, %149 : vector<64x256xf32>
    %151 = arith.truncf %150 : vector<64x256xf32> to vector<64x256xbf16>
    %cst_94 = arith.constant dense<0.000000e+00> : vector<64x640xf32>
    %152 = tpu.matmul %151, %7, %cst_94 {dimension_numbers = #tpu.dot_dimension_numbers<[1], [0], [0], [1], [0, 0, 1, 1], [], []>} : vector<64x256xbf16>, vector<256x640xbf16>, vector<64x640xf32> -> vector<64x640xf32>
    %153 = vector.broadcast %8 : vector<1x640xf32> to vector<64x640xf32>
    %154 = arith.addf %152, %153 : vector<64x640xf32>
    %155 = vector.extract_strided_slice %154 {offsets = [0, 0], sizes = [64, 128], strides = [1, 1]} : vector<64x640xf32> to vector<64x128xf32>
    %156 = vector.extract_strided_slice %154 {offsets = [0, 128], sizes = [64, 512], strides = [1, 1]} : vector<64x640xf32> to vector<64x512xf32>
    %c1_95 = arith.constant 1 : index
    %c0_96 = arith.constant 0 : index
    %c0_97 = arith.constant 0 : index
    %157 = vector.load %arg3[%c1_95, %c0_96, %c0_97] : memref<2x64x5xf32, #tpu.memory_space<vmem>>, vector<1x64x5xf32>
    %158 = vector.shape_cast %157 : vector<1x64x5xf32> to vector<64x5xf32>
    %cst_98 = arith.constant dense<0xFF800000> : vector<512xf32>
    %159 = vector.multi_reduction <maximumf>, %156, %cst_98 [0] : vector<64x512xf32> to vector<512xf32>
    %160 = vector.shape_cast %159 : vector<512xf32> to vector<1x512xf32>
    %c1_99 = arith.constant 1 : index
    %c1536_100 = arith.constant 1536 : index
    %161 = vector.load %arg10[%c1_99, %c1536_100] : memref<2x2048xf32, #tpu.memory_space<vmem>>, vector<1x512xf32>
    %162 = arith.maximumf %161, %160 : vector<1x512xf32>
    %c1_101 = arith.constant 1 : index
    %c1536_102 = arith.constant 1536 : index
    %163 = vector.load %arg10[%c1_101, %c1536_102] : memref<2x2048xf32, #tpu.memory_space<vmem>>, vector<1x512xf32>
    tpu.vector_store %arg10[%c1_101, %c1536_102], %162 {strides = array<i32>} : memref<2x2048xf32, #tpu.memory_space<vmem>>, vector<1x512xf32>,
    %cst_103 = arith.constant dense<0.000000e+00> : vector<64xf32>
    %164 = vector.multi_reduction <add>, %158, %cst_103 [1] : vector<64x5xf32> to vector<64xf32>
    %165 = vector.shape_cast %164 : vector<64xf32> to vector<64x1xf32>
    %cst_104 = arith.constant 0.899999976 : f32
    %166 = vector.broadcast %cst_104 : f32 to vector<64x1xf32>
    %167 = arith.cmpf olt, %165, %166 : vector<64x1xf32>
    %cst_105 = arith.constant 0.000000e+00 : f32
    %168 = vector.shape_cast %167 : vector<64x1xi1> to vector<64x1xi1>
    %169 = vector.broadcast %168 : vector<64x1xi1> to vector<64x128xi1>
    %170 = vector.broadcast %cst_105 : f32 to vector<64x128xf32>
    %171 = arith.select %169, %155, %170 : vector<64x128xi1>, vector<64x128xf32>
    %cst_106 = arith.constant dense<0xFF800000> : vector<128xf32>
    %172 = vector.multi_reduction <maximumf>, %171, %cst_106 [0] : vector<64x128xf32> to vector<128xf32>
    %173 = vector.shape_cast %172 : vector<128xf32> to vector<1x128xf32>
    %cst_107 = arith.constant dense<0x7F800000> : vector<128xf32>
    %174 = vector.multi_reduction <minimumf>, %171, %cst_107 [0] : vector<64x128xf32> to vector<128xf32>
    %175 = vector.shape_cast %174 : vector<128xf32> to vector<1x128xf32>
    %c1_108 = arith.constant 1 : index
    %c0_109 = arith.constant 0 : index
    %176 = vector.load %arg10[%c1_108, %c0_109] : memref<2x2048xf32, #tpu.memory_space<vmem>>, vector<1x128xf32>
    %177 = arith.maximumf %176, %173 : vector<1x128xf32>
    %c1_110 = arith.constant 1 : index
    %c0_111 = arith.constant 0 : index
    %178 = vector.load %arg10[%c1_110, %c0_111] : memref<2x2048xf32, #tpu.memory_space<vmem>>, vector<1x128xf32>
    tpu.vector_store %arg10[%c1_110, %c0_111], %177 {strides = array<i32>} : memref<2x2048xf32, #tpu.memory_space<vmem>>, vector<1x128xf32>,
    %c1_112 = arith.constant 1 : index
    %c768_113 = arith.constant 768 : index
    %179 = vector.load %arg10[%c1_112, %c768_113] : memref<2x2048xf32, #tpu.memory_space<vmem>>, vector<1x128xf32>
    %180 = arith.minimumf %179, %175 : vector<1x128xf32>
    %c1_114 = arith.constant 1 : index
    %c768_115 = arith.constant 768 : index
    %181 = vector.load %arg10[%c1_114, %c768_115] : memref<2x2048xf32, #tpu.memory_space<vmem>>, vector<1x128xf32>
    tpu.vector_store %arg10[%c1_114, %c768_115], %180 {strides = array<i32>} : memref<2x2048xf32, #tpu.memory_space<vmem>>, vector<1x128xf32>,
    %182 = vector.extract_strided_slice %158 {offsets = [0, 0], sizes = [64, 1], strides = [1, 1]} : vector<64x5xf32> to vector<64x1xf32>
    %cst_116 = arith.constant 0.000000e+00 : f32
    %183 = vector.broadcast %cst_116 : f32 to vector<64x1xf32>
    %184 = arith.cmpf one, %182, %183 : vector<64x1xf32>
    %cst_117 = arith.constant 0.000000e+00 : f32
    %185 = vector.shape_cast %184 : vector<64x1xi1> to vector<64x1xi1>
    %186 = vector.broadcast %185 : vector<64x1xi1> to vector<64x128xi1>
    %187 = vector.broadcast %cst_117 : f32 to vector<64x128xf32>
    %188 = arith.select %186, %155, %187 : vector<64x128xi1>, vector<64x128xf32>
    %cst_118 = arith.constant dense<0xFF800000> : vector<128xf32>
    %189 = vector.multi_reduction <maximumf>, %188, %cst_118 [0] : vector<64x128xf32> to vector<128xf32>
    %190 = vector.shape_cast %189 : vector<128xf32> to vector<1x128xf32>
    %cst_119 = arith.constant dense<0x7F800000> : vector<128xf32>
    %191 = vector.multi_reduction <minimumf>, %188, %cst_119 [0] : vector<64x128xf32> to vector<128xf32>
    %192 = vector.shape_cast %191 : vector<128xf32> to vector<1x128xf32>
    %c1_120 = arith.constant 1 : index
    %c128_121 = arith.constant 128 : index
    %193 = vector.load %arg10[%c1_120, %c128_121] : memref<2x2048xf32, #tpu.memory_space<vmem>>, vector<1x128xf32>
    %194 = arith.maximumf %193, %190 : vector<1x128xf32>
    %c1_122 = arith.constant 1 : index
    %c128_123 = arith.constant 128 : index
    %195 = vector.load %arg10[%c1_122, %c128_123] : memref<2x2048xf32, #tpu.memory_space<vmem>>, vector<1x128xf32>
    tpu.vector_store %arg10[%c1_122, %c128_123], %194 {strides = array<i32>} : memref<2x2048xf32, #tpu.memory_space<vmem>>, vector<1x128xf32>,
    %c1_124 = arith.constant 1 : index
    %c896_125 = arith.constant 896 : index
    %196 = vector.load %arg10[%c1_124, %c896_125] : memref<2x2048xf32, #tpu.memory_space<vmem>>, vector<1x128xf32>
    %197 = arith.minimumf %196, %192 : vector<1x128xf32>
    %c1_126 = arith.constant 1 : index
    %c896_127 = arith.constant 896 : index
    %198 = vector.load %arg10[%c1_126, %c896_127] : memref<2x2048xf32, #tpu.memory_space<vmem>>, vector<1x128xf32>
    tpu.vector_store %arg10[%c1_126, %c896_127], %197 {strides = array<i32>} : memref<2x2048xf32, #tpu.memory_space<vmem>>, vector<1x128xf32>,
    %199 = vector.extract_strided_slice %158 {offsets = [0, 1], sizes = [64, 1], strides = [1, 1]} : vector<64x5xf32> to vector<64x1xf32>
    %cst_128 = arith.constant 0.000000e+00 : f32
    %200 = vector.broadcast %cst_128 : f32 to vector<64x1xf32>
    %201 = arith.cmpf one, %199, %200 : vector<64x1xf32>
    %cst_129 = arith.constant 0.000000e+00 : f32
    %202 = vector.shape_cast %201 : vector<64x1xi1> to vector<64x1xi1>
    %203 = vector.broadcast %202 : vector<64x1xi1> to vector<64x128xi1>
    %204 = vector.broadcast %cst_129 : f32 to vector<64x128xf32>
    %205 = arith.select %203, %155, %204 : vector<64x128xi1>, vector<64x128xf32>
    %cst_130 = arith.constant dense<0xFF800000> : vector<128xf32>
    %206 = vector.multi_reduction <maximumf>, %205, %cst_130 [0] : vector<64x128xf32> to vector<128xf32>
    %207 = vector.shape_cast %206 : vector<128xf32> to vector<1x128xf32>
    %cst_131 = arith.constant dense<0x7F800000> : vector<128xf32>
    %208 = vector.multi_reduction <minimumf>, %205, %cst_131 [0] : vector<64x128xf32> to vector<128xf32>
    %209 = vector.shape_cast %208 : vector<128xf32> to vector<1x128xf32>
    %c1_132 = arith.constant 1 : index
    %c256_133 = arith.constant 256 : index
    %210 = vector.load %arg10[%c1_132, %c256_133] : memref<2x2048xf32, #tpu.memory_space<vmem>>, vector<1x128xf32>
    %211 = arith.maximumf %210, %207 : vector<1x128xf32>
    %c1_134 = arith.constant 1 : index
    %c256_135 = arith.constant 256 : index
    %212 = vector.load %arg10[%c1_134, %c256_135] : memref<2x2048xf32, #tpu.memory_space<vmem>>, vector<1x128xf32>
    tpu.vector_store %arg10[%c1_134, %c256_135], %211 {strides = array<i32>} : memref<2x2048xf32, #tpu.memory_space<vmem>>, vector<1x128xf32>,
    %c1_136 = arith.constant 1 : index
    %c1024_137 = arith.constant 1024 : index
    %213 = vector.load %arg10[%c1_136, %c1024_137] : memref<2x2048xf32, #tpu.memory_space<vmem>>, vector<1x128xf32>
    %214 = arith.minimumf %213, %209 : vector<1x128xf32>
    %c1_138 = arith.constant 1 : index
    %c1024_139 = arith.constant 1024 : index
    %215 = vector.load %arg10[%c1_138, %c1024_139] : memref<2x2048xf32, #tpu.memory_space<vmem>>, vector<1x128xf32>
    tpu.vector_store %arg10[%c1_138, %c1024_139], %214 {strides = array<i32>} : memref<2x2048xf32, #tpu.memory_space<vmem>>, vector<1x128xf32>,
    %216 = vector.extract_strided_slice %158 {offsets = [0, 2], sizes = [64, 1], strides = [1, 1]} : vector<64x5xf32> to vector<64x1xf32>
    %cst_140 = arith.constant 0.000000e+00 : f32
    %217 = vector.broadcast %cst_140 : f32 to vector<64x1xf32>
    %218 = arith.cmpf one, %216, %217 : vector<64x1xf32>
    %cst_141 = arith.constant 0.000000e+00 : f32
    %219 = vector.shape_cast %218 : vector<64x1xi1> to vector<64x1xi1>
    %220 = vector.broadcast %219 : vector<64x1xi1> to vector<64x128xi1>
    %221 = vector.broadcast %cst_141 : f32 to vector<64x128xf32>
    %222 = arith.select %220, %155, %221 : vector<64x128xi1>, vector<64x128xf32>
    %cst_142 = arith.constant dense<0xFF800000> : vector<128xf32>
    %223 = vector.multi_reduction <maximumf>, %222, %cst_142 [0] : vector<64x128xf32> to vector<128xf32>
    %224 = vector.shape_cast %223 : vector<128xf32> to vector<1x128xf32>
    %cst_143 = arith.constant dense<0x7F800000> : vector<128xf32>
    %225 = vector.multi_reduction <minimumf>, %222, %cst_143 [0] : vector<64x128xf32> to vector<128xf32>
    %226 = vector.shape_cast %225 : vector<128xf32> to vector<1x128xf32>
    %c1_144 = arith.constant 1 : index
    %c384_145 = arith.constant 384 : index
    %227 = vector.load %arg10[%c1_144, %c384_145] : memref<2x2048xf32, #tpu.memory_space<vmem>>, vector<1x128xf32>
    %228 = arith.maximumf %227, %224 : vector<1x128xf32>
    %c1_146 = arith.constant 1 : index
    %c384_147 = arith.constant 384 : index
    %229 = vector.load %arg10[%c1_146, %c384_147] : memref<2x2048xf32, #tpu.memory_space<vmem>>, vector<1x128xf32>
    tpu.vector_store %arg10[%c1_146, %c384_147], %228 {strides = array<i32>} : memref<2x2048xf32, #tpu.memory_space<vmem>>, vector<1x128xf32>,
    %c1_148 = arith.constant 1 : index
    %c1152_149 = arith.constant 1152 : index
    %230 = vector.load %arg10[%c1_148, %c1152_149] : memref<2x2048xf32, #tpu.memory_space<vmem>>, vector<1x128xf32>
    %231 = arith.minimumf %230, %226 : vector<1x128xf32>
    %c1_150 = arith.constant 1 : index
    %c1152_151 = arith.constant 1152 : index
    %232 = vector.load %arg10[%c1_150, %c1152_151] : memref<2x2048xf32, #tpu.memory_space<vmem>>, vector<1x128xf32>
    tpu.vector_store %arg10[%c1_150, %c1152_151], %231 {strides = array<i32>} : memref<2x2048xf32, #tpu.memory_space<vmem>>, vector<1x128xf32>,
    %233 = vector.extract_strided_slice %158 {offsets = [0, 3], sizes = [64, 1], strides = [1, 1]} : vector<64x5xf32> to vector<64x1xf32>
    %cst_152 = arith.constant 0.000000e+00 : f32
    %234 = vector.broadcast %cst_152 : f32 to vector<64x1xf32>
    %235 = arith.cmpf one, %233, %234 : vector<64x1xf32>
    %cst_153 = arith.constant 0.000000e+00 : f32
    %236 = vector.shape_cast %235 : vector<64x1xi1> to vector<64x1xi1>
    %237 = vector.broadcast %236 : vector<64x1xi1> to vector<64x128xi1>
    %238 = vector.broadcast %cst_153 : f32 to vector<64x128xf32>
    %239 = arith.select %237, %155, %238 : vector<64x128xi1>, vector<64x128xf32>
    %cst_154 = arith.constant dense<0xFF800000> : vector<128xf32>
    %240 = vector.multi_reduction <maximumf>, %239, %cst_154 [0] : vector<64x128xf32> to vector<128xf32>
    %241 = vector.shape_cast %240 : vector<128xf32> to vector<1x128xf32>
    %cst_155 = arith.constant dense<0x7F800000> : vector<128xf32>
    %242 = vector.multi_reduction <minimumf>, %239, %cst_155 [0] : vector<64x128xf32> to vector<128xf32>
    %243 = vector.shape_cast %242 : vector<128xf32> to vector<1x128xf32>
    %c1_156 = arith.constant 1 : index
    %c512_157 = arith.constant 512 : index
    %244 = vector.load %arg10[%c1_156, %c512_157] : memref<2x2048xf32, #tpu.memory_space<vmem>>, vector<1x128xf32>
    %245 = arith.maximumf %244, %241 : vector<1x128xf32>
    %c1_158 = arith.constant 1 : index
    %c512_159 = arith.constant 512 : index
    %246 = vector.load %arg10[%c1_158, %c512_159] : memref<2x2048xf32, #tpu.memory_space<vmem>>, vector<1x128xf32>
    tpu.vector_store %arg10[%c1_158, %c512_159], %245 {strides = array<i32>} : memref<2x2048xf32, #tpu.memory_space<vmem>>, vector<1x128xf32>,
    %c1_160 = arith.constant 1 : index
    %c1280_161 = arith.constant 1280 : index
    %247 = vector.load %arg10[%c1_160, %c1280_161] : memref<2x2048xf32, #tpu.memory_space<vmem>>, vector<1x128xf32>
    %248 = arith.minimumf %247, %243 : vector<1x128xf32>
    %c1_162 = arith.constant 1 : index
    %c1280_163 = arith.constant 1280 : index
    %249 = vector.load %arg10[%c1_162, %c1280_163] : memref<2x2048xf32, #tpu.memory_space<vmem>>, vector<1x128xf32>
    tpu.vector_store %arg10[%c1_162, %c1280_163], %248 {strides = array<i32>} : memref<2x2048xf32, #tpu.memory_space<vmem>>, vector<1x128xf32>,
    %250 = vector.extract_strided_slice %158 {offsets = [0, 4], sizes = [64, 1], strides = [1, 1]} : vector<64x5xf32> to vector<64x1xf32>
    %cst_164 = arith.constant 0.000000e+00 : f32
    %251 = vector.broadcast %cst_164 : f32 to vector<64x1xf32>
    %252 = arith.cmpf one, %250, %251 : vector<64x1xf32>
    %cst_165 = arith.constant 0.000000e+00 : f32
    %253 = vector.shape_cast %252 : vector<64x1xi1> to vector<64x1xi1>
    %254 = vector.broadcast %253 : vector<64x1xi1> to vector<64x128xi1>
    %255 = vector.broadcast %cst_165 : f32 to vector<64x128xf32>
    %256 = arith.select %254, %155, %255 : vector<64x128xi1>, vector<64x128xf32>
    %cst_166 = arith.constant dense<0xFF800000> : vector<128xf32>
    %257 = vector.multi_reduction <maximumf>, %256, %cst_166 [0] : vector<64x128xf32> to vector<128xf32>
    %258 = vector.shape_cast %257 : vector<128xf32> to vector<1x128xf32>
    %cst_167 = arith.constant dense<0x7F800000> : vector<128xf32>
    %259 = vector.multi_reduction <minimumf>, %256, %cst_167 [0] : vector<64x128xf32> to vector<128xf32>
    %260 = vector.shape_cast %259 : vector<128xf32> to vector<1x128xf32>
    %c1_168 = arith.constant 1 : index
    %c640_169 = arith.constant 640 : index
    %261 = vector.load %arg10[%c1_168, %c640_169] : memref<2x2048xf32, #tpu.memory_space<vmem>>, vector<1x128xf32>
    %262 = arith.maximumf %261, %258 : vector<1x128xf32>
    %c1_170 = arith.constant 1 : index
    %c640_171 = arith.constant 640 : index
    %263 = vector.load %arg10[%c1_170, %c640_171] : memref<2x2048xf32, #tpu.memory_space<vmem>>, vector<1x128xf32>
    tpu.vector_store %arg10[%c1_170, %c640_171], %262 {strides = array<i32>} : memref<2x2048xf32, #tpu.memory_space<vmem>>, vector<1x128xf32>,
    %c1_172 = arith.constant 1 : index
    %c1408_173 = arith.constant 1408 : index
    %264 = vector.load %arg10[%c1_172, %c1408_173] : memref<2x2048xf32, #tpu.memory_space<vmem>>, vector<1x128xf32>
    %265 = arith.minimumf %264, %260 : vector<1x128xf32>
    %c1_174 = arith.constant 1 : index
    %c1408_175 = arith.constant 1408 : index
    %266 = vector.load %arg10[%c1_174, %c1408_175] : memref<2x2048xf32, #tpu.memory_space<vmem>>, vector<1x128xf32>
    tpu.vector_store %arg10[%c1_174, %c1408_175], %265 {strides = array<i32>} : memref<2x2048xf32, #tpu.memory_space<vmem>>, vector<1x128xf32>,
    return
  }
  func.func @transform_0(%arg0: i32, %arg1: i32) -> (i32, i32, i32) {
    %c0_i32 = arith.constant 0 : i32
    %c0_i32_0 = arith.constant 0 : i32
    return %arg0, %arg1, %c0_i32 : i32, i32, i32
  }
  func.func @transform_1(%arg0: i32, %arg1: i32) -> (i32, i32, i32) {
    %c0_i32 = arith.constant 0 : i32
    %c0_i32_0 = arith.constant 0 : i32
    return %arg0, %arg1, %c0_i32 : i32, i32, i32
  }
  func.func @transform_2(%arg0: i32, %arg1: i32) -> (i32, i32) {
    %c0_i32 = arith.constant 0 : i32
    %c0_i32_0 = arith.constant 0 : i32
    %c0_i32_1 = arith.constant 0 : i32
    return %c0_i32, %c0_i32_0 : i32, i32
  }
  func.func @transform_3(%arg0: i32, %arg1: i32) -> (i32, i32) {
    %c0_i32 = arith.constant 0 : i32
    %c0_i32_0 = arith.constant 0 : i32
    %c0_i32_1 = arith.constant 0 : i32
    return %c0_i32, %c0_i32_0 : i32, i32
  }
  func.func @transform_4(%arg0: i32, %arg1: i32) -> (i32, i32) {
    %c0_i32 = arith.constant 0 : i32
    %c0_i32_0 = arith.constant 0 : i32
    %c0_i32_1 = arith.constant 0 : i32
    return %c0_i32, %c0_i32_0 : i32, i32
  }
  func.func @transform_5(%arg0: i32, %arg1: i32) -> (i32, i32) {
    %c0_i32 = arith.constant 0 : i32
    %c0_i32_0 = arith.constant 0 : i32
    %c0_i32_1 = arith.constant 0 : i32
    return %c0_i32, %c0_i32_0 : i32, i32
  }
  func.func @transform_6(%arg0: i32, %arg1: i32) -> (i32, i32) {
    %c0_i32 = arith.constant 0 : i32
    %c0_i32_0 = arith.constant 0 : i32
    %c0_i32_1 = arith.constant 0 : i32
    return %c0_i32, %c0_i32_0 : i32, i32
  }
  func.func @transform_7(%arg0: i32, %arg1: i32) -> (i32, i32) {
    %c0_i32 = arith.constant 0 : i32
    %c0_i32_0 = arith.constant 0 : i32
    %c0_i32_1 = arith.constant 0 : i32
    return %c0_i32, %c0_i32_0 : i32, i32
  }
  func.func @transform_8(%arg0: i32, %arg1: i32) -> (i32, i32) {
    %c0_i32 = arith.constant 0 : i32
    %c0_i32_0 = arith.constant 0 : i32
    return %arg0, %c0_i32 : i32, i32
  }
}

module attributes {stable_mosaic.version = 11 : i64} {
  func.func @head_kernel(%arg0: i32, %arg1: memref<2x2048xf32, #tpu.memory_space<vmem>>, %arg2: memref<2x24xf32, #tpu.memory_space<vmem>>, %arg3: memref<2048x128xbf16, #tpu.memory_space<vmem>>, %arg4: memref<24x128xbf16, #tpu.memory_space<vmem>>, %arg5: memref<1x128xf32, #tpu.memory_space<vmem>>, %arg6: memref<128x64xbf16, #tpu.memory_space<vmem>>, %arg7: memref<1x64xf32, #tpu.memory_space<vmem>>, %arg8: memref<64x64xbf16, #tpu.memory_space<vmem>>, %arg9: memref<1x64xf32, #tpu.memory_space<vmem>>, %arg10: memref<64x128xbf16, #tpu.memory_space<vmem>>, %arg11: memref<1x128xf32, #tpu.memory_space<vmem>>, %arg12: memref<2x128xf32, #tpu.memory_space<vmem>>) attributes {dimension_semantics = [#tpu.dimension_semantics<parallel>], iteration_bounds = array<i64: 1>, scalar_prefetch = 0 : i64, scratch_operands = 0 : i64, tpu.core_type = #tpu.core_type<tc>, window_params = [{transform_indices = @transform_0, window_bounds = array<i64: 2, 2048>}, {transform_indices = @transform_1, window_bounds = array<i64: 2, 24>}, {pipeline_mode = #tpu.pipeline_mode<synchronous>, transform_indices = @transform_2, window_bounds = array<i64: 2048, 128>}, {pipeline_mode = #tpu.pipeline_mode<synchronous>, transform_indices = @transform_3, window_bounds = array<i64: 24, 128>}, {pipeline_mode = #tpu.pipeline_mode<synchronous>, transform_indices = @transform_4, window_bounds = array<i64: 1, 128>}, {pipeline_mode = #tpu.pipeline_mode<synchronous>, transform_indices = @transform_5, window_bounds = array<i64: 128, 64>}, {pipeline_mode = #tpu.pipeline_mode<synchronous>, transform_indices = @transform_6, window_bounds = array<i64: 1, 64>}, {pipeline_mode = #tpu.pipeline_mode<synchronous>, transform_indices = @transform_7, window_bounds = array<i64: 64, 64>}, {pipeline_mode = #tpu.pipeline_mode<synchronous>, transform_indices = @transform_8, window_bounds = array<i64: 1, 64>}, {pipeline_mode = #tpu.pipeline_mode<synchronous>, transform_indices = @transform_9, window_bounds = array<i64: 64, 128>}, {pipeline_mode = #tpu.pipeline_mode<synchronous>, transform_indices = @transform_10, window_bounds = array<i64: 1, 128>}, {transform_indices = @transform_11, window_bounds = array<i64: 2, 128>}]} {
    %c0 = arith.constant 0 : index
    %c0_0 = arith.constant 0 : index
    %0 = vector.load %arg1[%c0, %c0_0] : memref<2x2048xf32, #tpu.memory_space<vmem>>, vector<2x2048xf32>
    %1 = arith.truncf %0 : vector<2x2048xf32> to vector<2x2048xbf16>
    %c0_1 = arith.constant 0 : index
    %c0_2 = arith.constant 0 : index
    %2 = vector.load %arg2[%c0_1, %c0_2] : memref<2x24xf32, #tpu.memory_space<vmem>>, vector<2x24xf32>
    %3 = arith.truncf %2 : vector<2x24xf32> to vector<2x24xbf16>
    %c0_3 = arith.constant 0 : index
    %c0_4 = arith.constant 0 : index
    %4 = vector.load %arg3[%c0_3, %c0_4] : memref<2048x128xbf16, #tpu.memory_space<vmem>>, vector<2048x128xbf16>
    %cst = arith.constant dense<0.000000e+00> : vector<2x128xf32>
    %5 = tpu.matmul %1, %4, %cst {dimension_numbers = #tpu.dot_dimension_numbers<[1], [0], [0], [1], [0, 0, 1, 1], [], []>} : vector<2x2048xbf16>, vector<2048x128xbf16>, vector<2x128xf32> -> vector<2x128xf32>
    %c0_5 = arith.constant 0 : index
    %c0_6 = arith.constant 0 : index
    %6 = vector.load %arg4[%c0_5, %c0_6] : memref<24x128xbf16, #tpu.memory_space<vmem>>, vector<24x128xbf16>
    %cst_7 = arith.constant dense<0.000000e+00> : vector<2x128xf32>
    %7 = tpu.matmul %3, %6, %cst_7 {dimension_numbers = #tpu.dot_dimension_numbers<[1], [0], [0], [1], [0, 0, 1, 1], [], []>} : vector<2x24xbf16>, vector<24x128xbf16>, vector<2x128xf32> -> vector<2x128xf32>
    %8 = arith.addf %5, %7 : vector<2x128xf32>
    %c0_8 = arith.constant 0 : index
    %c0_9 = arith.constant 0 : index
    %9 = vector.load %arg5[%c0_8, %c0_9] : memref<1x128xf32, #tpu.memory_space<vmem>>, vector<1x128xf32>
    %10 = vector.broadcast %9 : vector<1x128xf32> to vector<2x128xf32>
    %11 = arith.addf %8, %10 : vector<2x128xf32>
    %cst_10 = arith.constant 0.000000e+00 : f32
    %12 = vector.broadcast %cst_10 : f32 to vector<2x128xf32>
    %13 = arith.maximumf %11, %12 : vector<2x128xf32>
    %14 = arith.truncf %13 : vector<2x128xf32> to vector<2x128xbf16>
    %c0_11 = arith.constant 0 : index
    %c0_12 = arith.constant 0 : index
    %15 = vector.load %arg6[%c0_11, %c0_12] : memref<128x64xbf16, #tpu.memory_space<vmem>>, vector<128x64xbf16>
    %cst_13 = arith.constant dense<0.000000e+00> : vector<2x64xf32>
    %16 = tpu.matmul %14, %15, %cst_13 {dimension_numbers = #tpu.dot_dimension_numbers<[1], [0], [0], [1], [0, 0, 1, 1], [], []>} : vector<2x128xbf16>, vector<128x64xbf16>, vector<2x64xf32> -> vector<2x64xf32>
    %c0_14 = arith.constant 0 : index
    %c0_15 = arith.constant 0 : index
    %17 = vector.load %arg7[%c0_14, %c0_15] : memref<1x64xf32, #tpu.memory_space<vmem>>, vector<1x64xf32>
    %18 = vector.broadcast %17 : vector<1x64xf32> to vector<2x64xf32>
    %19 = arith.addf %16, %18 : vector<2x64xf32>
    %cst_16 = arith.constant 0.000000e+00 : f32
    %20 = vector.broadcast %cst_16 : f32 to vector<2x64xf32>
    %21 = arith.maximumf %19, %20 : vector<2x64xf32>
    %22 = arith.truncf %21 : vector<2x64xf32> to vector<2x64xbf16>
    %c0_17 = arith.constant 0 : index
    %c0_18 = arith.constant 0 : index
    %23 = vector.load %arg8[%c0_17, %c0_18] : memref<64x64xbf16, #tpu.memory_space<vmem>>, vector<64x64xbf16>
    %cst_19 = arith.constant dense<0.000000e+00> : vector<2x64xf32>
    %24 = tpu.matmul %22, %23, %cst_19 {dimension_numbers = #tpu.dot_dimension_numbers<[1], [0], [0], [1], [0, 0, 1, 1], [], []>} : vector<2x64xbf16>, vector<64x64xbf16>, vector<2x64xf32> -> vector<2x64xf32>
    %c0_20 = arith.constant 0 : index
    %c0_21 = arith.constant 0 : index
    %25 = vector.load %arg9[%c0_20, %c0_21] : memref<1x64xf32, #tpu.memory_space<vmem>>, vector<1x64xf32>
    %26 = vector.broadcast %25 : vector<1x64xf32> to vector<2x64xf32>
    %27 = arith.addf %24, %26 : vector<2x64xf32>
    %cst_22 = arith.constant 0.000000e+00 : f32
    %28 = vector.broadcast %cst_22 : f32 to vector<2x64xf32>
    %29 = arith.maximumf %27, %28 : vector<2x64xf32>
    %30 = arith.truncf %29 : vector<2x64xf32> to vector<2x64xbf16>
    %c0_23 = arith.constant 0 : index
    %c0_24 = arith.constant 0 : index
    %31 = vector.load %arg10[%c0_23, %c0_24] : memref<64x128xbf16, #tpu.memory_space<vmem>>, vector<64x128xbf16>
    %cst_25 = arith.constant dense<0.000000e+00> : vector<2x128xf32>
    %32 = tpu.matmul %30, %31, %cst_25 {dimension_numbers = #tpu.dot_dimension_numbers<[1], [0], [0], [1], [0, 0, 1, 1], [], []>} : vector<2x64xbf16>, vector<64x128xbf16>, vector<2x128xf32> -> vector<2x128xf32>
    %c0_26 = arith.constant 0 : index
    %c0_27 = arith.constant 0 : index
    %33 = vector.load %arg11[%c0_26, %c0_27] : memref<1x128xf32, #tpu.memory_space<vmem>>, vector<1x128xf32>
    %34 = vector.broadcast %33 : vector<1x128xf32> to vector<2x128xf32>
    %35 = arith.addf %32, %34 : vector<2x128xf32>
    %36 = tpu.iota {dimensions = array<i32: 1>} : vector<2x128xi32>
    %c4_i32 = arith.constant 4 : i32
    %37 = vector.broadcast %c4_i32 : i32 to vector<2x128xi32>
    %38 = arith.cmpi sge, %36, %37 : vector<2x128xi32>
    %c8_i32 = arith.constant 8 : i32
    %39 = vector.broadcast %c8_i32 : i32 to vector<2x128xi32>
    %40 = arith.cmpi slt, %36, %39 : vector<2x128xi32>
    %41 = arith.andi %38, %40 : vector<2x128xi1>
    %c9_i32 = arith.constant 9 : i32
    %42 = vector.broadcast %c9_i32 : i32 to vector<2x128xi32>
    %43 = arith.cmpi eq, %36, %42 : vector<2x128xi32>
    %44 = arith.ori %41, %43 : vector<2x128xi1>
    %cst_28 = arith.constant -2.000000e+01 : f32
    %cst_29 = arith.constant 2.000000e+00 : f32
    %45 = vector.broadcast %cst_28 : f32 to vector<2x128xf32>
    %46 = arith.maximumf %45, %35 : vector<2x128xf32>
    %47 = vector.broadcast %cst_29 : f32 to vector<2x128xf32>
    %48 = arith.minimumf %47, %46 : vector<2x128xf32>
    %49 = arith.select %44, %48, %35 : vector<2x128xi1>, vector<2x128xf32>
    %c0_30 = arith.constant 0 : index
    %c0_31 = arith.constant 0 : index
    %50 = vector.load %arg12[%c0_30, %c0_31] : memref<2x128xf32, #tpu.memory_space<vmem>>, vector<2x128xf32>
    tpu.vector_store %arg12[%c0_30, %c0_31], %49 {strides = array<i32>} : memref<2x128xf32, #tpu.memory_space<vmem>>, vector<2x128xf32>,
    return
  }
  func.func @transform_0(%arg0: i32) -> (i32, i32) {
    %c0_i32 = arith.constant 0 : i32
    %c0_i32_0 = arith.constant 0 : i32
    return %arg0, %c0_i32 : i32, i32
  }
  func.func @transform_1(%arg0: i32) -> (i32, i32) {
    %c0_i32 = arith.constant 0 : i32
    %c0_i32_0 = arith.constant 0 : i32
    return %arg0, %c0_i32 : i32, i32
  }
  func.func @transform_2(%arg0: i32) -> (i32, i32) {
    %c0_i32 = arith.constant 0 : i32
    %c0_i32_0 = arith.constant 0 : i32
    %c0_i32_1 = arith.constant 0 : i32
    return %c0_i32, %c0_i32_0 : i32, i32
  }
  func.func @transform_3(%arg0: i32) -> (i32, i32) {
    %c0_i32 = arith.constant 0 : i32
    %c0_i32_0 = arith.constant 0 : i32
    %c0_i32_1 = arith.constant 0 : i32
    return %c0_i32, %c0_i32_0 : i32, i32
  }
  func.func @transform_4(%arg0: i32) -> (i32, i32) {
    %c0_i32 = arith.constant 0 : i32
    %c0_i32_0 = arith.constant 0 : i32
    %c0_i32_1 = arith.constant 0 : i32
    return %c0_i32, %c0_i32_0 : i32, i32
  }
  func.func @transform_5(%arg0: i32) -> (i32, i32) {
    %c0_i32 = arith.constant 0 : i32
    %c0_i32_0 = arith.constant 0 : i32
    %c0_i32_1 = arith.constant 0 : i32
    return %c0_i32, %c0_i32_0 : i32, i32
  }
  func.func @transform_6(%arg0: i32) -> (i32, i32) {
    %c0_i32 = arith.constant 0 : i32
    %c0_i32_0 = arith.constant 0 : i32
    %c0_i32_1 = arith.constant 0 : i32
    return %c0_i32, %c0_i32_0 : i32, i32
  }
  func.func @transform_7(%arg0: i32) -> (i32, i32) {
    %c0_i32 = arith.constant 0 : i32
    %c0_i32_0 = arith.constant 0 : i32
    %c0_i32_1 = arith.constant 0 : i32
    return %c0_i32, %c0_i32_0 : i32, i32
  }
  func.func @transform_8(%arg0: i32) -> (i32, i32) {
    %c0_i32 = arith.constant 0 : i32
    %c0_i32_0 = arith.constant 0 : i32
    %c0_i32_1 = arith.constant 0 : i32
    return %c0_i32, %c0_i32_0 : i32, i32
  }
  func.func @transform_9(%arg0: i32) -> (i32, i32) {
    %c0_i32 = arith.constant 0 : i32
    %c0_i32_0 = arith.constant 0 : i32
    %c0_i32_1 = arith.constant 0 : i32
    return %c0_i32, %c0_i32_0 : i32, i32
  }
  func.func @transform_10(%arg0: i32) -> (i32, i32) {
    %c0_i32 = arith.constant 0 : i32
    %c0_i32_0 = arith.constant 0 : i32
    %c0_i32_1 = arith.constant 0 : i32
    return %c0_i32, %c0_i32_0 : i32, i32
  }
  func.func @transform_11(%arg0: i32) -> (i32, i32) {
    %c0_i32 = arith.constant 0 : i32
    %c0_i32_0 = arith.constant 0 : i32
    return %arg0, %c0_i32 : i32, i32
  }
}

</mosaic_0001>

<bundles_post_ra>
// kernel: gaussian_policy_forward.3
= control target key start
LH: loop header
LB: loop body
LE: loop exit
PB: predicated region body
PF: predicated region fallthrough
CT: control target
= control target key end

     0   :  { %v2414_v0 = vmov 0.0   ;;  %vm421_vm0 = vcmask 1043456   ;;  %vm2415_vm1 = vmmov 0   ;;  %vm417_vm2 = vcmask 195584   ;;  %s2985_s2 = inlined_call_operand.vmem [shape: bf16[2048,128], index: 2, kind: input, shape index: {}]   ;;  %s2986_s3 = inlined_call_operand.vmem [shape: bf16[24,128], index: 3, kind: input, shape index: {}]   ;;  %s2987_s1 = inlined_call_operand.vmem [shape: f32[2,24], index: 1, kind: input, shape index: {}]   ;;  %s2988_s0 = inlined_call_operand.vmem [shape: f32[2,2048], index: 0, kind: input, shape index: {}]   ;;  %s2989_s5 = inlined_call_operand.vmem [shape: bf16[128,64], index: 5, kind: input, shape index: {}]   ;;  %s2990_s7 = inlined_call_operand.vmem [shape: bf16[64,64], index: 7, kind: input, shape index: {}]   ;;  %s2991_s4 = inlined_call_operand.vmem [shape: f32[1,128], index: 4, kind: input, shape index: {}]   ;;  %s2992_s9 = inlined_call_operand.vmem [shape: bf16[64,128], index: 9, kind: input, shape index: {}]   ;;  %s2993_s6 = inlined_call_operand.vmem [shape: f32[1,64], index: 6, kind: input, shape index: {}]   ;;  %s2994_s8 = inlined_call_operand.vmem [shape: f32[1,64], index: 8, kind: input, shape index: {}]   ;;  %s2995_s10 = inlined_call_operand.vmem [shape: f32[1,128], index: 10, kind: input, shape index: {}]   ;;  %s2996_s11 = inlined_call_operand.vmem [shape: f32[2,128], index: 11, kind: output, shape index: {}]  }
   0x1   :  { %2209 = vmatprep.subr.bf16.mxu0 %v2414_v0  ;;  %v2264_v1 = vld [vmem:[%s2985_s2 + $0x78] sm:$0xff]   ;;  %2213 = vmatprep.mubr.msk.bf16.mxu0 %vm2415_vm1, %v2414_v0  ;;  %v2265_v2 = vld [vmem:[%s2986_s3 + $0x8] ss:$0 sps:$4 sm:$0xff]   ;;  %v2267_v5 = vld [vmem:[%s2985_s2 + $0x70] sm:$0xff]   ;;  %v51_v30 = vlaneseq  ;;  %v2416_v38 = vmov 1983009808  }
   0x2   :  { %2014 = vmatprep.subr.bf16.mxu1 %v2264_v1  ;;  %v2266_v3 = vld [vmem:[%s2985_s2 + $0x38] sm:$0xff]   ;;  %v423_v4 = vsel %vm421_vm0, %v2265_v2, 0  ;;  %v2268_v6 = vld [vmem:[%s2986_s3] sm:$0xff]   ;;  %v2269_v7 = vld [vmem:[%s2985_s2 + $0x30] sm:$0xff]   ;;  %v49_v39 = vunpack.c.l.s4 %v2416_v38  ;;  %vm1715_vm3 = vcmask 523264  }
   0x3   :  { %2210 = vmatpush3.bf16.msra.mxu0 %v423_v4  ;;  %2015 = vmatpush3.bf16.msra.mxu1 %v2266_v3  ;;  %v147_v8 = vld [vmem:[%s2987_s1] sm:$0x3]  ;;  %v2270_v9 = vld [vmem:[%s2985_s2 + $0x68] sm:$0xff]   ;;  %v2271_v11 = vld [vmem:[%s2985_s2 + $0xf8] sm:$0xff]   ;;  %v52_v35 = vshrl.u32 %v51_v30, 7 }
   0x4   :  { %2211 = vmatprep.subr.bf16.mxu0 %v2414_v0  ;;  %2016 = vmatprep.subr.bf16.mxu1 %v2267_v5  ;;  %v148_v10 = vpack.c.bf16 %v147_v8, %v147_v8  ;;  %v2272_v12 = vld [vmem:[%s2985_s2 + $0x28] sm:$0xff]   ;;  %v2273_v13 = vld [vmem:[%s2985_s2 + $0xb8] sm:$0xff]   ;;  %v2274_v14 = vld [vmem:[%s2985_s2 + $0x60] sm:$0xff]   ;;  %v50_v42 = vunpack.c.0.s8 %v49_v39 }
   0x5   :  { %v2275_v15 = vld [vmem:[%s2985_s2 + $0xf0] sm:$0xff]   ;;  %v2276_v16 = vld [vmem:[%s2985_s2 + $0x20] sm:$0xff]   ;;  %v2278_v18 = vld [vmem:[%s2985_s2 + $0x58] sm:$0xff]  }
   0x6   :  { %v2277_v17 = vld [vmem:[%s2985_s2 + $0xb0] sm:$0xff]   ;;  %v2279_v19 = vld [vmem:[%s2985_s2 + $0xe8] sm:$0xff]   ;;  %v2280_v20 = vld [vmem:[%s2985_s2 + $0x18] sm:$0xff]   ;;  %v2587_v44 = vsub.s32 %v50_v42, %v52_v35 }
   0x7   :  { %2212 = vmatpush3.bf16.msra.mxu0 %v2268_v6  ;;  %2017 = vmatpush3.bf16.msra.mxu1 %v2269_v7  ;;  %v2281_v21 = vld [vmem:[%s2985_s2 + $0xa8] sm:$0xff]   ;;  %v2282_v22 = vld [vmem:[%s2985_s2 + $0x50] sm:$0xff]   ;;  %v2283_v23 = vld [vmem:[%s2985_s2 + $0xe0] sm:$0xff]  }
   0x8   :  { %2018 = vmatprep.subr.bf16.mxu1 %v2270_v9  ;;  %2036 = vmatprep.subr.bf16.mxu0 %v2271_v11  ;;  %v2284_v24 = vld [vmem:[%s2985_s2 + $0x10] sm:$0xff]   ;;  %v2285_v25 = vld [vmem:[%s2985_s2 + $0xa0] sm:$0xff]   ;;  %v2286_v26 = vld [vmem:[%s2985_s2 + $0x48] sm:$0xff]  }
   0x9   :  { %v2287_v27 = vld [vmem:[%s2985_s2 + $0xd8] sm:$0xff]   ;;  %v2288_v28 = vld [vmem:[%s2985_s2 + $0x8] sm:$0xff]   ;;  %v2290_v31 = vld [vmem:[%s2985_s2 + $0x40] sm:$0xff]  }
   0xa   :  { %2214 = vmatmul.mubr.msk.bf16.vlgmr.msra.gmra.mxu0 %vm417_vm2, %v148_v10  ;;  %v2289_v29 = vld [vmem:[%s2985_s2 + $0x98] sm:$0xff]   ;;  %v2291_v32 = vld [vmem:[%s2985_s2 + $0xd0] sm:$0xff]   ;;  %v2292_v33 = vld [vmem:[%s2985_s2] sm:$0xff]  }
   0xb   :  { %2019 = vmatpush3.bf16.msra.mxu1 %v2272_v12  ;;  %2037 = vmatpush3.bf16.msra.mxu0 %v2273_v13  ;;  %v2293_v34 = vld [vmem:[%s2985_s2 + $0x90] sm:$0xff]   ;;  %v39_v36 = vld [vmem:[%s2988_s0] sm:$0xff]  ;;  %v2295_v37 = vld [vmem:[%s2985_s2 + $0xc8] sm:$0xff]  }
   0xc   :  { %2020 = vmatprep.subr.bf16.mxu1 %v2274_v14  ;;  %2038 = vmatprep.subr.bf16.mxu0 %v2275_v15  ;;  %v2296_v40 = vld [vmem:[%s2985_s2 + $0x178] sm:$0xff]   ;;  %v47_v41 = vcombine.high %v39_v36, %v39_v36  ;;  %v2297_v43 = vld [vmem:[%s2985_s2 + $0x88] sm:$0xff]   ;;  %v2299_v45 = vld [vmem:[%s2985_s2 + $0xc0] sm:$0xff]   ;;  %v54_v46 = vrot.slane %v39_v36, %v2587_v44 }
   0xd   :  { %v2301_v47 = vld [vmem:[%s2985_s2 + $0x80] sm:$0xff]   ;;  %v2298_v50 = vld [vmem:[%s2985_s2 + $0x138] sm:$0xff]   ;;  %v2300_v56 = vld [vmem:[%s2985_s2 + $0x170] sm:$0xff]  }
   0xe   :  { %v61_v48 = vrot.slane %v47_v41, %v2587_v44  ;;  %v62_v49 = vcombine.high %v54_v46, %v54_v46  ;;  %v131_v52 = vpack.c.bf16 %v54_v46, %v54_v46  ;;  %v2304_v54 = vld [vmem:[%s2985_s2 + $0x1f8] sm:$0xff]   ;;  %v2302_v59 = vld [vmem:[%s2985_s2 + $0x130] sm:$0xff]   ;;  %v2303_v61 = vld [vmem:[%s2985_s2 + $0x168] sm:$0xff]  }
   0xf   :  { %2021 = vmatpush3.bf16.msra.mxu1 %v2276_v16  ;;  %2039 = vmatpush3.bf16.msra.mxu0 %v2277_v17  ;;  %v2306_v58 = vld [vmem:[%s2985_s2 + $0x1b8] sm:$0xff]   ;;  %v2308_v60 = vld [vmem:[%s2985_s2 + $0x1f0] sm:$0xff]   ;;  %v2305_v63 = vld [vmem:[%s2985_s2 + $0x128] sm:$0xff]  }
  0x10   :  { %2022 = vmatprep.subr.bf16.mxu1 %v2278_v18  ;;  %2040 = vmatprep.subr.bf16.mxu0 %v2279_v19  ;;  %v63_v51 = vcombine.high %v61_v48, %v61_v48  ;;  %v133_v53 = vpack.c.bf16 %v61_v48, %v61_v48  ;;  %v132_v55 = vpack.c.bf16 %v62_v49, %v62_v49  ;;  %v2310_v62 = vld [vmem:[%s2985_s2 + $0x1b0] sm:$0xff]   ;;  %v2312_v1 = vld [vmem:[%s2985_s2 + $0x1e8] sm:$0xff]   ;;  %v2307_v2 = vld [vmem:[%s2985_s2 + $0x160] sm:$0xff]  }
  0x11   :  { %v2314_v3 = vld [vmem:[%s2985_s2 + $0x1a8] sm:$0xff]   ;;  %v2309_v4 = vld [vmem:[%s2985_s2 + $0x120] sm:$0xff]   ;;  %v2311_v6 = vld [vmem:[%s2985_s2 + $0x158] sm:$0xff]  }
  0x12   :  { %v134_v57 = vpack.c.bf16 %v63_v51, %v63_v51  ;;  %1265 = vmatprep.mubr.bf16.mxu1 %v132_v55  ;;  %v2316_v5 = vld [vmem:[%s2985_s2 + $0x1e0] sm:$0xff]   ;;  %v2313_v8 = vld [vmem:[%s2985_s2 + $0x118] sm:$0xff]   ;;  %v2315_v10 = vld [vmem:[%s2985_s2 + $0x150] sm:$0xff]  }
  0x13   :  { %2023 = vmatpush3.bf16.msra.mxu1 %v2280_v20  ;;  %2041 = vmatpush3.bf16.msra.mxu0 %v2281_v21  ;;  %v2318_v7 = vld [vmem:[%s2985_s2 + $0x1a0] sm:$0xff]   ;;  %v2320_v9 = vld [vmem:[%s2985_s2 + $0x1d8] sm:$0xff]   ;;  %v2317_v12 = vld [vmem:[%s2985_s2 + $0x110] sm:$0xff]  }
  0x14   :  { %2024 = vmatprep.subr.bf16.mxu1 %v2282_v22  ;;  %2042 = vmatprep.subr.bf16.mxu0 %v2283_v23  ;;  %v2322_v11 = vld [vmem:[%s2985_s2 + $0x198] sm:$0xff]   ;;  %v2324_v13 = vld [vmem:[%s2985_s2 + $0x1d0] sm:$0xff]   ;;  %v2319_v14 = vld [vmem:[%s2985_s2 + $0x148] sm:$0xff]  }
  0x15   :  { %1305 = vmatprep.mubr.bf16.mxu0 %v134_v57  ;;  %v2326_v15 = vld [vmem:[%s2985_s2 + $0x190] sm:$0xff]   ;;  %v40_v16 = vld [vmem:[%s2988_s0 + $0x8] sm:$0xff]  ;;  %v2323_v21 = vld [vmem:[%s2985_s2 + $0x140] sm:$0xff]  }
  0x16   :  { %v71_v17 = vrot.slane %v40_v16, %v2587_v44  ;;  %v2327_v18 = vld [vmem:[%s2985_s2 + $0x1c8] sm:$0xff]   ;;  %v64_v19 = vcombine.high %v40_v16, %v40_v16  ;;  %v2337_v35 = vld [vmem:[%s2985_s2 + $0x2f8] sm:$0xff]   ;;  %v2332_v36 = vld [vmem:[%s2985_s2 + $0x270] sm:$0xff]  }
  0x17   :  { %2025 = vmatpush3.bf16.msra.mxu1 %v2284_v24  ;;  %2043 = vmatpush3.bf16.msra.mxu0 %v2285_v25  ;;  %v2321_v20 = vld [vmem:[%s2985_s2 + $0x108] sm:$0xff]   ;;  %v2339_v38 = vld [vmem:[%s2985_s2 + $0x2b8] sm:$0xff]   ;;  %v2334_v39 = vld [vmem:[%s2985_s2 + $0x230] sm:$0xff]  }
  0x18   :  { %2026 = vmatprep.subr.bf16.mxu1 %v2286_v26  ;;  %2044 = vmatprep.subr.bf16.mxu0 %v2287_v27  ;;  %v79_v22 = vcombine.high %v71_v17, %v71_v17  ;;  %v78_v23 = vrot.slane %v64_v19, %v2587_v44  ;;  %v2329_v24 = vld [vmem:[%s2985_s2 + $0x188] sm:$0xff]   ;;  %v2331_v26 = vld [vmem:[%s2985_s2 + $0x1c0] sm:$0xff]   ;;  %v2343_v42 = vld [vmem:[%s2985_s2 + $0x2b0] sm:$0xff]  }
  0x19   :  { %v2336_v41 = vld [vmem:[%s2985_s2 + $0x268] sm:$0xff]   ;;  %v2340_v46 = vld [vmem:[%s2985_s2 + $0x260] sm:$0xff]   ;;  %v2355_v55 = vld [vmem:[%s2985_s2 + $0x298] sm:$0xff]  }
  0x1a   :  { %v136_v25 = vpack.c.bf16 %v79_v22, %v79_v22  ;;  %v80_v27 = vcombine.high %v78_v23, %v78_v23  ;;  %v2342_v48 = vld [vmem:[%s2985_s2 + $0x220] sm:$0xff]   ;;  %v2357_v57 = vld [vmem:[%s2985_s2 + $0x2d0] sm:$0xff]  }
  0x1b   :  { %2027 = vmatpush3.bf16.msra.mxu1 %v2288_v28  ;;  %2045 = vmatpush3.bf16.msra.mxu0 %v2289_v29  ;;  %v2325_v28 = vld [vmem:[%s2985_s2 + $0x100] sm:$0xff]   ;;  %v2328_v29 = vld [vmem:[%s2985_s2 + $0x278] sm:$0xff]   ;;  %v2365_v16 = vld [vmem:[%s2985_s2 + $0x370] sm:$0xff]  }
  0x1c   :  { %2028 = vmatprep.subr.bf16.mxu1 %v2290_v31  ;;  %2046 = vmatprep.subr.bf16.mxu0 %v2291_v32  ;;  %v138_v31 = vpack.c.bf16 %v80_v27, %v80_v27  ;;  %v2333_v32 = vld [vmem:[%s2985_s2 + $0x180] sm:$0xff]   ;;  %v2367_v19 = vld [vmem:[%s2985_s2 + $0x330] sm:$0xff]  }
  0x1d   :  { %v2349_v49 = vld [vmem:[%s2985_s2 + $0x2e0] sm:$0xff]   ;;  %v2376_v22 = vld [vmem:[%s2985_s2 + $0x3b0] sm:$0xff]  }
  0x1e   :  { %v2351_v51 = vld [vmem:[%s2985_s2 + $0x2a0] sm:$0xff]  }
  0x1f   :  { %2029 = vmatpush3.bf16.msra.mxu1 %v2292_v33  ;;  %2047 = vmatpush3.bf16.msra.mxu0 %v2293_v34  ;;  %v2330_v33 = vld [vmem:[%s2985_s2 + $0x238] sm:$0xff]   ;;  %v135_v34 = vpack.c.bf16 %v71_v17, %v71_v17  ;;  %v2375_v27 = vld [vmem:[%s2985_s2 + $0x320] sm:$0xff]  }
  0x20   :  { %2048 = vmatprep.subr.bf16.mxu0 %v2295_v37  ;;  %2058 = vmatprep.subr.bf16.mxu1 %v2296_v40  ;;  %v137_v37 = vpack.c.bf16 %v78_v23, %v78_v23  ;;  %v2341_v40 = vld [vmem:[%s2985_s2 + $0x2f0] sm:$0xff]   ;;  %v2371_v23 = vld [vmem:[%s2985_s2 + $0x328] sm:$0xff]  }
  0x22   :  { %1266 = vmatmul.mubr.bf16.vlgmr.msra.gmra.mxu1 %v131_v52  ;;  %v2346_v52 = vld [vmem:[%s2985_s2 + $0x218] sm:$0xff]  }
  0x23   :  { %2049 = vmatpush3.bf16.msra.mxu0 %v2297_v43  ;;  %2059 = vmatpush3.bf16.msra.mxu1 %v2298_v50  ;;  %v2338_v43 = vld [vmem:[%s2985_s2 + $0x228] sm:$0xff]   ;;  %v2344_v50 = vld [vmem:[%s2985_s2 + $0x258] sm:$0xff]  }
  0x24   :  { %2050 = vmatprep.subr.bf16.mxu0 %v2299_v45  ;;  %2060 = vmatprep.subr.bf16.mxu1 %v2300_v56  ;;  %v2345_v45 = vld [vmem:[%s2985_s2 + $0x2e8] sm:$0xff]   ;;  %v2350_v56 = vld [vmem:[%s2985_s2 + $0x210] sm:$0xff]  }
  0x25   :  { %1345 = vmatprep.mubr.bf16.mxu1 %v136_v25  ;;  %v2373_v25 = vld [vmem:[%s2985_s2 + $0x360] sm:$0xff]  }
  0x27   :  { %2051 = vmatpush3.bf16.msra.mxu0 %v2301_v47  ;;  %2061 = vmatpush3.bf16.msra.mxu1 %v2302_v59  ;;  %v2347_v47 = vld [vmem:[%s2985_s2 + $0x2a8] sm:$0xff]   ;;  %v2359_v59 = vld [vmem:[%s2985_s2 + $0x290] sm:$0xff]  }
  0x28   :  { %2080 = vmatprep.subr.bf16.mxu0 %v2304_v54  ;;  %2062 = vmatprep.subr.bf16.mxu1 %v2303_v61  ;;  %v2348_v54 = vld [vmem:[%s2985_s2 + $0x250] sm:$0xff]  }
  0x2a   :  { %1306 = vmatmul.mubr.bf16.vlgmr.msra.gmra.mxu0 %v133_v53  ;;  %v2353_v53 = vld [vmem:[%s2985_s2 + $0x2d8] sm:$0xff]  }
  0x2b   :  { %2081 = vmatpush3.bf16.msra.mxu0 %v2306_v58  ;;  %2063 = vmatpush3.bf16.msra.mxu1 %v2305_v63  ;;  %v2352_v58 = vld [vmem:[%s2985_s2 + $0x248] sm:$0xff]  }
  0x2c   :  { %2082 = vmatprep.subr.bf16.mxu0 %v2308_v60  ;;  %2064 = vmatprep.subr.bf16.mxu1 %v2307_v2  ;;  %v41_v60 = vld [vmem:[%s2988_s0 + $0x10] sm:$0xff]  ;;  %v2356_v2 = vld [vmem:[%s2985_s2 + $0x240] sm:$0xff]  }
  0x2d   :  { %1385 = vmatprep.mubr.bf16.mxu0 %v138_v31  ;;  %v88_v61 = vrot.slane %v41_v60, %v2587_v44  ;;  %v81_v63 = vcombine.high %v41_v60, %v41_v60  ;;  %v2384_v31 = vld [vmem:[%s2985_s2 + $0x3a0] sm:$0xff]  }
  0x2f   :  { %2083 = vmatpush3.bf16.msra.mxu0 %v2310_v62  ;;  %2065 = vmatpush3.bf16.msra.mxu1 %v2309_v4  ;;  %v2360_v62 = vld [vmem:[%s2985_s2 + $0x2c8] sm:$0xff]   ;;  %v95_v4 = vrot.slane %v81_v63, %v2587_v44 }
  0x30   :  { %2084 = vmatprep.subr.bf16.mxu0 %v2312_v1  ;;  %2066 = vmatprep.subr.bf16.mxu1 %v2311_v6  ;;  %v2354_v1 = vld [vmem:[%s2985_s2 + $0x208] sm:$0xff]  }
  0x31   :  { %v141_v17 = vpack.c.bf16 %v95_v4, %v95_v4 }
  0x33   :  { %2085 = vmatpush3.bf16.msra.mxu0 %v2314_v3  ;;  %2067 = vmatpush3.bf16.msra.mxu1 %v2313_v8  ;;  %v96_v3 = vcombine.high %v88_v61, %v88_v61  ;;  %v97_v8 = vcombine.high %v95_v4, %v95_v4  ;;  %v2404_v4 = vld [vmem:[%s2989_s5 + $0x8] sm:$0xff]  }
  0x34   :  { %2086 = vmatprep.subr.bf16.mxu0 %v2316_v5  ;;  %2068 = vmatprep.subr.bf16.mxu1 %v2315_v10  ;;  %v2362_v5 = vld [vmem:[%s2985_s2 + $0x288] sm:$0xff]   ;;  %v2361_v10 = vld [vmem:[%s2985_s2 + $0x378] sm:$0xff]  }
  0x35   :  { %v140_v6 = vpack.c.bf16 %v96_v3, %v96_v3  ;;  %v2403_v3 = vld [vmem:[%s2989_s5 + $0x10] sm:$0xff]  }
  0x37   :  { %2087 = vmatpush3.bf16.msra.mxu0 %v2318_v7  ;;  %2069 = vmatpush3.bf16.msra.mxu1 %v2317_v12  ;;  %v2364_v7 = vld [vmem:[%s2985_s2 + $0x2c0] sm:$0xff]  }
  0x38   :  { %2088 = vmatprep.subr.bf16.mxu0 %v2320_v9  ;;  %2070 = vmatprep.subr.bf16.mxu1 %v2319_v14  ;;  %v2358_v9 = vld [vmem:[%s2985_s2 + $0x200] sm:$0xff]   ;;  %v139_v14 = vpack.c.bf16 %v88_v61, %v88_v61 }
  0x39   :  { %v2366_v12 = vld [vmem:[%s2985_s2 + $0x280] sm:$0xff]  }
  0x3a   :  { %v2401_v61 = vld [vmem:[%s2989_s5 + $0x20] sm:$0xff]  }
  0x3b   :  { %2089 = vmatpush3.bf16.msra.mxu0 %v2322_v11  ;;  %2071 = vmatpush3.bf16.msra.mxu1 %v2321_v20  ;;  %v142_v11 = vpack.c.bf16 %v97_v8, %v97_v8  ;;  %v2374_v20 = vld [vmem:[%s2985_s2 + $0x3f0] sm:$0xff]  }
  0x3c   :  { %2090 = vmatprep.subr.bf16.mxu0 %v2324_v13  ;;  %2072 = vmatprep.subr.bf16.mxu1 %v2323_v21  ;;  %v2363_v13 = vld [vmem:[%s2985_s2 + $0x338] sm:$0xff]   ;;  %v2369_v21 = vld [vmem:[%s2985_s2 + $0x368] sm:$0xff]  }
  0x3f   :  { %2091 = vmatpush3.bf16.msra.mxu0 %v2326_v15  ;;  %2073 = vmatpush3.bf16.msra.mxu1 %v2325_v28  ;;  %v2370_v15 = vld [vmem:[%s2985_s2 + $0x3f8] sm:$0xff]   ;;  %v2382_v28 = vld [vmem:[%s2985_s2 + $0x3e0] sm:$0xff]  }
  0x40   :  { %2092 = vmatprep.subr.bf16.mxu0 %v2327_v18  ;;  %2102 = vmatprep.subr.bf16.mxu1 %v2328_v29  ;;  %v2372_v18 = vld [vmem:[%s2985_s2 + $0x3b8] sm:$0xff]  }
  0x41   :  { %v2377_v29 = vld [vmem:[%s2985_s2 + $0x358] sm:$0xff]  }
  0x42   :  { %1346 = vmatmul.mubr.bf16.vlgmr.msra.gmra.mxu1 %v135_v34  ;;  %v2381_v34 = vld [vmem:[%s2985_s2 + $0x350] sm:$0xff]  }
  0x43   :  { %2093 = vmatpush3.bf16.msra.mxu0 %v2329_v24  ;;  %2103 = vmatpush3.bf16.msra.mxu1 %v2330_v33  ;;  %v2378_v24 = vld [vmem:[%s2985_s2 + $0x3e8] sm:$0xff]   ;;  %v2386_v33 = vld [vmem:[%s2985_s2 + $0x3d8] sm:$0xff]  }
  0x44   :  { %2094 = vmatprep.subr.bf16.mxu0 %v2331_v26  ;;  %2104 = vmatprep.subr.bf16.mxu1 %v2332_v36  ;;  %v2380_v26 = vld [vmem:[%s2985_s2 + $0x3a8] sm:$0xff]   ;;  %v2383_v36 = vld [vmem:[%s2985_s2 + $0x310] sm:$0xff]  }
  0x45   :  { %1425 = vmatprep.mubr.bf16.mxu1 %v140_v6  ;;  %v2406_v6 = vld [vmem:[%s2990_s7 + $0x18] sm:$0xff]  }
  0x47   :  { %2095 = vmatpush3.bf16.msra.mxu0 %v2333_v32  ;;  %2105 = vmatpush3.bf16.msra.mxu1 %v2334_v39  ;;  %v2379_v32 = vld [vmem:[%s2985_s2 + $0x318] sm:$0xff]   ;;  %v2392_v39 = vld [vmem:[%s2985_s2 + $0x390] sm:$0xff]  }
  0x48   :  { %2124 = vmatprep.subr.bf16.mxu0 %v2337_v35  ;;  %2106 = vmatprep.subr.bf16.mxu1 %v2336_v41  ;;  %v2388_v35 = vld [vmem:[%s2985_s2 + $0x398] sm:$0xff]  }
  0x4a   :  { %1386 = vmatmul.mubr.bf16.vlgmr.msra.gmra.mxu0 %v137_v37  ;;  %v2390_v37 = vld [vmem:[%s2985_s2 + $0x3d0] sm:$0xff]  }
  0x4b   :  { %2125 = vmatpush3.bf16.msra.mxu0 %v2339_v38  ;;  %2107 = vmatpush3.bf16.msra.mxu1 %v2338_v43  ;;  %v2385_v38 = vld [vmem:[%s2985_s2 + $0x348] sm:$0xff]  }
  0x4c   :  { %2126 = vmatprep.subr.bf16.mxu0 %v2341_v40  ;;  %2108 = vmatprep.subr.bf16.mxu1 %v2340_v46  ;;  %v42_v40 = vld [vmem:[%s2988_s0 + $0x18] sm:$0xff]  ;;  %v2389_v46 = vld [vmem:[%s2985_s2 + $0x340] sm:$0xff]  }
  0x4d   :  { %1465 = vmatprep.mubr.bf16.mxu0 %v142_v11  ;;  %v105_v41 = vrot.slane %v42_v40, %v2587_v44  ;;  %v98_v43 = vcombine.high %v42_v40, %v42_v40 }
  0x4f   :  { %2127 = vmatpush3.bf16.msra.mxu0 %v2343_v42  ;;  %2109 = vmatpush3.bf16.msra.mxu1 %v2342_v48  ;;  %v2393_v42 = vld [vmem:[%s2985_s2 + $0x3c8] sm:$0xff]   ;;  %v112_v48 = vrot.slane %v98_v43, %v2587_v44  ;;  %v2396_v44 = vld [vmem:[%s2985_s2 + $0x380] sm:$0xff]  }
  0x50   :  { %2128 = vmatprep.subr.bf16.mxu0 %v2345_v45  ;;  %2110 = vmatprep.subr.bf16.mxu1 %v2344_v50  ;;  %v2387_v45 = vld [vmem:[%s2985_s2 + $0x308] sm:$0xff]  }
  0x53   :  { %2129 = vmatpush3.bf16.msra.mxu0 %v2347_v47  ;;  %2111 = vmatpush3.bf16.msra.mxu1 %v2346_v52  ;;  %v113_v47 = vcombine.high %v105_v41, %v105_v41  ;;  %v114_v52 = vcombine.high %v112_v48, %v112_v48 }
  0x54   :  { %2130 = vmatprep.subr.bf16.mxu0 %v2349_v49  ;;  %2112 = vmatprep.subr.bf16.mxu1 %v2348_v54  ;;  %v2394_v49 = vld [vmem:[%s2985_s2 + $0x388] sm:$0xff]  }
  0x55   :  { %v144_v50 = vpack.c.bf16 %v113_v47, %v113_v47  ;;  %v146_v54 = vpack.c.bf16 %v114_v52, %v114_v52 }
  0x57   :  { %2131 = vmatpush3.bf16.msra.mxu0 %v2351_v51  ;;  %2113 = vmatpush3.bf16.msra.mxu1 %v2350_v56  ;;  %v2395_v51 = vld [vmem:[%s2985_s2 + $0x3c0] sm:$0xff]   ;;  %v145_v56 = vpack.c.bf16 %v112_v48, %v112_v48 }
  0x58   :  { %2132 = vmatprep.subr.bf16.mxu0 %v2353_v53  ;;  %2114 = vmatprep.subr.bf16.mxu1 %v2352_v58  ;;  %v2391_v53 = vld [vmem:[%s2985_s2 + $0x300] sm:$0xff]   ;;  %v2399_v58 = vld [vmem:[%s2989_s5 + $0x30] sm:$0xff]  }
  0x5b   :  { %2133 = vmatpush3.bf16.msra.mxu0 %v2355_v55  ;;  %2115 = vmatpush3.bf16.msra.mxu1 %v2354_v1  ;;  %v143_v55 = vpack.c.bf16 %v105_v41, %v105_v41  ;;  %v2402_v1 = vld [vmem:[%s2989_s5 + $0x18] sm:$0xff]  }
  0x5c   :  { %2134 = vmatprep.subr.bf16.mxu0 %v2357_v57  ;;  %2116 = vmatprep.subr.bf16.mxu1 %v2356_v2  ;;  %v2398_v57 = vld [vmem:[%s2989_s5 + $0x38] sm:$0xff]  }
  0x5f   :  { %2135 = vmatpush3.bf16.msra.mxu0 %v2359_v59  ;;  %2117 = vmatpush3.bf16.msra.mxu1 %v2358_v9  ;;  %v2400_v59 = vld [vmem:[%s2989_s5 + $0x28] sm:$0xff]  }
  0x60   :  { %2136 = vmatprep.subr.bf16.mxu0 %v2360_v62  ;;  %2146 = vmatprep.subr.bf16.mxu1 %v2361_v10 }
  0x62   :  { %1426 = vmatmul.mubr.bf16.vlgmr.msra.gmra.mxu1 %v139_v14 }
  0x63   :  { %2137 = vmatpush3.bf16.msra.mxu0 %v2362_v5  ;;  %2147 = vmatpush3.bf16.msra.mxu1 %v2363_v13  ;;  %v2405_v5 = vld [vmem:[%s2989_s5] sm:$0xff]  }
  0x64   :  { %2138 = vmatprep.subr.bf16.mxu0 %v2364_v7  ;;  %2148 = vmatprep.subr.bf16.mxu1 %v2365_v16  ;;  %v2407_v7 = vld [vmem:[%s2990_s7 + $0x10] sm:$0xff]  }
  0x65   :  { %1505 = vmatprep.mubr.bf16.mxu1 %v144_v50 }
  0x67   :  { %2139 = vmatpush3.bf16.msra.mxu0 %v2366_v12  ;;  %2149 = vmatpush3.bf16.msra.mxu1 %v2367_v19 }
  0x68   :  { %2168 = vmatprep.subr.bf16.mxu0 %v2370_v15  ;;  %2150 = vmatprep.subr.bf16.mxu1 %v2369_v21 }
  0x6a   :  { %1466 = vmatmul.mubr.bf16.vlgmr.msra.gmra.mxu0 %v141_v17 }
  0x6b   :  { %2169 = vmatpush3.bf16.msra.mxu0 %v2372_v18  ;;  %2151 = vmatpush3.bf16.msra.mxu1 %v2371_v23 }
  0x6c   :  { %2170 = vmatprep.subr.bf16.mxu0 %v2374_v20  ;;  %2152 = vmatprep.subr.bf16.mxu1 %v2373_v25 }
  0x6d   :  { %1545 = vmatprep.mubr.bf16.mxu0 %v146_v54 }
  0x6f   :  { %2171 = vmatpush3.bf16.msra.mxu0 %v2376_v22  ;;  %2153 = vmatpush3.bf16.msra.mxu1 %v2375_v27 }
  0x70   :  { %2172 = vmatprep.subr.bf16.mxu0 %v2378_v24  ;;  %2154 = vmatprep.subr.bf16.mxu1 %v2377_v29 }
  0x73   :  { %2173 = vmatpush3.bf16.msra.mxu0 %v2380_v26  ;;  %2155 = vmatpush3.bf16.msra.mxu1 %v2379_v32 }
  0x74   :  { %2174 = vmatprep.subr.bf16.mxu0 %v2382_v28  ;;  %2156 = vmatprep.subr.bf16.mxu1 %v2381_v34 }
  0x77   :  { %2175 = vmatpush3.bf16.msra.mxu0 %v2384_v31  ;;  %2157 = vmatpush3.bf16.msra.mxu1 %v2383_v36 }
  0x78   :  { %2176 = vmatprep.subr.bf16.mxu0 %v2386_v33  ;;  %2158 = vmatprep.subr.bf16.mxu1 %v2385_v38 }
  0x7b   :  { %2177 = vmatpush3.bf16.msra.mxu0 %v2388_v35  ;;  %2159 = vmatpush3.bf16.msra.mxu1 %v2387_v45 }
  0x7c   :  { %2178 = vmatprep.subr.bf16.mxu0 %v2390_v37  ;;  %2160 = vmatprep.subr.bf16.mxu1 %v2389_v46 }
  0x7f   :  { %2179 = vmatpush3.bf16.msra.mxu0 %v2392_v39  ;;  %2161 = vmatpush3.bf16.msra.mxu1 %v2391_v53 }
  0x80   :  { %2180 = vmatprep.subr.bf16.mxu0 %v2393_v42  ;;  %2217 = vmatprep.subr.bf16.mxu1 %v2414_v0 }
  0x82   :  { %1506 = vmatmul.mubr.bf16.vlgmr.msra.gmra.mxu1 %v143_v55 }
  0x83   :  { %2181 = vmatpush3.bf16.msra.mxu0 %v2394_v49  ;;  %2233 = vmatprep.mubr.msk.bf16.mxu1 %vm2415_vm1, %v2414_v0 }
  0x84   :  { %2182 = vmatprep.subr.bf16.mxu0 %v2395_v51  ;;  %2218 = vmatpush3.bf16.msra.mxu1 %v2398_v57 }
  0x85   :  { %2219 = vmatprep.subr.bf16.mxu1 %v2414_v0 }
  0x87   :  { %2183 = vmatpush3.bf16.msra.mxu0 %v2396_v44  ;;  %v1989_v44 = vld [vmem:[%s2991_s4] ss:$0 sm:$0xff] }
  0x88   :  { %2237 = vmatprep.subr.bf16.mxu0 %v2414_v0  ;;  %2220 = vmatpush3.bf16.msra.mxu1 %v2399_v58 }
  0x89   :  { %2221 = vmatprep.subr.bf16.mxu1 %v2414_v0 }
  0x8a   :  { %1546 = vmatmul.mubr.bf16.vlgmr.msra.gmra.mxu0 %v145_v56 }
  0x8b   :  { %2245 = vmatprep.mubr.msk.bf16.mxu0 %vm2415_vm1, %v2414_v0  ;;  %2238 = vmatpush3.bf16.msra.mxu0 %v2406_v6  ;;  %v2410_v6 = vld [vmem:[%s2992_s9 + $0x18] sm:$0xff]  }
  0x8c   :  { %2222 = vmatpush3.bf16.msra.mxu1 %v2400_v59  ;;  %2239 = vmatprep.subr.bf16.mxu0 %v2414_v0 }
  0x8d   :  { %2223 = vmatprep.subr.bf16.mxu1 %v2414_v0 }
  0x8f   :  { %2240 = vmatpush3.bf16.msra.mxu0 %v2407_v7 }
  0x90   :  { %2224 = vmatpush3.bf16.msra.mxu1 %v2401_v61  ;;  %2241 = vmatprep.subr.bf16.mxu0 %v2414_v0  ;;  %v2408_v61 = vld [vmem:[%s2990_s7 + $0x8] sm:$0xff]  }
  0x91   :  { %2225 = vmatprep.subr.bf16.mxu1 %v2414_v0 }
  0x93   :  { %2242 = vmatpush3.bf16.msra.mxu0 %v2408_v61 }
  0x94   :  { %2226 = vmatpush3.bf16.msra.mxu1 %v2402_v1  ;;  %2243 = vmatprep.subr.bf16.mxu0 %v2414_v0 }
  0x95   :  { %2227 = vmatprep.subr.bf16.mxu1 %v2414_v0 }
  0x98   :  { %2228 = vmatpush3.bf16.msra.mxu1 %v2403_v3 }
  0x99   :  { %2229 = vmatprep.subr.bf16.mxu1 %v2414_v0 }
  0x9c   :  { %2230 = vmatpush3.bf16.msra.mxu1 %v2404_v4 }
  0x9d   :  { %2231 = vmatprep.subr.bf16.mxu1 %v2414_v0 }
  0xa0   :  { %2232 = vmatpush3.bf16.msra.mxu1 %v2405_v5 }
  0xca   :  { %v459_v60 = vpop.f32.mrf.mxu0 }
  0xcc   :  { %v2215_v62 = vpop.f32.mrf.mxu0 }
  0xcd   :  { %v2409_v62 = vld [vmem:[%s2990_s7] sm:$0xff]  }
  0xce   :  { %v462_v63 = vpop.f32.mrf.mxu0  ;;  %2244 = vmatpush3.bf16.msra.mxu0 %v2409_v62 }
  0xcf   :  { %2249 = vmatprep.subr.bf16.mxu0 %v2414_v0  ;;  %v1990_v63 = vld [vmem:[%s2993_s6] ss:$0 sm:$0xff] }
  0xd0   :  { %v2216_v2 = vpop.f32.mrf.mxu0 }
  0xe2   :  { %v2030_v8 = vpop.f32.mrf.mxu1 }
  0xe4   :  { %v2031_v10 = vpop.f32.mrf.mxu1 }
  0xe5   :  { %v2032_v12 = vadd.f32 %v2031_v10, %v2030_v8  ;;  %v2412_v10 = vld [vmem:[%s2992_s9 + $0x8] sm:$0xff]  }
  0xe6   :  { %v2033_v14 = vpop.f32.mrf.mxu1 }
  0xe7   :  { %v1268_v16 = vadd.f32 %v2032_v12, %v459_v60  ;;  %v1999_v12 = vld [vmem:[%s2994_s8] ss:$0 sm:$0xff] }
  0xe8   :  { %v2034_v17 = vpop.f32.mrf.mxu1 }
  0xea   :  { %v2052_v9 = vpop.f32.mrf.mxu0 }
  0xec   :  { %v2053_v11 = vpop.f32.mrf.mxu0 }
  0xed   :  { %v2054_v13 = vadd.f32 %v2053_v11, %v2052_v9  ;;  %v2411_v9 = vld [vmem:[%s2992_s9 + $0x10] sm:$0xff]   ;;  %v2413_v11 = vld [vmem:[%s2992_s9] sm:$0xff]  }
  0xee   :  { %v2055_v15 = vpop.f32.mrf.mxu0 }
  0xef   :  { %v1308_v19 = vadd.f32 %v2054_v13, %v1268_v16 }
  0xf0   :  { %v2056_v18 = vpop.f32.mrf.mxu0 }
 0x102   :  { %v2074_v20 = vpop.f32.mrf.mxu1 }
 0x104   :  { %v2075_v22 = vpop.f32.mrf.mxu1 }
 0x105   :  { %v2076_v37 = vadd.f32 %v2075_v22, %v2074_v20  ;;  %v1844_v20 = vand.u32 127, %v51_v30 }
 0x106   :  { %v2077_v24 = vpop.f32.mrf.mxu1 }
 0x107   :  { %v1348_v39 = vadd.f32 %v2076_v37, %v1308_v19  ;;  %vm1845_vm4 = vcmp.ge.s32.totalorder %v1844_v20, 4  ;;  %vm1846_vm5 = vcmp.lt.s32.totalorder %v1844_v20, 8  ;;  %vm1848_vm7 = vcmp.eq.s32.totalorder %v1844_v20, 9 }
 0x108   :  { %v2078_v26 = vpop.f32.mrf.mxu1  ;;  %vm1847_vm6 = vmand %vm1845_vm4, %vm1846_vm5 }
 0x109   :  { %vm1849_vm8 = vmor %vm1847_vm6, %vm1848_vm7 }
 0x10a   :  { %v2096_v21 = vpop.f32.mrf.mxu0 }
 0x10c   :  { %v2097_v23 = vpop.f32.mrf.mxu0 }
 0x10d   :  { %v2098_v38 = vadd.f32 %v2097_v23, %v2096_v21 }
 0x10e   :  { %v2099_v25 = vpop.f32.mrf.mxu0 }
 0x10f   :  { %v1388_v41 = vadd.f32 %v2098_v38, %v1348_v39 }
 0x110   :  { %v2100_v27 = vpop.f32.mrf.mxu0 }
 0x122   :  { %v2118_v28 = vpop.f32.mrf.mxu1 }
 0x124   :  { %v2119_v31 = vpop.f32.mrf.mxu1 }
 0x125   :  { %v2120_v40 = vadd.f32 %v2119_v31, %v2118_v28 }
 0x126   :  { %v2121_v33 = vpop.f32.mrf.mxu1 }
 0x127   :  { %v1428_v45 = vadd.f32 %v2120_v40, %v1388_v41 }
 0x128   :  { %v2122_v35 = vpop.f32.mrf.mxu1 }
 0x12a   :  { %v2140_v29 = vpop.f32.mrf.mxu0 }
 0x12c   :  { %v2141_v32 = vpop.f32.mrf.mxu0 }
 0x12d   :  { %v2142_v42 = vadd.f32 %v2141_v32, %v2140_v29 }
 0x12e   :  { %v2143_v34 = vpop.f32.mrf.mxu0 }
 0x12f   :  { %v1468_v48 = vadd.f32 %v2142_v42, %v1428_v45 }
 0x130   :  { %v2144_v36 = vpop.f32.mrf.mxu0 }
 0x142   :  { %v2162_v43 = vpop.f32.mrf.mxu1 }
 0x144   :  { %v2163_v46 = vpop.f32.mrf.mxu1 }
 0x145   :  { %v2164_v49 = vadd.f32 %v2163_v46, %v2162_v43 }
 0x146   :  { %v2165_v50 = vpop.f32.mrf.mxu1 }
 0x147   :  { %v1508_v52 = vadd.f32 %v2164_v49, %v1468_v48 }
 0x148   :  { %v2166_v54 = vpop.f32.mrf.mxu1 }
 0x14a   :  { %v2184_v47 = vpop.f32.mrf.mxu0 }
 0x14c   :  { %v2185_v51 = vpop.f32.mrf.mxu0 }
 0x14d   :  { %v2186_v53 = vadd.f32 %v2185_v51, %v2184_v47 }
 0x14e   :  { %v2187_v55 = vpop.f32.mrf.mxu0 }
 0x14f   :  { %v1548_v56 = vadd.f32 %v2186_v53, %v1508_v52 }
 0x150   :  { %v2188_v57 = vpop.f32.mrf.mxu0 }
 0x151   :  { %v1560_v58 = vadd.f32 %v1989_v44, %v1548_v56 }
 0x153   :  { %v1561_v59 = vmax.f32 %v1560_v58, 0.0 }
 0x155   :  { %v1562_v60 = vpack.c.bf16 %v1561_v59, %v1561_v59 }
 0x157   :  { %2234 = vmatmul.mubr.bf16.vlgmr.msra.gmra.mxu1 %v1562_v60 }
 0x217   :  { %v1668_v1 = vpop.f32.mrf.mxu1 }
 0x218   :  { %v1669_v2 = vadd.f32 %v1990_v63, %v1668_v1 }
 0x219   :  { %v2235_v3 = vpop.f32.mrf.mxu1 }
 0x21a   :  { %v1674_v4 = vmax.f32 %v1669_v2, 0.0 }
 0x21b   :  { %v1671_v5 = vpop.f32.mrf.mxu1 }
 0x21c   :  { %v1675_v7 = vpack.c.bf16 %v1674_v4, %v1674_v4 }
 0x21d   :  { %v2236_v8 = vpop.f32.mrf.mxu1 }
 0x21e   :  { %2246 = vmatmul.mubr.msk.bf16.vlgmr.msra.gmra.mxu0 %vm1715_vm3, %v1675_v7 }
 0x21f   :  { %2250 = vmatpush3.bf16.msra.mxu0 %v2410_v6  ;;  %2257 = vmatprep.mubr.msk.bf16.mxu0 %vm2415_vm1, %v2414_v0 }
 0x220   :  { %2251 = vmatprep.subr.bf16.mxu0 %v2414_v0 }
 0x223   :  { %2252 = vmatpush3.bf16.msra.mxu0 %v2411_v9 }
 0x224   :  { %2253 = vmatprep.subr.bf16.mxu0 %v2414_v0 }
 0x227   :  { %2254 = vmatpush3.bf16.msra.mxu0 %v2412_v10 }
 0x228   :  { %2255 = vmatprep.subr.bf16.mxu0 %v2414_v0  ;;  %v2005_v0 = vld [vmem:[%s2995_s10] ss:$0 sm:$0xff] }
 0x22b   :  { %2256 = vmatpush3.bf16.msra.mxu0 %v2413_v11 }
 0x2de   :  { %v1753_v13 = vpop.f32.mrf.mxu0 }
 0x2df   :  { %v1754_v14 = vadd.f32 %v1999_v12, %v1753_v13 }
 0x2e0   :  { %v2247_v15 = vpop.f32.mrf.mxu0 }
 0x2e1   :  { %v1759_v16 = vmax.f32 %v1754_v14, 0.0 }
 0x2e2   :  { %v1756_v17 = vpop.f32.mrf.mxu0 }
 0x2e3   :  { %v1760_v18 = vpack.c.bf16 %v1759_v16, %v1759_v16 }
 0x2e4   :  { %v2248_v19 = vpop.f32.mrf.mxu0 }
 0x2e5   :  { %2258 = vmatmul.mubr.msk.bf16.vlgmr.msra.gmra.mxu0 %vm1715_vm3, %v1760_v18 }
 0x3a5   :  { %v1837_v21 = vpop.f32.mrf.mxu0 }
 0x3a6   :  { %v1838_v22 = vadd.f32 %v2005_v0, %v1837_v21 }
 0x3a7   :  { %v2259_v23 = vpop.f32.mrf.mxu0 }
 0x3a8   :  { %v1850_v24 = vmax.f32 %v1838_v22, -20.0 }
 0x3a9   :  { %v1840_v25 = vpop.f32.mrf.mxu0 }
 0x3aa   :  { %v1851_v26 = vmin.f32 %v1850_v24, 2.0 }
 0x3ab   :  { %v2260_v27 = vpop.f32.mrf.mxu0 }
 0x3ac   :  { %v1852_v28 = vsel %vm1849_vm8, %v1851_v26, %v1838_v22 }
 0x3ad   :  { %1853 = vst [vmem:[%s2996_s11] sm:$0x3] %v1852_v28 }

// kernel: gaussian_policy_forward.2
= control target key start
LH: loop header
LB: loop body
LE: loop exit
PB: predicated region body
PF: predicated region fallthrough
CT: control target
= control target key end

     0   :  { %s3933_s27 = smov 0   ;;  %s3935_s28 = smov 0   ;;  %s6372_s0 = inlined_call_operand.vmem [shape: bf16[2,256,13], index: 0, kind: input, shape index: {}]   ;;  %s6373_s1 = inlined_call_operand.vmem [shape: f32[2,256,5], index: 1, kind: input, shape index: {}]   ;;  %s6374_s2 = inlined_call_operand.vmem [shape: bf16[13,128], index: 2, kind: input, shape index: {}]   ;;  %s6375_s3 = inlined_call_operand.vmem [shape: f32[1,128], index: 3, kind: input, shape index: {}]   ;;  %s6376_s4 = inlined_call_operand.vmem [shape: bf16[128,256], index: 4, kind: input, shape index: {}]   ;;  %s6377_s5 = inlined_call_operand.vmem [shape: f32[1,256], index: 5, kind: input, shape index: {}]   ;;  %s6378_s6 = inlined_call_operand.vmem [shape: bf16[256,640], index: 6, kind: input, shape index: {}]   ;;  %s6379_s7 = inlined_call_operand.vmem [shape: f32[1,640], index: 7, kind: input, shape index: {}]   ;;  %s6380_s8 = inlined_call_operand.vmem [shape: f32[2,2048], index: 8, kind: output, shape index: {}]  }
   0x1   :  { %s3937_s29 = smov 0   ;;  %s3939_s30 = smov 0  }
   0x2   :  { %s3941_s9 = smov 0  }
   0x3 LB: > { %s27_s10 = sadd.s32 1, %s3873_s30  ;;  %p46_p1 = scmp.ne.s32.totalorder %s3865_s28, %s3861_s27  ;;  %s3877_s9 = sphi %s3941_s9, %s18_s9   ;;  %s3873_s30 = sphi %s3939_s30, %s6644_s30   ;;  %s3869_s29 = sphi %s3937_s29, %s6643_s29   ;;  %s3865_s28 = sphi %s3935_s28, %s6642_s28   ;;  %s3861_s27 = sphi %s3933_s27, %s6641_s27  }
   0x4   : > { %p28_p0 = scmp.ge.s32.totalorder %s27_s10, 4  ;;  %p47_p2 = scmp.eq.s32.totalorder %s3877_s9, 0 }
   0x5   : > { %s39_s13 = sadd.s32 1, %s3865_s28  ;;  %p3295_p5 = scmp.ge.s32.totalorder %s3877_s9, 4 }
   0x6   : > { %s6646_s10 = smov (%p28_p0, %s27_s10), 0  ;;  %p3964_p3 = por %p47_p2, %p46_p1 }
   0x7   : > { %s35_s12 = ssub.s32 %s3873_s30, %s6646_s10  ;;  %270 = sbr.rel (%p3295_p5) target bundleno = 32 (0x20), region = 40 }
   0x8   : > { %p37_p4 = scmp.eq.s32.totalorder %s35_s12, 0 }
   0xa   : > { %s3972_s14 = scalar_select %p37_p4, %s3865_s28, %s39_s13  }
   0xc   : > { %273 = sbr.rel (!%p3964_p3) target bundleno = 20 (0x14), region = 44  ;;  %s275_s15 = sand.u32 (%p3964_p3), 1, %s3865_s28  }
   0xd   : > { %s3443_s16 = sshll.u32 (%p3964_p3), %s3873_s30, 5  ;;  %s3296_s17 = sshll.u32 (%p3964_p3), %s275_s15, 6 }
   0xe   : > { %s283_s20 = scalar_lea.vmem (%p3964_p3), %s6372_s0, %s3443_s16  ;;  %s277_s21 = scalar_lea.vmem (%p3964_p3), [#allocation2], %s3296_s17 }
   0xf   : > { %v300_v0 = vld [vmem:[%s283_s20] sm:$0xff] (%p3964_p3)   ;;  %v304_v1 = vld [vmem:[%s283_s20 + $0x8] sm:$0xff] (%p3964_p3)   ;;  %v308_v2 = vld [vmem:[%s283_s20 + $0x10] sm:$0xff] (%p3964_p3)  }
  0x10   : > { %301 = vst [vmem:[%s277_s21] sm:$0xff] (%p3964_p3), %v300_v0   ;;  %305 = vst [vmem:[%s277_s21 + $0x8] sm:$0xff] (%p3964_p3), %v304_v1   ;;  %v312_v3 = vld [vmem:[%s283_s20 + $0x18] sm:$0xff] (%p3964_p3)   ;;  %v316_v4 = vld [vmem:[%s283_s20 + $0x80] sm:$0xff] (%p3964_p3)  }
  0x11   : > { %309 = vst [vmem:[%s277_s21 + $0x10] sm:$0xff] %v308_v2   ;;  %v320_v5 = vld [vmem:[%s283_s20 + $0x88] sm:$0xff]   ;;  %313 = vst [vmem:[%s277_s21 + $0x18] sm:$0xff] %v312_v3   ;;  %v324_v6 = vld [vmem:[%s283_s20 + $0x90] sm:$0xff]  }
  0x12   : > { %317 = vst [vmem:[%s277_s21 + $0x20] sm:$0xff] %v316_v4   ;;  %321 = vst [vmem:[%s277_s21 + $0x28] sm:$0xff] %v320_v5   ;;  %v328_v7 = vld [vmem:[%s283_s20 + $0x98] sm:$0xff]  }
  0x13   : > { %325 = vst [vmem:[%s277_s21 + $0x30] sm:$0xff] %v324_v6   ;;  %329 = vst [vmem:[%s277_s21 + $0x38] sm:$0xff] %v328_v7  }
  0x14 PF: > { %387 = sbr.rel (!%p3964_p3) target bundleno = 32 (0x20), region = 85  ;;  %s389_s22 = sand.u32 (%p3964_p3), 1, %s3865_s28  }
  0x15   : > { %s3444_s23 = sshll.u32 (%p3964_p3), %s3873_s30, 6  ;;  %s3299_s24 = sshll.u32 (%p3964_p3), %s389_s22, 7 }
  0x16   : > { %s3989_s12 = scalar_lea.vmem (%p3964_p3), %s6373_s1, %s3444_s23  ;;  %s391_s11 = scalar_lea.vmem (%p3964_p3), [#allocation3], %s3299_s24 }
  0x17   : > { %v456_v8 = vld [vmem:[%s3989_s12] sm:$0xff] (%p3964_p3)  ;;  %v458_v9 = vld [vmem:[%s3989_s12 + $0x8] sm:$0xff] (%p3964_p3)  ;;  %v460_v10 = vld [vmem:[%s3989_s12 + $0x10] sm:$0xff] (%p3964_p3) }
  0x18   : > { %457 = vst [vmem:[%s391_s11] sm:$0xff] (%p3964_p3), %v456_v8  ;;  %459 = vst [vmem:[%s391_s11 + $0x8] sm:$0xff] (%p3964_p3), %v458_v9  ;;  %v462_v11 = vld [vmem:[%s3989_s12 + $0x18] sm:$0xff] (%p3964_p3)  ;;  %v464_v12 = vld [vmem:[%s3989_s12 + $0x20] sm:$0xff] (%p3964_p3) }
  0x19   : > { %461 = vst [vmem:[%s391_s11 + $0x10] sm:$0xff] %v460_v10  ;;  %v466_v13 = vld [vmem:[%s3989_s12 + $0x28] sm:$0xff]  ;;  %463 = vst [vmem:[%s391_s11 + $0x18] sm:$0xff] %v462_v11  ;;  %v468_v14 = vld [vmem:[%s3989_s12 + $0x30] sm:$0xff] }
  0x1a   : > { %465 = vst [vmem:[%s391_s11 + $0x20] sm:$0xff] %v464_v12  ;;  %467 = vst [vmem:[%s391_s11 + $0x28] sm:$0xff] %v466_v13  ;;  %v470_v15 = vld [vmem:[%s3989_s12 + $0x38] sm:$0xff]  ;;  %v472_v16 = vld [vmem:[%s3989_s12 + $0x100] sm:$0xff] }
  0x1b   : > { %469 = vst [vmem:[%s391_s11 + $0x30] sm:$0xff] %v468_v14  ;;  %471 = vst [vmem:[%s391_s11 + $0x38] sm:$0xff] %v470_v15  ;;  %v474_v17 = vld [vmem:[%s3989_s12 + $0x108] sm:$0xff]  ;;  %v476_v18 = vld [vmem:[%s3989_s12 + $0x110] sm:$0xff] }
  0x1c   : > { %473 = vst [vmem:[%s391_s11 + $0x40] sm:$0xff] %v472_v16  ;;  %v478_v19 = vld [vmem:[%s3989_s12 + $0x118] sm:$0xff]  ;;  %475 = vst [vmem:[%s391_s11 + $0x48] sm:$0xff] %v474_v17  ;;  %v480_v20 = vld [vmem:[%s3989_s12 + $0x120] sm:$0xff] }
  0x1d   : > { %477 = vst [vmem:[%s391_s11 + $0x50] sm:$0xff] %v476_v18  ;;  %479 = vst [vmem:[%s391_s11 + $0x58] sm:$0xff] %v478_v19  ;;  %v482_v21 = vld [vmem:[%s3989_s12 + $0x128] sm:$0xff]  ;;  %v484_v22 = vld [vmem:[%s3989_s12 + $0x130] sm:$0xff] }
  0x1e   : > { %481 = vst [vmem:[%s391_s11 + $0x60] sm:$0xff] %v480_v20  ;;  %483 = vst [vmem:[%s391_s11 + $0x68] sm:$0xff] %v482_v21  ;;  %v486_v23 = vld [vmem:[%s3989_s12 + $0x138] sm:$0xff] }
  0x1f   : > { %485 = vst [vmem:[%s391_s11 + $0x70] sm:$0xff] %v484_v22  ;;  %487 = vst [vmem:[%s391_s11 + $0x78] sm:$0xff] %v486_v23 }
  0x20 PF: > { %p3302_p6 = scmp.ge.s32.totalorder %s3877_s9, 1  ;;  %p492_p7 = scmp.lt.s32.totalorder %s3877_s9, 5 }
  0x22   : > { %p493_p8 = pnand %p3302_p6, %p492_p7 }
  0x24   : > { %496 = sbr.rel (%p493_p8) target bundleno = 1265 (0x4f1), region = 123 }
  0x29   : > { %s499_s13 = sand.u32 1, %s3861_s27   ;;  %p3305_p9 = scmp.ne.s32.totalorder %s3869_s29, 0 }
  0x2a   : > { %s3303_s15 = sshll.u32 %s499_s13, 6  ;;  %s3304_s16 = sshll.u32 %s499_s13, 7 }
  0x2b   : > { %s4010_s17 = scalar_lea.vmem [#allocation2], %s3303_s15  ;;  %s4012_s18 = scalar_lea.vmem [#allocation3], %s3304_s16 }
  0x2c   : > { %556 = sbr.rel (%p3305_p9) target bundleno = 53 (0x35), region = 135 }
  0x31   : > { %v3879_v24 = vmov -inf   ;;  %v3880_v25 = vmov inf  }
  0x32   : > { %557 = vst [vmem:[%s6380_s8] sm:$0xff] %v3879_v24  ;;  %558 = vst [vmem:[%s6380_s8 + $0x8] sm:$0xf] %v3879_v24 }
  0x33   : > { %561 = vst [vmem:[%s6380_s8 + $0x18] sm:$0xff] %v3879_v24  ;;  %559 = vst [vmem:[%s6380_s8 + $0xc] sm:$0xff] %v3880_v25 }
  0x34   : > { %560 = vst [vmem:[%s6380_s8 + $0x14] sm:$0xf] %v3880_v25 }
  0x35 PF: > { %v3634_v26 = vld [vmem:[%s6374_s2] sm:$0x7f]   ;;  %vm731_vm0 = vcmask 1045504   ;;  %vm732_vm1 = vcmask 1046528   ;;  %v3881_v28 = vmov 65535   ;;  %vm718_vm2 = vcmask 105472  }
  0x36   : > { %v3635_v27 = vld [vmem:[%s4010_s17] sm:$0xff]   ;;  %v733_v29 = vsel %vm731_vm0, 4294967295, %v3881_v28  ;;  %v3636_v32 = vld [vmem:[%s4010_s17 + $0x8] sm:$0xff]   ;;  %v3637_v33 = vld [vmem:[%s4010_s17 + $0x10] sm:$0xff]   ;;  %v6385_v51 = vmov 0   ;;  %vm1753_vm3 = vcmask 39936  }
  0x37   : > { %v734_v30 = vsel %vm732_vm1, %v733_v29, 0  ;;  %3537 = vmatprep.mubr.msk.bf16.mxu0 %vm718_vm2, %v3635_v27  ;;  %v3639_v34 = vld [vmem:[%s6376_s4 + $0x74] ss:$8 sps:$4 sm:$0xff]   ;;  %v3641_v35 = vld [vmem:[%s6376_s4 + $0x70] ss:$8 sps:$4 sm:$0xff]   ;;  %938 = vmatprep.mubr.bf16.mxu1 %v6385_v51  ;;  %v1656_v55 = vld [vmem:[%s4012_s18] sm:$0xff] }
  0x38   : > { %v4035_v31 = vand.u32 %v3634_v26, %v734_v30  ;;  %v3642_v36 = vld [vmem:[%s6376_s4 + $0x64] ss:$8 sps:$4 sm:$0xff]   ;;  %906 = vmatprep.subr.bf16.mxu1 %v3639_v34  ;;  %v3644_v37 = vld [vmem:[%s6376_s4 + $0x60] ss:$8 sps:$4 sm:$0xff]   ;;  %v3645_v38 = vld [vmem:[%s6376_s4 + $0x54] ss:$8 sps:$4 sm:$0xff]   ;;  %3624 = vset.pattern.permute.xlu0 %v6385_v51 }
  0x39   : > { %907 = vmatpush1.bf16.msra.mxu1 %v3641_v35  ;;  %v3647_v39 = vld [vmem:[%s6376_s4 + $0x50] ss:$8 sps:$4 sm:$0xff]   ;;  %v3648_v41 = vld [vmem:[%s6376_s4 + $0x44] ss:$8 sps:$4 sm:$0xff]   ;;  %v3650_v42 = vld [vmem:[%s6376_s4 + $0x40] ss:$8 sps:$4 sm:$0xff]  }
  0x3a   : > { %3535 = vmatprep.subr.bf16.mxu0 %v4035_v31  ;;  %908 = vmatprep.subr.bf16.mxu1 %v3642_v36  ;;  %v3638_v40 = vld [vmem:[%s4010_s17 + $0x18] sm:$0xff]   ;;  %v4078_v45 = vld [vmem:[%s6376_s4 + $0x24] ss:$8 sps:$4 sm:$0xff]   ;;  %v4083_v46 = vld [vmem:[%s6376_s4 + $0x20] ss:$8 sps:$4 sm:$0xff]   ;;  %v6382_v56 = vmov 1  }
  0x3b   : > { %3536 = vmatpush3.bf16.msra.mxu0 %v4035_v31  ;;  %v3651_v43 = vld [vmem:[%s6376_s4 + $0x34] ss:$8 sps:$4 sm:$0xff]   ;;  %v3653_v44 = vld [vmem:[%s6376_s4 + $0x30] ss:$8 sps:$4 sm:$0xff]   ;;  %v4099_v49 = vld [vmem:[%s6376_s4 + $0x4] ss:$8 sps:$4 sm:$0xff]   ;;  %3620 = vset.pattern.permute.xlu1 %v6382_v56 }
  0x3c   : > { %v4090_v47 = vld [vmem:[%s6376_s4 + $0x14] ss:$8 sps:$4 sm:$0xff]   ;;  %v3659_v48 = vld [vmem:[%s6376_s4 + $0x10] ss:$8 sps:$4 sm:$0xff]   ;;  %v3662_v50 = vld [vmem:[%s6376_s4] ss:$8 sps:$4 sm:$0xff]  }
  0x3d   : > { %909 = vmatpush1.bf16.msra.mxu1 %v3644_v37  ;;  %v4108_v52 = vld [vmem:[%s4012_s18 + $0x10] sm:$0xff]  ;;  %v4111_v53 = vld [vmem:[%s4012_s18 + $0x18] sm:$0xff]  ;;  %v4118_v57 = vld [vmem:[%s4012_s18 + $0x8] sm:$0xff]  ;;  %v1754_v59 = vsel %vm1753_vm3, %v1656_v55, 0.0  ;;  %vm1842_vm4 = vcmp.ne.f32.partialorder %v1656_v55, 0.0 }
  0x3e   : > { %3538 = vmatmul.mubr.msk.bf16.vlgmr.msra.gmra.mxu0 %vm718_vm2, %v3636_v32  ;;  %910 = vmatprep.subr.bf16.mxu1 %v3645_v38  ;;  %v1760_v54 = vsel %vm1753_vm3, %v4108_v52, 0.0  ;;  %v1763_v58 = vsel %vm1753_vm3, %v4111_v53, 0.0  ;;  %v4124_v60 = vld [vmem:[%s4012_s18 + $0x28] sm:$0xff]  ;;  %v4129_v61 = vld [vmem:[%s6378_s6 + $0x124] ss:$20 sps:$4 sm:$0xff]   ;;  %v1757_v62 = vsel %vm1753_vm3, %v4118_v57, 0.0 }
  0x3f   : > { %3541 = vmatprep.mubr.msk.bf16.mxu0 %vm718_vm2, %v3637_v33  ;;  %1761 = vadd.xlane.f32.xlu1 %v1760_v54  ;;  %v4136_v63 = vld [vmem:[%s6378_s6 + $0x118] ss:$20 sps:$4 sm:$0xff]   ;;  %v4140_v0 = vld [vmem:[%s4012_s18 + $0x20] sm:$0xff]  ;;  %v4145_v1 = vld [vmem:[%s6378_s6 + $0x11c] ss:$20 sps:$4 sm:$0xff]   ;;  %v1769_v2 = vsel %vm1753_vm3, %v4124_v60, 0.0 }
  0x40   : > { %1755 = vadd.xlane.f32.xlu0 %v1754_v59  ;;  %v4150_v3 = vld [vmem:[%s4012_s18 + $0x38] sm:$0xff]  ;;  %1445 = vmatprep.subr.bf16.mxu0 %v4145_v1  ;;  %v4156_v4 = vld [vmem:[%s6378_s6 + $0xf4] ss:$20 sps:$4 sm:$0xff]   ;;  %v1766_v5 = vsel %vm1753_vm3, %v4140_v0, 0.0  ;;  %v4164_v6 = vld [vmem:[%s6378_s6 + $0xf0] ss:$20 sps:$4 sm:$0xff]  }
  0x41   : > { %911 = vmatpush1.bf16.msra.mxu1 %v3647_v39  ;;  %1446 = vmatpush1.bf16.msra.mxu0 %v4136_v63  ;;  %v4167_v7 = vld [vmem:[%s4012_s18 + $0x30] sm:$0xff]  ;;  %v4173_v8 = vld [vmem:[%s6378_s6 + $0xcc] ss:$20 sps:$4 sm:$0xff]   ;;  %v1775_v9 = vsel %vm1753_vm3, %v4150_v3, 0.0  ;;  %v4183_v11 = vld [vmem:[%s6378_s6 + $0xc8] ss:$20 sps:$4 sm:$0xff]  }
  0x42   : > { %912 = vmatprep.subr.bf16.mxu1 %v3648_v41  ;;  %1447 = vmatprep.subr.bf16.mxu0 %v4156_v4  ;;  %v1772_v10 = vsel %vm1753_vm3, %v4167_v7, 0.0  ;;  %v4186_v12 = vld [vmem:[%s4012_s18 + $0x48] sm:$0xff]  ;;  %v4192_v13 = vld [vmem:[%s6378_s6 + $0xa4] ss:$20 sps:$4 sm:$0xff]   ;;  %v4200_v15 = vld [vmem:[%s6378_s6 + $0xa0] ss:$20 sps:$4 sm:$0xff]  }
  0x43   : > { %1764 = vadd.xlane.f32.xlu1 %v1763_v58  ;;  %v2741_v14 = vsel %vm1753_vm3, %v4186_v12, 0.0  ;;  %v4203_v16 = vld [vmem:[%s4012_s18 + $0x50] sm:$0xff]  ;;  %v4217_v19 = vld [vmem:[%s6378_s6 + $0x78] ss:$20 sps:$4 sm:$0xff]   ;;  %v4220_v20 = vld [vmem:[%s4012_s18 + $0x60] sm:$0xff]  ;;  %v4246_v26 = vsel %vm1842_vm4, 1, %v6385_v51 }
  0x44   : > { %1758 = vadd.xlane.f32.xlu0 %v1757_v62  ;;  %v4209_v17 = vld [vmem:[%s6378_s6 + $0x7c] ss:$20 sps:$4 sm:$0xff]   ;;  %v2744_v18 = vsel %vm1753_vm3, %v4203_v16, 0.0  ;;  %v4226_v21 = vld [vmem:[%s6378_s6 + $0x54] ss:$20 sps:$4 sm:$0xff]   ;;  %v2750_v22 = vsel %vm1753_vm3, %v4220_v20, 0.0 }
  0x45   : > { %913 = vmatpush1.bf16.msra.mxu1 %v3650_v42  ;;  %1448 = vmatpush1.bf16.msra.mxu0 %v4164_v6  ;;  %v4234_v23 = vld [vmem:[%s6378_s6 + $0x50] ss:$20 sps:$4 sm:$0xff]   ;;  %v4243_v25 = vld [vmem:[%s6378_s6 + $0x2c] ss:$20 sps:$4 sm:$0xff]   ;;  %vm1844_vm5 = vcmp.ne.f32.partialorder %v4108_v52, 0.0  ;;  %vm1845_vm6 = vcmp.ne.f32.partialorder %v4111_v53, 0.0 }
  0x46   : > { %3542 = vmatmul.mubr.msk.bf16.gmra.mxu0 %vm718_vm2, %v3638_v40  ;;  %914 = vmatprep.subr.bf16.mxu1 %v3651_v43  ;;  %v4237_v24 = vld [vmem:[%s4012_s18 + $0x70] sm:$0xff]  ;;  %v4255_v28 = vld [vmem:[%s6378_s6 + $0x28] ss:$20 sps:$4 sm:$0xff]   ;;  %v4261_v29 = vld [vmem:[%s6378_s6 + $0x4] ss:$20 sps:$4 sm:$0xff]   ;;  %v4265_v30 = vsel %vm1844_vm5, 1, %v6385_v51 }
  0x47   : > { %1770 = vadd.xlane.f32.xlu1 %v1769_v2  ;;  %1449 = vmatprep.subr.bf16.mxu0 %v4173_v8  ;;  %v2756_v27 = vsel %vm1753_vm3, %v4237_v24, 0.0  ;;  %v4272_v32 = vld [vmem:[%s6378_s6] ss:$20 sps:$4 sm:$0xff]   ;;  %v4278_v33 = vld [vmem:[%s6378_s6 + $0x25c] ss:$20 sps:$4 sm:$0xff]   ;;  %v4282_v34 = vsel %vm1845_vm6, 1, %v6385_v51 }
  0x48   : > { %1767 = vadd.xlane.f32.xlu0 %v1766_v5  ;;  %vm1847_vm7 = vcmp.ne.f32.partialorder %v4124_v60, 0.0  ;;  %v4289_v35 = vld [vmem:[%s6378_s6 + $0x258] ss:$20 sps:$4 sm:$0xff]   ;;  %v4295_v36 = vld [vmem:[%s6378_s6 + $0x234] ss:$20 sps:$4 sm:$0xff]   ;;  %vm1849_vm8 = vcmp.ne.f32.partialorder %v4150_v3, 0.0 }
  0x49   : > { %915 = vmatpush1.bf16.msra.mxu1 %v3653_v44  ;;  %1450 = vmatpush1.bf16.msra.mxu0 %v4183_v11  ;;  %v4299_v37 = vsel %vm1847_vm7, 1, %v6385_v51  ;;  %v4306_v38 = vld [vmem:[%s6378_s6 + $0x230] ss:$20 sps:$4 sm:$0xff]   ;;  %v4312_v39 = vld [vmem:[%s6378_s6 + $0x20c] ss:$20 sps:$4 sm:$0xff]   ;;  %v4316_v40 = vsel %vm1849_vm8, 1, %v6385_v51 }
  0x4a   : > { %916 = vmatprep.subr.bf16.mxu1 %v4078_v45  ;;  %1451 = vmatprep.subr.bf16.mxu0 %v4192_v13  ;;  %v4322_v41 = vld [vmem:[%s6378_s6 + $0x208] ss:$20 sps:$4 sm:$0xff]   ;;  %vm1843_vm9 = vcmp.ne.f32.partialorder %v4118_v57, 0.0  ;;  %v4329_v42 = vld [vmem:[%s6378_s6 + $0x1e4] ss:$20 sps:$4 sm:$0xff]   ;;  %v6381_v52 = vmov 2  }
  0x4b   : > { %1776 = vadd.xlane.f32.xlu1 %v1775_v9  ;;  %v4333_v43 = vsel %vm1843_vm9, 1, %v6385_v51  ;;  %v4339_v44 = vld [vmem:[%s6378_s6 + $0x1e0] ss:$20 sps:$4 sm:$0xff]   ;;  %v4357_v53 = vld [vmem:[%s6378_s6 + $0x1b8] ss:$20 sps:$4 sm:$0xff]   ;;  %vm1846_vm11 = vcmp.ne.f32.partialorder %v4140_v0, 0.0 }
  0x4c   : > { %1773 = vadd.xlane.f32.xlu0 %v1772_v10  ;;  %v4367_v55 = vsel %vm1846_vm11, 1, %v6385_v51  ;;  %vm1848_vm12 = vcmp.ne.f32.partialorder %v4167_v7, 0.0  ;;  %v6389_v58 = vmov 3   ;;  %vm2827_vm13 = vcmp.ne.f32.partialorder %v4186_v12, 0.0  ;;  %v3306_v3 = vld [vmem:[%s6375_s3] ss:$0 sm:$0xff] }
  0x4d   : > { %917 = vmatpush1.bf16.msra.mxu1 %v4083_v46  ;;  %1452 = vmatpush1.bf16.msra.mxu0 %v4200_v15  ;;  %v4374_v57 = vsel %vm1848_vm12, 1, %v6385_v51  ;;  %v4385_v59 = vsel %vm2827_vm13, 1, %v6385_v51  ;;  %vm2830_vm14 = vcmp.ne.f32.partialorder %v4220_v20, 0.0  ;;  %vm2832_vm15 = vcmp.ne.f32.partialorder %v4237_v24, 0.0 }
  0x4e   : > { %918 = vmatprep.subr.bf16.mxu1 %v4090_v47  ;;  %1453 = vmatprep.subr.bf16.mxu0 %v4209_v17  ;;  %v4391_v60 = vsel %vm2830_vm14, 1, %v6385_v51  ;;  %v4397_v62 = vsel %vm2832_vm15, 1, %v6385_v51 }
  0x50   : > { %2742 = vadd.xlane.f32.xlu0 %v2741_v14 }
  0x51   : > { %919 = vmatpush1.bf16.msra.mxu1 %v3659_v48  ;;  %1454 = vmatpush1.bf16.msra.mxu0 %v4217_v19  ;;  %v4342_v48 = vld [vmem:[%s4012_s18 + $0x40] sm:$0xff] }
  0x52   : > { %920 = vmatprep.subr.bf16.mxu1 %v4099_v49  ;;  %1455 = vmatprep.subr.bf16.mxu0 %v4226_v21  ;;  %vm2826_vm10 = vcmp.ne.f32.partialorder %v4342_v48, 0.0 }
  0x53   : > { %v4363_v54 = vsel %vm2826_vm10, 1, %v6385_v51 }
  0x54   : > { %2745 = vadd.xlane.f32.xlu0 %v2744_v18 }
  0x55   : > { %921 = vmatpush1.bf16.msra.mxu1 %v3662_v50  ;;  %1456 = vmatpush1.bf16.msra.mxu0 %v4234_v23  ;;  %v4348_v50 = vld [vmem:[%s6378_s6 + $0x1bc] ss:$20 sps:$4 sm:$0xff]  }
  0x56   : > { %1518 = vmatprep.subr.bf16.mxu1 %v4129_v61  ;;  %1457 = vmatprep.subr.bf16.mxu0 %v4243_v25 }
  0x58   : > { %2751 = vadd.xlane.f32.xlu0 %v2750_v22  ;;  %v3663_v22 = vld [vmem:[%s6378_s6 + $0x120] ss:$20 sps:$4 sm:$0xff]  }
  0x59   : > { %1458 = vmatpush1.bf16.msra.mxu0 %v4255_v28 }
  0x5a   : > { %1459 = vmatprep.subr.bf16.mxu0 %v4261_v29 }
  0x5c   : > { %1931 = vperm.xlu1 %3620, %v4246_v26   ;;  %2757 = vadd.xlane.f32.xlu0 %v2756_v27 }
  0x5d   : > { %1460 = vmatpush1.bf16.msra.mxu0 %v4272_v32 }
  0x5e   : > { %1461 = vmatprep.subr.bf16.mxu0 %v4278_v33 }
  0x60   : > { %1937 = vperm.xlu1 %3620, %v4265_v30  }
  0x61   : > { %1462 = vmatpush2.bf16.msra.mxu0 %v4289_v35 }
  0x62   : > { %1463 = vmatprep.subr.bf16.mxu0 %v4295_v36 }
  0x64   : > { %1940 = vperm.xlu1 %3620, %v4282_v34  }
  0x65   : > { %1464 = vmatpush2.bf16.msra.mxu0 %v4306_v38 }
  0x66   : > { %1465 = vmatprep.subr.bf16.mxu0 %v4312_v39 }
  0x68   : > { %1946 = vperm.xlu1 %3620, %v4299_v37  }
  0x69   : > { %1466 = vmatpush2.bf16.msra.mxu0 %v4322_v41 }
  0x6a   : > { %1467 = vmatprep.subr.bf16.mxu0 %v4329_v42 }
  0x6c   : > { %1952 = vperm.xlu1 %3620, %v4316_v40  }
  0x6d   : > { %1468 = vmatpush2.bf16.msra.mxu0 %v4339_v44 }
  0x6e   : > { %1469 = vmatprep.subr.bf16.mxu0 %v4348_v50 }
  0x70   : > { %3621 = vset.pattern.permute.xlu1 %v6381_v52 }
  0x71   : > { %2006 = vperm.xlu1 %3621, %v4333_v43   ;;  %1470 = vmatpush2.bf16.msra.mxu0 %v4357_v53 }
  0x72   : > { %1859 = vperm.xlu0 %3624, %v4246_v26  }
  0x75   : > { %2009 = vperm.xlu1 %3621, %v4265_v30  }
  0x76   : > { %2843 = vperm.xlu0 %3624, %v4363_v54  }
  0x79   : > { %2015 = vperm.xlu1 %3621, %v4367_v55  }
  0x7a   : > { %3626 = vset.pattern.permute.xlu0 %v6382_v56 }
  0x7b   : > { %1934 = vperm.xlu0 %3626, %v4333_v43  }
  0x7d   : > { %2021 = vperm.xlu1 %3621, %v4374_v57  }
  0x7f   : > { %1943 = vperm.xlu0 %3626, %v4367_v55  }
  0x81   : > { %3622 = vset.pattern.permute.xlu1 %v6389_v58 }
  0x82   : > { %2075 = vperm.xlu1 %3622, %v4246_v26  }
  0x83   : > { %1949 = vperm.xlu0 %3626, %v4374_v57  }
  0x86   : > { %2081 = vperm.xlu1 %3622, %v4265_v30  }
  0x87   : > { %2918 = vperm.xlu0 %3626, %v4385_v59  }
  0x8a   : > { %2084 = vperm.xlu1 %3622, %v4282_v34  }
  0x8b   : > { %2927 = vperm.xlu0 %3626, %v4391_v60  }
  0x8e   : > { %2090 = vperm.xlu1 %3622, %v4299_v37  }
  0x8f   : > { %2933 = vperm.xlu0 %3626, %v4397_v62  }
  0x92   : > { %2096 = vperm.xlu1 %3622, %v4316_v40  }
  0x93   : > { %3628 = vset.pattern.permute.xlu0 %v6381_v52 }
  0x94   : > { %2003 = vperm.xlu0 %3628, %v4246_v26  }
  0x98   : > { %2012 = vperm.xlu0 %3628, %v4282_v34  }
  0x9c   : > { %2018 = vperm.xlu0 %3628, %v4299_v37  }
  0xa0   : > { %2024 = vperm.xlu0 %3628, %v4316_v40  }
  0xa4   : > { %2987 = vperm.xlu0 %3628, %v4363_v54  }
  0xfe   : > { %v3539_v0 = vpop.f32.mrf.mxu0 }
  0xff   : > { %v781_v56 = vadd.f32 %v3539_v0, %v3306_v3  ;;  %v3675_v0 = vld [vmem:[%s6378_s6 + $0xd0] ss:$20 sps:$4 sm:$0xff]  }
 0x100   : > { %v772_v2 = vpop.f32.mrf.mxu0 }
 0x101   : > { %v773_v7 = vadd.f32 %v3306_v3, %v772_v2  ;;  %v3671_v2 = vld [vmem:[%s6378_s6 + $0xfc] ss:$20 sps:$4 sm:$0xff]  }
 0x102   : > { %v3540_v5 = vpop.f32.mrf.mxu0 }
 0x103   : > { %v803_v14 = vmax.f32 %v773_v7, 0.0  ;;  %v784_v24 = vadd.f32 %v3540_v5, %v3306_v3  ;;  %v3669_v7 = vld [vmem:[%s6378_s6 + $0xf8] ss:$20 sps:$4 sm:$0xff]   ;;  %v3677_v5 = vld [vmem:[%s6378_s6 + $0xd4] ss:$20 sps:$4 sm:$0xff]  }
 0x104   : > { %v775_v9 = vpop.f32.mrf.mxu0 }
 0x105   : > { %v776_v10 = vadd.f32 %v3306_v3, %v775_v9  ;;  %v806_v9 = vmax.f32 %v784_v24, 0.0  ;;  %v3683_v24 = vld [vmem:[%s6378_s6 + $0xac] ss:$20 sps:$4 sm:$0xff]  }
 0x106   : > { %v3543_v12 = vpop.f32.mrf.mxu0 }
 0x107   : > { %v804_v18 = vmax.f32 %v776_v10, 0.0 }
 0x108   : > { %v788_v20 = vpop.f32.mrf.mxu0 }
 0x109   : > { %v811_v27 = vpack.c.bf16 %v804_v18, %v803_v14  ;;  %v805_v14 = vmax.f32 %v781_v56, 0.0  ;;  %v3681_v56 = vld [vmem:[%s6378_s6 + $0xa8] ss:$20 sps:$4 sm:$0xff]  }
 0x10a   : > { %v3544_v52 = vpop.f32.mrf.mxu0 }
 0x10b   : > { %939 = vmatmul.mubr.bf16.vlgmr.msra.gmra.mxu1 %v811_v27  ;;  %v812_v18 = vpack.c.bf16 %v806_v9, %v805_v14  ;;  %v789_v27 = vadd.f32 %v3306_v3, %v788_v20  ;;  %v3689_v20 = vld [vmem:[%s6378_s6 + $0x84] ss:$20 sps:$4 sm:$0xff]   ;;  %v3687_v9 = vld [vmem:[%s6378_s6 + $0x80] ss:$20 sps:$4 sm:$0xff]  }
 0x10c   : > { %948 = vmatprep.mubr.bf16.mxu1 %v6385_v51  ;;  %1519 = vmatpush1.bf16.msra.mxu1 %v3663_v22  ;;  %v791_v10 = vpop.f32.mrf.mxu0 }
 0x10d   : > { %1520 = vmatprep.subr.bf16.mxu1 %v3671_v2  ;;  %v792_v22 = vadd.f32 %v3306_v3, %v791_v10  ;;  %v807_v2 = vmax.f32 %v789_v27, 0.0  ;;  %v800_v10 = vadd.f32 %v3544_v52, %v3306_v3  ;;  %v3701_v52 = vld [vmem:[%s6378_s6 + $0x34] ss:$20 sps:$4 sm:$0xff]  }
 0x110   : > { %1521 = vmatpush1.bf16.msra.mxu1 %v3669_v7  ;;  %v808_v7 = vmax.f32 %v792_v22, 0.0  ;;  %v810_v22 = vmax.f32 %v800_v10, 0.0  ;;  %v3723_v10 = vld [vmem:[%s6378_s6 + $0x210] ss:$20 sps:$4 sm:$0xff]  }
 0x111   : > { %1522 = vmatprep.subr.bf16.mxu1 %v3677_v5  ;;  %v797_v5 = vadd.f32 %v3543_v12, %v3306_v3  ;;  %v3699_v3 = vld [vmem:[%s6378_s6 + $0x30] ss:$20 sps:$4 sm:$0xff]  }
 0x112   : > { %v813_v14 = vpack.c.bf16 %v808_v7, %v807_v2  ;;  %v3713_v2 = vld [vmem:[%s6378_s6 + $0x264] ss:$20 sps:$4 sm:$0xff]   ;;  %v3711_v7 = vld [vmem:[%s6378_s6 + $0x260] ss:$20 sps:$4 sm:$0xff]  }
 0x113   : > { %949 = vmatmul.mubr.bf16.gmra.mxu1 %v812_v18  ;;  %v3693_v18 = vld [vmem:[%s6378_s6 + $0x58] ss:$20 sps:$4 sm:$0xff]   ;;  %v809_v27 = vmax.f32 %v797_v5, 0.0  ;;  %v3725_v5 = vld [vmem:[%s6378_s6 + $0x214] ss:$20 sps:$4 sm:$0xff]  }
 0x114   : > { %958 = vmatprep.mubr.bf16.mxu1 %v6385_v51  ;;  %1523 = vmatpush1.bf16.msra.mxu1 %v3675_v0  ;;  %v3695_v0 = vld [vmem:[%s6378_s6 + $0x5c] ss:$20 sps:$4 sm:$0xff]  }
 0x115   : > { %1524 = vmatprep.subr.bf16.mxu1 %v3683_v24  ;;  %v814_v12 = vpack.c.bf16 %v810_v22, %v809_v27  ;;  %v3707_v24 = vld [vmem:[%s6378_s6 + $0xc] ss:$20 sps:$4 sm:$0xff]   ;;  %v3743_v22 = vld [vmem:[%s6378_s6 + $0x19c] ss:$20 sps:$4 sm:$0xff]  }
 0x116   : > { %v3735_v27 = vld [vmem:[%s6378_s6 + $0x1c0] ss:$20 sps:$4 sm:$0xff]  }
 0x118   : > { %1525 = vmatpush1.bf16.msra.mxu1 %v3681_v56  ;;  %v3705_v56 = vld [vmem:[%s6378_s6 + $0x8] ss:$20 sps:$4 sm:$0xff]  }
 0x119   : > { %1526 = vmatprep.subr.bf16.mxu1 %v3689_v20  ;;  %v3719_v20 = vld [vmem:[%s6378_s6 + $0x23c] ss:$20 sps:$4 sm:$0xff]  }
 0x11b   : > { %959 = vmatmul.mubr.bf16.gmra.mxu1 %v813_v14  ;;  %v3731_v14 = vld [vmem:[%s6378_s6 + $0x1ec] ss:$20 sps:$4 sm:$0xff]  }
 0x11c   : > { %968 = vmatprep.mubr.bf16.mxu1 %v6385_v51  ;;  %1527 = vmatpush1.bf16.msra.mxu1 %v3687_v9  ;;  %v3717_v9 = vld [vmem:[%s6378_s6 + $0x238] ss:$20 sps:$4 sm:$0xff]  }
 0x11d   : > { %1528 = vmatprep.subr.bf16.mxu1 %v3695_v0  ;;  %v3729_v0 = vld [vmem:[%s6378_s6 + $0x1e8] ss:$20 sps:$4 sm:$0xff]  }
 0x120   : > { %1529 = vmatpush1.bf16.msra.mxu1 %v3693_v18  ;;  %v3737_v18 = vld [vmem:[%s6378_s6 + $0x1c4] ss:$20 sps:$4 sm:$0xff]  }
 0x121   : > { %1530 = vmatprep.subr.bf16.mxu1 %v3701_v52  ;;  %v4495_v52 = vld [vmem:[%s6378_s6 + $0x194] ss:$20 sps:$4 sm:$0xff]  }
 0x122   : > { %1471 = vmatprep.subr.bf16.mxu0 %v4495_v52 }
 0x123   : > { %969 = vmatmul.mubr.bf16.gmra.mxu1 %v814_v12  ;;  %v4503_v12 = vld [vmem:[%s6378_s6 + $0x190] ss:$20 sps:$4 sm:$0xff]  }
 0x124   : > { %1531 = vmatpush1.bf16.msra.mxu1 %v3699_v3  ;;  %v3741_v3 = vld [vmem:[%s6378_s6 + $0x198] ss:$20 sps:$4 sm:$0xff]   ;;  %1472 = vmatpush2.bf16.msra.mxu0 %v4503_v12 }
 0x125   : > { %1532 = vmatprep.subr.bf16.mxu1 %v3707_v24  ;;  %v3749_v24 = vld [vmem:[%s6378_s6 + $0x174] ss:$20 sps:$4 sm:$0xff]  }
 0x128   : > { %1533 = vmatpush1.bf16.msra.mxu1 %v3705_v56  ;;  %v4513_v56 = vld [vmem:[%s6378_s6 + $0x16c] ss:$20 sps:$4 sm:$0xff]  }
 0x129   : > { %1534 = vmatprep.subr.bf16.mxu1 %v3713_v2  ;;  %6447 = vst [vmem:[#allocation4_spill] sm:$0xff] %v4513_v56  ;;  %v3747_v2 = vld [vmem:[%s6378_s6 + $0x170] ss:$20 sps:$4 sm:$0xff]   ;;  %1473 = vmatprep.subr.bf16.mxu0 %v4513_v56 }
 0x12c   : > { %1535 = vmatpush2.bf16.msra.mxu1 %v3711_v7  ;;  %v4521_v7 = vld [vmem:[%s6378_s6 + $0x168] ss:$20 sps:$4 sm:$0xff]  }
 0x12d   : > { %1536 = vmatprep.subr.bf16.mxu1 %v3719_v20  ;;  %6448 = vst [vmem:[#allocation5_spill] sm:$0xff] %v4521_v7  ;;  %1474 = vmatpush2.bf16.msra.mxu0 %v4521_v7  ;;  %v3755_v20 = vld [vmem:[%s6378_s6 + $0x14c] ss:$20 sps:$4 sm:$0xff]  }
 0x130   : > { %1537 = vmatpush2.bf16.msra.mxu1 %v3717_v9  ;;  %v4531_v9 = vld [vmem:[%s6378_s6 + $0x144] ss:$20 sps:$4 sm:$0xff]  }
 0x131   : > { %1538 = vmatprep.subr.bf16.mxu1 %v3725_v5  ;;  %6449 = vst [vmem:[#allocation6_spill] sm:$0xff] %v4531_v9  ;;  %v6383_v5 = vmov 4   ;;  %1475 = vmatprep.subr.bf16.mxu0 %v4531_v9  ;;  %v6457_v9 = vmov 1  }
 0x132   : > { %3623 = vset.pattern.permute.xlu1 %v6383_v5 }
 0x133   : > { %2150 = vperm.xlu1 %3623, %v4333_v43  }
 0x134   : > { %1539 = vmatpush2.bf16.msra.mxu1 %v3723_v10  ;;  %v3753_v10 = vld [vmem:[%s6378_s6 + $0x148] ss:$20 sps:$4 sm:$0xff]  }
 0x135   : > { %1540 = vmatprep.subr.bf16.mxu1 %v3731_v14  ;;  %v4540_v14 = vld [vmem:[%s6378_s6 + $0x140] ss:$20 sps:$4 sm:$0xff]  }
 0x136   : > { %6450 = vst [vmem:[#allocation7_spill] sm:$0xff] %v4540_v14  ;;  %1476 = vmatpush2.bf16.msra.mxu0 %v4540_v14 }
 0x137   : > { %2153 = vperm.xlu1 %3623, %v4265_v30  }
 0x138   : > { %1541 = vmatpush2.bf16.msra.mxu1 %v3729_v0  ;;  %v4549_v0 = vld [vmem:[%s6378_s6 + $0x268] ss:$20 sps:$4 sm:$0xff]  }
 0x139   : > { %1542 = vmatprep.subr.bf16.mxu1 %v3737_v18  ;;  %6451 = vst [vmem:[#allocation8_spill] sm:$0xff] %v4549_v0  ;;  %3450 = vmatprep.subr.bf16.mxu0 %v4549_v0  ;;  %v3433_v18 = vld [vmem:[%s4012_s18 + $0x58] sm:$0xff] }
 0x13a   : > { %vm2829_vm0 = vcmp.ne.f32.partialorder %v3433_v18, 0.0 }
 0x13b   : > { %2159 = vperm.xlu1 %3623, %v4367_v55  }
 0x13c   : > { %1543 = vmatpush2.bf16.msra.mxu1 %v3735_v27  ;;  %v4558_v27 = vsel %vm2829_vm0, 1, %v6385_v51 }
 0x13d   : > { %1544 = vmatprep.subr.bf16.mxu1 %v3743_v22  ;;  %2996 = vperm.xlu0 %3628, %v4558_v27   ;;  %v3435_v22 = vld [vmem:[%s4012_s18 + $0x68] sm:$0xff] }
 0x13e   : > { %vm2831_vm1 = vcmp.ne.f32.partialorder %v3435_v22, 0.0  ;;  %v2753_v5 = vsel %vm1753_vm3, %v3435_v22, 0.0 }
 0x13f   : > { %2165 = vperm.xlu1 %3623, %v4374_v57  }
 0x140   : > { %1545 = vmatpush2.bf16.msra.mxu1 %v3741_v3  ;;  %v3437_v3 = vld [vmem:[%s4012_s18 + $0x78] sm:$0xff] }
 0x141   : > { %1546 = vmatprep.subr.bf16.mxu1 %v3749_v24  ;;  %vm2833_vm4 = vcmp.ne.f32.partialorder %v3437_v3, 0.0  ;;  %v4564_v24 = vsel %vm2831_vm1, 1, %v6385_v51 }
 0x142   : > { %3002 = vperm.xlu0 %3628, %v4564_v24  }
 0x143   : > { %3625 = vset.pattern.permute.xlu1 %v6385_v51 }
 0x144   : > { %1547 = vmatpush2.bf16.msra.mxu1 %v3747_v2  ;;  %v4568_v2 = vsel %vm2833_vm4, 1, %v6385_v51  ;;  %v2759_v51 = vsel %vm1753_vm3, %v3437_v3, 0.0 }
 0x145   : > { %1548 = vmatprep.subr.bf16.mxu1 %v3755_v20  ;;  %v2738_v20 = vsel %vm1753_vm3, %v4342_v48, 0.0  ;;  %v6452_v48 = vmov 4  }
 0x146   : > { %3008 = vperm.xlu0 %3628, %v4568_v2  }
 0x148   : > { %1549 = vmatpush2.bf16.msra.mxu1 %v3753_v10  ;;  %v2747_v10 = vsel %vm1753_vm3, %v3433_v18, 0.0  ;;  %vm2828_vm3 = vcmp.ne.f32.partialorder %v4203_v16, 0.0  ;;  %v581_v16 = vld [vmem:[%s6377_s5] sm:$0x3] }
 0x149   : > { %3545 = vmatprep.subr.bf16.mxu1 %v4035_v31 }
 0x14a   : > { %3630 = vset.pattern.permute.xlu0 %v6389_v58 }
 0x14b   : > { %2078 = vperm.xlu0 %3630, %v4333_v43  }
 0x14f   : > { %2087 = vperm.xlu0 %3630, %v4367_v55  }
 0x153   : > { %2093 = vperm.xlu0 %3630, %v4374_v57  }
 0x157   : > { %3062 = vperm.xlu0 %3630, %v4385_v59  }
 0x15b   : > { %3071 = vperm.xlu0 %3630, %v4391_v60  }
 0x15f   : > { %3077 = vperm.xlu0 %3630, %v4397_v62  }
 0x163   : > { %2739 = vadd.xlane.f32.xlu1 %v2738_v20  ;;  %3632 = vset.pattern.permute.xlu0 %v6452_v48 }
 0x164   : > { %2147 = vperm.xlu0 %3632, %v4246_v26  }
 0x167   : > { %2748 = vadd.xlane.f32.xlu1 %v2747_v10 }
 0x168   : > { %2156 = vperm.xlu0 %3632, %v4282_v34  }
 0x16b   : > { %2754 = vadd.xlane.f32.xlu1 %v2753_v5 }
 0x16c   : > { %2162 = vperm.xlu0 %3632, %v4299_v37  }
 0x16f   : > { %2760 = vadd.xlane.f32.xlu1 %v2759_v51  ;;  %v6453_v51 = vmov 0  }
 0x170   : > { %2168 = vperm.xlu0 %3632, %v4316_v40   ;;  %v4602_v26 = vsel %vm2828_vm3, 1, %v6453_v51 }
 0x174   : > { %3131 = vperm.xlu0 %3632, %v4363_v54  }
 0x178   : > { %3140 = vperm.xlu0 %3632, %v4558_v27  }
 0x17c   : > { %3146 = vperm.xlu0 %3632, %v4564_v24  }
 0x180   : > { %1862 = vperm.xlu1 %3625, %v4333_v43   ;;  %3152 = vperm.xlu0 %3632, %v4568_v2  }
 0x184   : > { %1865 = vperm.xlu1 %3625, %v4265_v30   ;;  %v6387_v30 = vlaneseq }
 0x188   : > { %1868 = vperm.xlu1 %3625, %v4282_v34   ;;  %v4606_v34 = vshrl.u32 %v6387_v30, 7 }
 0x18a   : > { %6454 = vst [vmem:[#allocation9_spill] sm:$0xff] %v4606_v34 }
 0x18c   : > { %1871 = vperm.xlu1 %3625, %v4367_v55  }
 0x190   : > { %1874 = vperm.xlu1 %3625, %v4299_v37   ;;  %v6388_v37 = vsub.s32 1, %v4606_v34 }
 0x192   : > { %v4617_v55 = vrot.slane %v581_v16, %v6388_v37 }
 0x194   : > { %1877 = vperm.xlu1 %3625, %v4374_v57   ;;  %6455 = vst [vmem:[#allocation10_spill] sm:$0xff] %v4617_v55 }
 0x198   : > { %1880 = vperm.xlu1 %3625, %v4316_v40   ;;  %v6392_v40 = vsub.s32 0, %v4606_v34 }
 0x19a   : > { %v4621_v57 = vrot.slane %v581_v16, %v6392_v40 }
 0x19c   : > { %2846 = vperm.xlu1 %3625, %v4385_v59   ;;  %6456 = vst [vmem:[#allocation11_spill] sm:$0xff] %v4621_v57 }
 0x1a0   : > { %2849 = vperm.xlu1 %3625, %v4602_v26  }
 0x1a4   : > { %2852 = vperm.xlu1 %3625, %v4558_v27  }
 0x1a8   : > { %2855 = vperm.xlu1 %3625, %v4391_v60  }
 0x1ac   : > { %2858 = vperm.xlu1 %3625, %v4564_v24  }
 0x1b0   : > { %2861 = vperm.xlu1 %3625, %v4397_v62  }
 0x1b4   : > { %2864 = vperm.xlu1 %3625, %v4568_v2  }
 0x1b8   : > { %3627 = vset.pattern.permute.xlu1 %v6457_v9 }
 0x1b9   : > { %2915 = vperm.xlu1 %3627, %v4363_v54  }
 0x1bd   : > { %2921 = vperm.xlu1 %3627, %v4602_v26  }
 0x1c1   : > { %2924 = vperm.xlu1 %3627, %v4558_v27  }
 0x1c5   : > { %2930 = vperm.xlu1 %3627, %v4564_v24  }
 0x1c9   : > { %2936 = vperm.xlu1 %3627, %v4568_v2  }
 0x1cb   : > { %v940_v43 = vpop.f32.mrf.mxu1 }
 0x1cc   : > { %v941_v20 = vadd.f32 %v940_v43, %v4621_v57 }
 0x1cd   : > { %v942_v5 = vpop.f32.mrf.mxu1 }
 0x1ce   : > { %v943_v22 = vadd.f32 %v942_v5, %v4617_v55  ;;  %v979_v40 = vmax.f32 %v941_v20, 0.0  ;;  %v3760_v5 = vld [vmem:[%s6378_s6 + $0x128] ss:$20 sps:$4 sm:$0xff]  }
 0x1cf   : > { %v944_v18 = vpop.f32.mrf.mxu1 }
 0x1d0   : > { %v945_v3 = vadd.f32 %v944_v18, %v4621_v57  ;;  %v980_v34 = vmax.f32 %v943_v22, 0.0 }
 0x1d1   : > { %v946_v10 = vpop.f32.mrf.mxu1 }
 0x1d2   : > { %v947_v30 = vadd.f32 %v946_v10, %v4617_v55  ;;  %v981_v37 = vmax.f32 %v945_v3, 0.0  ;;  %v3761_v3 = vld [vmem:[%s6378_s6 + $0x240] ss:$20 sps:$4 sm:$0xff]  }
 0x1d3   : > { %v950_v58 = vpop.f32.mrf.mxu1 }
 0x1d4   : > { %v982_v16 = vmax.f32 %v947_v30, 0.0  ;;  %v4635_v43 = vpack.c.bf16 %v981_v37, %v979_v40 }
 0x1d5   : > { %v952_v0 = vpop.f32.mrf.mxu1 }
 0x1d6   : > { %v4629_v14 = vpack.c.bf16 %v982_v16, %v980_v34  ;;  %v953_v22 = vadd.f32 %v952_v0, %v4617_v55  ;;  %v951_v34 = vadd.f32 %v950_v58, %v4621_v57  ;;  %v3762_v0 = vld [vmem:[%s6378_s6 + $0x100] ss:$20 sps:$4 sm:$0xff]   ;;  %v3763_v58 = vld [vmem:[%s6378_s6 + $0x218] ss:$20 sps:$4 sm:$0xff]  }
 0x1d7   : > { %v954_v18 = vpop.f32.mrf.mxu1 }
 0x1d8   : > { %v955_v30 = vadd.f32 %v954_v18, %v4621_v57  ;;  %1477 = vmatprep.mubr.bf16.mxu0 %v4629_v14  ;;  %1550 = vmatprep.mubr.bf16.mxu1 %v4629_v14  ;;  %v984_v16 = vmax.f32 %v953_v22, 0.0 }
 0x1d9   : > { %v956_v20 = vpop.f32.mrf.mxu1  ;;  %1478 = vmatmul.mubr.bf16.vlgmr.msra.gmra.mxu0 %v4635_v43  ;;  %1551 = vmatmul.mubr.bf16.vlgmr.msra.gmra.mxu1 %v4635_v43 }
 0x1da   : > { %v957_v37 = vadd.f32 %v956_v20, %v4617_v55  ;;  %3546 = vmatpush3.bf16.msra.mxu1 %v4035_v31  ;;  %3451 = vmatpush3.bf16.msra.mxu0 %v3760_v5  ;;  %v985_v40 = vmax.f32 %v955_v30, 0.0  ;;  %v983_v20 = vmax.f32 %v951_v34, 0.0 }
 0x1db   : > { %v960_v10 = vpop.f32.mrf.mxu1  ;;  %3452 = vmatprep.subr.bf16.mxu0 %v3761_v3  ;;  %2433 = vmatprep.subr.bf16.mxu1 %v4145_v1  ;;  %v3764_v3 = vld [vmem:[%s6378_s6 + $0xd8] ss:$20 sps:$4 sm:$0xff]   ;;  %v3765_v1 = vld [vmem:[%s6378_s6 + $0x1f0] ss:$20 sps:$4 sm:$0xff]  }
 0x1dc   : > { %v986_v18 = vmax.f32 %v957_v37, 0.0  ;;  %v4663_v30 = vpack.c.bf16 %v985_v40, %v983_v20  ;;  %v961_v34 = vadd.f32 %v960_v10, %v4621_v57  ;;  %v3766_v40 = vld [vmem:[%s6378_s6 + $0xb0] ss:$20 sps:$4 sm:$0xff]   ;;  %v3767_v10 = vld [vmem:[%s6378_s6 + $0x1c8] ss:$20 sps:$4 sm:$0xff]  }
 0x1dd   : > { %v962_v31 = vpop.f32.mrf.mxu1 }
 0x1de   : > { %v4658_v5 = vpack.c.bf16 %v986_v18, %v984_v16  ;;  %3453 = vmatpush3.bf16.msra.mxu0 %v3762_v0  ;;  %v963_v9 = vadd.f32 %v962_v31, %v4617_v55  ;;  %v987_v20 = vmax.f32 %v961_v34, 0.0 }
 0x1df   : > { %v964_v7 = vpop.f32.mrf.mxu1  ;;  %3454 = vmatprep.subr.bf16.mxu0 %v3763_v58 }
 0x1e0   : > { %v965_v22 = vadd.f32 %v964_v7, %v4621_v57  ;;  %1487 = vmatprep.mubr.bf16.mxu0 %v4658_v5  ;;  %1560 = vmatprep.mubr.bf16.mxu1 %v4658_v5  ;;  %v988_v16 = vmax.f32 %v963_v9, 0.0  ;;  %v3769_v9 = vld [vmem:[%s6378_s6 + $0x1a0] ss:$20 sps:$4 sm:$0xff]  }
 0x1e1   : > { %v966_v37 = vpop.f32.mrf.mxu1  ;;  %1488 = vmatmul.mubr.bf16.gmra.mxu0 %v4663_v30  ;;  %1561 = vmatmul.mubr.bf16.gmra.mxu1 %v4663_v30 }
 0x1e2   : > { %v967_v0 = vadd.f32 %v966_v37, %v4617_v55  ;;  %3455 = vmatpush3.bf16.msra.mxu0 %v3764_v3  ;;  %v989_v7 = vmax.f32 %v965_v22, 0.0  ;;  %v3768_v3 = vld [vmem:[%s6378_s6 + $0x88] ss:$20 sps:$4 sm:$0xff]  }
 0x1e3   : > { %v970_v58 = vpop.f32.mrf.mxu1  ;;  %3456 = vmatprep.subr.bf16.mxu0 %v3765_v1 }
 0x1e4   : > { %v990_v18 = vmax.f32 %v967_v0, 0.0  ;;  %v4689_v22 = vpack.c.bf16 %v989_v7, %v987_v20  ;;  %v971_v0 = vadd.f32 %v970_v58, %v4621_v57  ;;  %v3771_v58 = vld [vmem:[%s6378_s6 + $0x178] ss:$20 sps:$4 sm:$0xff]  }
 0x1e5   : > { %v972_v31 = vpop.f32.mrf.mxu1 }
 0x1e6   : > { %v4683_v56 = vpack.c.bf16 %v990_v18, %v988_v16  ;;  %3457 = vmatpush3.bf16.msra.mxu0 %v3766_v40  ;;  %v973_v34 = vadd.f32 %v972_v31, %v4617_v55  ;;  %v991_v31 = vmax.f32 %v971_v0, 0.0  ;;  %v3774_v0 = vld [vmem:[%s6378_s6 + $0x10] ss:$20 sps:$4 sm:$0xff]  }
 0x1e7   : > { %v974_v1 = vpop.f32.mrf.mxu1  ;;  %3458 = vmatprep.subr.bf16.mxu0 %v3767_v10  ;;  %v3770_v10 = vld [vmem:[%s6378_s6 + $0x60] ss:$20 sps:$4 sm:$0xff]  }
 0x1e8   : > { %v975_v37 = vadd.f32 %v974_v1, %v4621_v57  ;;  %1497 = vmatprep.mubr.bf16.mxu0 %v4683_v56  ;;  %1570 = vmatprep.mubr.bf16.mxu1 %v4683_v56  ;;  %v992_v18 = vmax.f32 %v973_v34, 0.0  ;;  %v3773_v34 = vld [vmem:[%s6378_s6 + $0x150] ss:$20 sps:$4 sm:$0xff]  }
 0x1e9   : > { %v976_v40 = vpop.f32.mrf.mxu1  ;;  %1498 = vmatmul.mubr.bf16.gmra.mxu0 %v4689_v22  ;;  %1571 = vmatmul.mubr.bf16.gmra.mxu1 %v4689_v22 }
 0x1ea   : > { %v977_v7 = vadd.f32 %v976_v40, %v4617_v55  ;;  %3459 = vmatpush3.bf16.msra.mxu0 %v3768_v3  ;;  %v993_v16 = vmax.f32 %v975_v37, 0.0  ;;  %v3772_v3 = vld [vmem:[%s6378_s6 + $0x38] ss:$20 sps:$4 sm:$0xff]   ;;  %v4714_v40 = vpop.xlane.xlu0 %1755  ;;  %v3775_v37 = vld [vmem:[%s4010_s17 + $0x20] sm:$0xff]  }
 0x1eb   : > { %3460 = vmatprep.subr.bf16.mxu0 %v3769_v9 }
 0x1ec   : > { %v994_v20 = vmax.f32 %v977_v7, 0.0  ;;  %v4717_v9 = vpack.c.bf16 %v993_v16, %v991_v31  ;;  %v3776_v16 = vld [vmem:[%s4010_s17 + $0x28] sm:$0xff]   ;;  %v3780_v31 = vld [vmem:[%s6376_s4 + $0x70] ss:$8 sps:$4 sm:$0xff]  }
 0x1ee   : > { %v4709_v1 = vpack.c.bf16 %v994_v20, %v992_v18  ;;  %3461 = vmatpush3.bf16.msra.mxu0 %v3770_v10  ;;  %v4732_v7 = vpop.xlane.xlu0 %1758  ;;  %v6458_v10 = vmov 2   ;;  %v4741_v18 = vpop.xlane.xlu1 %1761 }
 0x1ef   : > { %3462 = vmatprep.subr.bf16.mxu0 %v3771_v58  ;;  %3629 = vset.pattern.permute.xlu1 %v6458_v10  ;;  %v3777_v58 = vld [vmem:[%s4010_s17 + $0x30] sm:$0xff]   ;;  %vm1779_vm5 = vcmp.lt.f32.partialorder %v4732_v7, 0.9 }
 0x1f0   : > { %1507 = vmatprep.mubr.bf16.mxu0 %v4709_v1  ;;  %1580 = vmatprep.mubr.bf16.mxu1 %v4709_v1  ;;  %v3788_v10 = vld [vmem:[%s6376_s4 + $0x30] ss:$8 sps:$4 sm:$0xff]  }
 0x1f1   : > { %1508 = vmatmul.mubr.bf16.gmra.mxu0 %v4717_v9  ;;  %1581 = vmatmul.mubr.bf16.gmra.mxu1 %v4717_v9 }
 0x1f2   : > { %3463 = vmatpush3.bf16.msra.mxu0 %v3772_v3  ;;  %1623 = vmatprep.mubr.bf16.mxu0 %v4629_v14  ;;  %v3779_v14 = vld [vmem:[%s6376_s4 + $0x74] ss:$8 sps:$4 sm:$0xff]   ;;  %v4747_v20 = vpop.xlane.xlu0 %1767  ;;  %v3781_v3 = vld [vmem:[%s6376_s4 + $0x64] ss:$8 sps:$4 sm:$0xff]  }
 0x1f3   : > { %3464 = vmatprep.subr.bf16.mxu0 %v3773_v34  ;;  %3547 = vmatprep.mubr.msk.bf16.mxu1 %vm718_vm2, %v3775_v37  ;;  %v3782_v34 = vld [vmem:[%s6376_s4 + $0x60] ss:$8 sps:$4 sm:$0xff]   ;;  %v3783_v37 = vld [vmem:[%s6376_s4 + $0x54] ss:$8 sps:$4 sm:$0xff]  }
 0x1f4   : > { %2990 = vperm.xlu1 %3629, %v4385_v59  }
 0x1f6   : > { %3465 = vmatpush3.bf16.msra.mxu0 %v3774_v0  ;;  %v6461_v0 = vmov 3  }
 0x1f7   : > { %2336 = vmatprep.subr.bf16.mxu0 %v3779_v14 }
 0x1f8   : > { %2993 = vperm.xlu1 %3629, %v4602_v26  }
 0x1f9   : > { %1624 = vmatmul.mubr.bf16.vlgmr.msra.gmra.mxu0 %v4635_v43  ;;  %3548 = vmatmul.mubr.msk.bf16.vlgmr.msra.gmra.mxu1 %vm718_vm2, %v3776_v16  ;;  %v3778_v43 = vld [vmem:[%s4010_s17 + $0x38] sm:$0xff]  }
 0x1fa   : > { %1631 = vmatprep.mubr.bf16.mxu0 %v4658_v5  ;;  %3551 = vmatprep.mubr.msk.bf16.mxu1 %vm718_vm2, %v3777_v58  ;;  %v4759_v5 = vpop.xlane.xlu1 %1764 }
 0x1fb   : > { %2337 = vmatpush1.bf16.msra.mxu0 %v3780_v31  ;;  %2434 = vmatpush1.bf16.msra.mxu1 %v4136_v63  ;;  %v4765_v63 = vpop.xlane.xlu0 %1773  ;;  %vm1781_vm13 = vcmp.lt.f32.partialorder %v4759_v5, 0.9 }
 0x1fc   : > { %2338 = vmatprep.subr.bf16.mxu0 %v3781_v3  ;;  %2435 = vmatprep.subr.bf16.mxu1 %v4156_v4  ;;  %v3784_v4 = vld [vmem:[%s6376_s4 + $0x50] ss:$8 sps:$4 sm:$0xff]  }
 0x1fd   : > { %2999 = vperm.xlu1 %3629, %v4391_v60  }
 0x1ff   : > { %2339 = vmatpush1.bf16.msra.mxu0 %v3782_v34  ;;  %2436 = vmatpush1.bf16.msra.mxu1 %v4164_v6  ;;  %v4779_v6 = vpop.xlane.xlu1 %1770 }
 0x200   : > { %2340 = vmatprep.subr.bf16.mxu0 %v3783_v37  ;;  %2437 = vmatprep.subr.bf16.mxu1 %v4173_v8  ;;  %v3785_v8 = vld [vmem:[%s6376_s4 + $0x44] ss:$8 sps:$4 sm:$0xff]  }
 0x201   : > { %1632 = vmatmul.mubr.bf16.gmra.mxu0 %v4663_v30  ;;  %3552 = vmatmul.mubr.msk.bf16.gmra.mxu1 %vm718_vm2, %v3778_v43  ;;  %v4785_v30 = vpop.xlane.xlu0 %2742  ;;  %vm1778_vm2 = vcmp.lt.f32.partialorder %v4714_v40, 0.9 }
 0x202   : > { %1639 = vmatprep.mubr.bf16.mxu0 %v4683_v56  ;;  %6459 = vst [vmem:[#allocation12_spill] sm:$0xff] %v4785_v30  ;;  %3005 = vperm.xlu1 %3629, %v4397_v62   ;;  %v3786_v56 = vld [vmem:[%s6376_s4 + $0x40] ss:$8 sps:$4 sm:$0xff]  }
 0x203   : > { %2341 = vmatpush1.bf16.msra.mxu0 %v3784_v4  ;;  %2438 = vmatpush1.bf16.msra.mxu1 %v4183_v11  ;;  %v3787_v11 = vld [vmem:[%s6376_s4 + $0x34] ss:$8 sps:$4 sm:$0xff]  }
 0x204   : > { %2342 = vmatprep.subr.bf16.mxu0 %v3785_v8  ;;  %2439 = vmatprep.subr.bf16.mxu1 %v4192_v13  ;;  %v4798_v13 = vpop.xlane.xlu1 %1776 }
 0x205   : > { %6460 = vst [vmem:[#allocation13_spill] sm:$0xff] %v4798_v13 }
 0x206   : > { %3631 = vset.pattern.permute.xlu1 %v6461_v0 }
 0x207   : > { %2343 = vmatpush1.bf16.msra.mxu0 %v3786_v56  ;;  %2440 = vmatpush1.bf16.msra.mxu1 %v4200_v15  ;;  %v4805_v15 = vpop.xlane.xlu0 %2745 }
 0x208   : > { %2344 = vmatprep.subr.bf16.mxu0 %v3787_v11  ;;  %2441 = vmatprep.subr.bf16.mxu1 %v4209_v17  ;;  %6462 = vst [vmem:[#allocation14_spill] sm:$0xff] %v4805_v15  ;;  %v4812_v17 = vpop.permute.xlu1 %1931 }
 0x209   : > { %1640 = vmatmul.mubr.bf16.gmra.mxu0 %v4689_v22  ;;  %3059 = vperm.xlu1 %3631, %v4363_v54   ;;  %vm1954_vm8 = vcmp.eq.s32.totalorder %v4812_v17, 1 }
 0x20a   : > { %1647 = vmatprep.mubr.bf16.mxu0 %v4709_v1 }
 0x20b   : > { %2345 = vmatpush1.bf16.msra.mxu0 %v3788_v10  ;;  %2442 = vmatpush1.bf16.msra.mxu1 %v4217_v19  ;;  %v4818_v19 = vpop.xlane.xlu0 %2751 }
 0x20c   : > { %2346 = vmatprep.subr.bf16.mxu0 %v4078_v45  ;;  %2443 = vmatprep.subr.bf16.mxu1 %v4226_v21  ;;  %6463 = vst [vmem:[#allocation15_spill] sm:$0xff] %v4818_v19  ;;  %v3789_v45 = vld [vmem:[%s6376_s4 + $0x10] ss:$8 sps:$4 sm:$0xff]  }
 0x20d   : > { %3065 = vperm.xlu1 %3631, %v4602_v26  }
 0x20f   : > { %2347 = vmatpush1.bf16.msra.mxu0 %v4083_v46  ;;  %2444 = vmatpush1.bf16.msra.mxu1 %v4234_v23  ;;  %v4828_v46 = vpop.permute.xlu1 %1937  ;;  %v4834_v21 = vpop.xlane.xlu0 %2757 }
 0x210   : > { %2348 = vmatprep.subr.bf16.mxu0 %v4090_v47  ;;  %2445 = vmatprep.subr.bf16.mxu1 %v4243_v25  ;;  %v3790_v47 = vld [vmem:[%s6376_s4] ss:$8 sps:$4 sm:$0xff]   ;;  %6464 = vst [vmem:[#allocation16_spill] sm:$0xff] %v4834_v21 }
 0x211   : > { %1648 = vmatmul.mubr.bf16.gmra.mxu0 %v4717_v9  ;;  %3068 = vperm.xlu1 %3631, %v4558_v27  }
 0x212   : > { %2368 = vmatprep.mubr.bf16.mxu0 %v6453_v51 }
 0x213   : > { %2349 = vmatpush1.bf16.msra.mxu0 %v3789_v45  ;;  %2446 = vmatpush1.bf16.msra.mxu1 %v4255_v28  ;;  %v4844_v23 = vpop.permute.xlu0 %1859 }
 0x214   : > { %2350 = vmatprep.subr.bf16.mxu0 %v4099_v49  ;;  %2447 = vmatprep.subr.bf16.mxu1 %v4261_v29  ;;  %v4840_v49 = vpop.permute.xlu1 %1940  ;;  %vm1882_vm7 = vcmp.eq.s32.totalorder %v4844_v23, 1 }
 0x215   : > { %3074 = vperm.xlu1 %3631, %v4564_v24   ;;  %vm1957_vm12 = vcmp.eq.s32.totalorder %v4840_v49, 1 }
 0x217   : > { %2351 = vmatpush1.bf16.msra.mxu0 %v3790_v47  ;;  %2448 = vmatpush1.bf16.msra.mxu1 %v4272_v32  ;;  %v4853_v25 = vpop.permute.xlu0 %2843 }
 0x218   : > { %2506 = vmatprep.subr.bf16.mxu0 %v4129_v61  ;;  %2449 = vmatprep.subr.bf16.mxu1 %v4278_v33  ;;  %v4849_v61 = vpop.permute.xlu1 %1946  ;;  %6465 = vst [vmem:[#allocation17_spill] sm:$0xff] %v4853_v25 }
 0x219   : > { %3080 = vperm.xlu1 %3631, %v4568_v2  }
 0x21b   : > { %2450 = vmatpush2.bf16.msra.mxu1 %v4289_v35  ;;  %v4861_v29 = vpop.permute.xlu0 %1934  ;;  %v6467_v35 = vld [vmem:[#allocation4_spill] sm:$0xff] }
 0x21c   : > { %2451 = vmatprep.subr.bf16.mxu1 %v4295_v36  ;;  %v4858_v28 = vpop.permute.xlu1 %1952  ;;  %v6468_v36 = vld [vmem:[#allocation5_spill] sm:$0xff]  ;;  %vm1955_vm9 = vcmp.eq.s32.totalorder %v4861_v29, 1 }
 0x21d   : > { %3633 = vset.pattern.permute.xlu1 %v6452_v48  ;;  %6466 = vst [vmem:[#allocation18_spill] sm:$0xff] %v4858_v28 }
 0x21e   : > { %3134 = vperm.xlu1 %3633, %v4385_v59  }
 0x21f   : > { %2452 = vmatpush2.bf16.msra.mxu1 %v4306_v38  ;;  %v4870_v33 = vpop.permute.xlu0 %1943 }
 0x220   : > { %2453 = vmatprep.subr.bf16.mxu1 %v4312_v39  ;;  %v4866_v32 = vpop.permute.xlu1 %2006  ;;  %v6469_v39 = vld [vmem:[#allocation6_spill] sm:$0xff] }
 0x222   : > { %3137 = vperm.xlu1 %3633, %v4602_v26  }
 0x223   : > { %2454 = vmatpush2.bf16.msra.mxu1 %v4322_v41  ;;  %v4877_v41 = vpop.permute.xlu0 %1949 }
 0x224   : > { %2455 = vmatprep.subr.bf16.mxu1 %v4329_v42  ;;  %v4874_v38 = vpop.permute.xlu1 %2009  ;;  %v6470_v42 = vld [vmem:[#allocation7_spill] sm:$0xff] }
 0x226   : > { %3143 = vperm.xlu1 %3633, %v4391_v60  }
 0x227   : > { %2456 = vmatpush2.bf16.msra.mxu1 %v4339_v44  ;;  %v6471_v44 = vld [vmem:[#allocation8_spill] sm:$0xff] }
 0x228   : > { %2457 = vmatprep.subr.bf16.mxu1 %v4348_v50  ;;  %v4881_v50 = vpop.permute.xlu1 %2015 }
 0x22a   : > { %3149 = vperm.xlu1 %3633, %v4397_v62  }
 0x22b   : > { %2458 = vmatpush2.bf16.msra.mxu1 %v4357_v53  ;;  %v4883_v53 = vpop.permute.xlu0 %2918 }
 0x22c   : > { %2459 = vmatprep.subr.bf16.mxu1 %v4495_v52  ;;  %6472 = vst [vmem:[#allocation4_spill] sm:$0xff] %v4883_v53  ;;  %v4885_v54 = vpop.permute.xlu1 %2021 }
 0x22f   : > { %2460 = vmatpush2.bf16.msra.mxu1 %v4503_v12  ;;  %v4887_v59 = vpop.permute.xlu0 %2927 }
 0x230   : > { %2461 = vmatprep.subr.bf16.mxu1 %v6467_v35  ;;  %6473 = vst [vmem:[#allocation5_spill] sm:$0xff] %v4887_v59  ;;  %v4889_v60 = vpop.permute.xlu1 %2075 }
 0x231   : > { %vm2098_vm0 = vcmp.eq.s32.totalorder %v4889_v60, 1 }
 0x233   : > { %2462 = vmatpush2.bf16.msra.mxu1 %v6468_v36  ;;  %v4891_v62 = vpop.permute.xlu0 %2933 }
 0x234   : > { %2463 = vmatprep.subr.bf16.mxu1 %v6469_v39  ;;  %6474 = vst [vmem:[#allocation6_spill] sm:$0xff] %v4891_v62  ;;  %v4893_v52 = vpop.permute.xlu1 %2081  ;;  %v678_v62 = vld [vmem:[%s6379_s7] sm:$0x1f] }
 0x237   : > { %2464 = vmatpush2.bf16.msra.mxu1 %v6470_v42  ;;  %v4895_v12 = vpop.permute.xlu0 %2003 }
 0x238   : > { %3555 = vmatprep.subr.bf16.mxu1 %v6471_v44  ;;  %v4897_v27 = vpop.permute.xlu1 %2084  ;;  %vm2026_vm15 = vcmp.eq.s32.totalorder %v4895_v12, 1 }
 0x239   : > { %vm2101_vm4 = vcmp.eq.s32.totalorder %v4897_v27, 1 }
 0x23b   : > { %v4899_v24 = vpop.permute.xlu0 %2012 }
 0x23c   : > { %v4901_v2 = vpop.permute.xlu1 %2090  ;;  %vm2029_vm10 = vcmp.eq.s32.totalorder %v4899_v24, 1 }
 0x23f   : > { %v4903_v48 = vpop.permute.xlu0 %2018 }
 0x240   : > { %v4905_v26 = vpop.permute.xlu1 %2096 }
 0x241   : > { %6475 = vst [vmem:[#allocation7_spill] sm:$0xff] %v4905_v26 }
 0x243   : > { %v4907_v22 = vpop.permute.xlu0 %2024 }
 0x244   : > { %6476 = vst [vmem:[#allocation8_spill] sm:$0xff] %v4907_v22  ;;  %v4909_v1 = vpop.permute.xlu1 %2150 }
 0x247   : > { %v4911_v9 = vpop.permute.xlu0 %2987 }
 0x248   : > { %6477 = vst [vmem:[#allocation19_spill] sm:$0xff] %v4911_v9  ;;  %v4913_v16 = vpop.permute.xlu1 %2153 }
 0x249   : > { %vm2172_vm11 = vcmp.eq.s32.totalorder %v4913_v16, 1 }
 0x24b   : > { %v4915_v58 = vpop.permute.xlu0 %2996 }
 0x24c   : > { %6478 = vst [vmem:[#allocation20_spill] sm:$0xff] %v4915_v58  ;;  %v4917_v14 = vpop.permute.xlu1 %2159 }
 0x24f   : > { %v4919_v31 = vpop.permute.xlu0 %3002 }
 0x250   : > { %6479 = vst [vmem:[#allocation21_spill] sm:$0xff] %v4919_v31  ;;  %v4921_v3 = vpop.permute.xlu1 %2165 }
 0x253   : > { %v4923_v43 = vpop.permute.xlu0 %3008 }
 0x254   : > { %6480 = vst [vmem:[#allocation22_spill] sm:$0xff] %v4923_v43  ;;  %v4925_v34 = vpop.xlane.xlu1 %2739 }
 0x255   : > { %6481 = vst [vmem:[#allocation23_spill] sm:$0xff] %v4925_v34 }
 0x257   : > { %v4927_v37 = vpop.permute.xlu0 %2078 }
 0x258   : > { %v4929_v4 = vpop.xlane.xlu1 %2748  ;;  %vm2099_vm14 = vcmp.eq.s32.totalorder %v4927_v37, 1 }
 0x259   : > { %6482 = vst [vmem:[#allocation24_spill] sm:$0xff] %v4929_v4 }
 0x25b   : > { %v4931_v8 = vpop.permute.xlu0 %2087 }
 0x25c   : > { %v4933_v56 = vpop.xlane.xlu1 %2754 }
 0x25d   : > { %6483 = vst [vmem:[#allocation25_spill] sm:$0xff] %v4933_v56 }
 0x25f   : > { %v4935_v11 = vpop.permute.xlu0 %2093 }
 0x260   : > { %v4937_v0 = vpop.xlane.xlu1 %2760 }
 0x261   : > { %6484 = vst [vmem:[#allocation26_spill] sm:$0xff] %v4937_v0  ;;  %v6488_v0 = vld [vmem:[#allocation9_spill] sm:$0xff] }
 0x262   : > { %v6489_v21 = vsub.s32 1, %v6488_v0  ;;  %v1014_v59 = vsub.s32 2, %v6488_v0  ;;  %v1022_v57 = vsub.s32 4, %v6488_v0 }
 0x263   : > { %v4939_v10 = vpop.permute.xlu0 %3062 }
 0x264   : > { %6485 = vst [vmem:[#allocation27_spill] sm:$0xff] %v4939_v10  ;;  %v4941_v45 = vpop.permute.xlu1 %1862  ;;  %v4956_v31 = vrot.slane %v678_v62, %v6489_v21  ;;  %v1018_v21 = vsub.s32 3, %v6488_v0  ;;  %v5014_v22 = vrot.slane %v678_v62, %v1022_v57 }
 0x265   : > { %vm1883_vm6 = vcmp.eq.s32.totalorder %v4941_v45, 1 }
 0x266   : > { %6492 = vst [vmem:[#allocation31_spill] sm:$0xff] %v5014_v22 }
 0x267   : > { %v4943_v47 = vpop.permute.xlu0 %3071 }
 0x268   : > { %6486 = vst [vmem:[#allocation28_spill] sm:$0xff] %v4943_v47  ;;  %v4945_v39 = vpop.permute.xlu1 %1865  ;;  %v6490_v47 = vsub.s32 0, %v6488_v0 }
 0x269   : > { %vm1884_vm1 = vcmp.eq.s32.totalorder %v4945_v39, 1 }
 0x26a   : > { %v4960_v4 = vrot.slane %v678_v62, %v6490_v47 }
 0x26b   : > { %v4949_v43 = vpop.permute.xlu0 %3077 }
 0x26c   : > { %6487 = vst [vmem:[#allocation29_spill] sm:$0xff] %v4949_v43  ;;  %6491 = vst [vmem:[#allocation30_spill] sm:$0xff] %v4960_v4  ;;  %v4973_v10 = vpop.permute.xlu1 %1868 }
 0x26f   : > { %v2148_v9 = vpop.permute.xlu0 %2147 }
 0x270   : > { %vm2170_vm3 = vcmp.eq.s32.totalorder %v2148_v9, 1  ;;  %v5012_v26 = vpop.permute.xlu1 %1871 }
 0x299   : > { %v1479_v35 = vpop.f32.mrf.mxu0  ;;  %v1552_v36 = vpop.f32.mrf.mxu1 }
 0x29b   : > { %v1481_v42 = vpop.f32.mrf.mxu0  ;;  %v4947_v44 = vpop.f32.mrf.mxu1 }
 0x29c   : > { %v4967_v43 = vadd.f32 %v1481_v42, %v4956_v31  ;;  %v4983_v42 = vrot.slane %v678_v62, %v1014_v59 }
 0x29d   : > { %v1483_v56 = vpop.f32.mrf.mxu0  ;;  %v1556_v58 = vpop.f32.mrf.mxu1 }
 0x29e   : > { %v1484_v59 = vadd.f32 %v1483_v56, %v4960_v4  ;;  %v1557_v0 = vadd.f32 %v1556_v58, %v4983_v42 }
 0x29f   : > { %v1485_v19 = vpop.f32.mrf.mxu0  ;;  %v1558_v15 = vpop.f32.mrf.mxu1 }
 0x2a0   : > { %v4971_v34 = vadd.f32 %v1485_v19, %v4956_v31  ;;  %v1480_v19 = vadd.f32 %v1479_v35, %v4960_v4  ;;  %v4993_v35 = vrot.slane %v678_v62, %v1018_v21  ;;  %v1553_v21 = vadd.f32 %v1552_v36, %v4983_v42  ;;  %v5031_v36 = vpop.permute.xlu0 %2156 }
 0x2a1   : > { %v1489_v47 = vpop.f32.mrf.mxu0  ;;  %v1562_v53 = vpop.f32.mrf.mxu1  ;;  %v5041_v17 = vsel %vm1779_vm5, %v1484_v59, 0.0  ;;  %v5050_v9 = vsel %vm1955_vm9, %v1484_v59, 0.0  ;;  %vm2102_vm5 = vcmp.eq.s32.totalorder %v4931_v8, 1  ;;  %v5067_v29 = vsel %vm1883_vm6, %v1484_v59, 0.0 }
 0x2a2   : > { %v5006_v56 = vsel %vm1778_vm2, %v1480_v19, 0.0  ;;  %v5018_v28 = vsel %vm1954_vm8, %v1480_v19, 0.0  ;;  %v5022_v13 = vsel %vm2026_vm15, %v1480_v19, 0.0  ;;  %v5026_v40 = vsel %vm2098_vm0, %v1480_v19, 0.0  ;;  %6496 = vst [vmem:[#allocation34_spill] sm:$0xff] %v5067_v29 }
 0x2a3   : > { %v1491_v30 = vpop.f32.mrf.mxu0  ;;  %v1564_v25 = vpop.f32.mrf.mxu1  ;;  %v5029_v58 = vsel %vm2170_vm3, %v1480_v19, 0.0  ;;  %vm2030_vm2 = vcmp.eq.s32.totalorder %v4881_v50, 1  ;;  %vm2031_vm8 = vcmp.eq.s32.totalorder %v4903_v48, 1  ;;  %v1555_v57 = vadd.f32 %v4947_v44, %v4993_v35 }
 0x2a4   : > { %6493 = vst [vmem:[#allocation32_spill] sm:$0xff] %v5029_v58  ;;  %v1559_v60 = vadd.f32 %v1558_v15, %v4993_v35  ;;  %v5046_v12 = vsel %vm1882_vm7, %v1480_v19, 0.0  ;;  %vm6495_vm15 = vcmp.eq.s32.totalorder %v4866_v32, 1  ;;  %v1490_v44 = vadd.f32 %v1489_v47, %v4960_v4  ;;  %v5080_v45 = vpop.permute.xlu0 %2162 }
 0x2a5   : > { %v1493_v55 = vpop.f32.mrf.mxu0  ;;  %6494 = vst [vmem:[#allocation33_spill] sm:$0xff] %v5046_v12  ;;  %v5054_v22 = vsel %vm6495_vm15, %v1484_v59, 0.0  ;;  %v1566_v7 = vpop.f32.mrf.mxu1  ;;  %v5063_v15 = vsel %vm2099_vm14, %v1484_v59, 0.0  ;;  %v1677_v23 = vmax.f32 %v1553_v21, %v1557_v0  ;;  %v1563_v32 = vadd.f32 %v1562_v53, %v4983_v42 }
 0x2a6   : > { %vm2173_vm7 = vcmp.eq.s32.totalorder %v5031_v36, 1  ;;  %vm1885_vm9 = vcmp.eq.s32.totalorder %v4973_v10, 1  ;;  %v1492_v19 = vadd.f32 %v1491_v30, %v4956_v31  ;;  %v1565_v37 = vadd.f32 %v1564_v25, %v4993_v35  ;;  %v5090_v25 = vpop.permute.xlu1 %1874 }
 0x2a7   : > { %v5010_v51 = vpop.f32.mrf.mxu0  ;;  %vm6497_vm14 = vcmp.lt.f32.partialorder %v4747_v20, 0.9  ;;  %vm6498_vm6 = vcmp.eq.s32.totalorder %v4909_v1, 1  ;;  %v1690_v21 = vmax.f32 %v1555_v57, %v1559_v60  ;;  %vm6499_vm15 = vcmp.lt.f32.partialorder %v4741_v18, 0.9 }
 0x2a8   : > { %v5084_v53 = vsel %vm6498_vm6, %v1484_v59, 0.0  ;;  %v5094_v20 = vsel %vm6499_vm15, %v1490_v44, 0.0  ;;  %vm6501_vm6 = vcmp.eq.s32.totalorder %v4874_v38, 1  ;;  %vm6502_vm0 = vcmp.eq.s32.totalorder %v4893_v52, 1 }
 0x2a9   : > { %v1499_v62 = vpop.f32.mrf.mxu0  ;;  %v5106_v59 = vsel %vm6502_vm0, %v1490_v44, 0.0  ;;  %vm2174_vm3 = vcmp.eq.s32.totalorder %v4917_v14, 1  ;;  %v5109_v57 = vmax.f32 %v1677_v23, %v1563_v32  ;;  %v5113_v18 = vsel %vm1884_vm1, %v1490_v44, 0.0 }
 0x2aa   : > { %v5058_v58 = vadd.f32 %v1499_v62, %v4960_v4  ;;  %v1494_v62 = vadd.f32 %v1493_v55, %v4960_v4  ;;  %v5102_v55 = vsel %vm6501_vm6, %v1490_v44, 0.0  ;;  %vm6503_vm15 = vcmp.eq.s32.totalorder %v4870_v33, 1 }
 0x2ab   : > { %v5072_v47 = vpop.f32.mrf.mxu0  ;;  %v6505_v52 = vmax.f32 %v4967_v43, %v4971_v34  ;;  %v5128_v23 = vmax.f32 %v1690_v21, %v1565_v37  ;;  %vm2175_vm1 = vcmp.eq.s32.totalorder %v5080_v45, 1  ;;  %vm1784_vm0 = vcmp.lt.f32.partialorder %v4765_v63, 0.9 }
 0x2ac   : > { %v1806_v0 = vsel %vm6497_vm14, %v5058_v58, 0.0  ;;  %vm6500_vm14 = vcmp.eq.s32.totalorder %v4828_v46, 1  ;;  %v5116_v46 = vadd.f32 %v1566_v7, %v4983_v42  ;;  %v1966_v38 = vsel %vm6503_vm15, %v5058_v58, 0.0 }
 0x2ad   : > { %v1810_v29 = vmax.f32 %v5006_v56, %v1806_v0  ;;  %v1823_v12 = vmin.f32 %v5006_v56, %v1806_v0  ;;  %v1503_v30 = vpop.f32.mrf.mxu0  ;;  %v5098_v1 = vsel %vm6500_vm14, %v1490_v44, 0.0  ;;  %v1568_v56 = vpop.f32.mrf.mxu1  ;;  %v5126_v0 = vmax.f32 %v6505_v52, %v1492_v19  ;;  %6506 = vst [vmem:[#allocation36_spill] sm:$0xff] %v5128_v23 }
 0x2ae   : > { %v5131_v39 = vadd.f32 %v1503_v30, %v4960_v4  ;;  %v5136_v7 = vsel %vm2172_vm11, %v1490_v44, 0.0  ;;  %vm1960_vm14 = vcmp.eq.s32.totalorder %v4877_v41, 1  ;;  %v5142_v33 = vsel %vm1781_vm13, %v1494_v62, 0.0  ;;  %v5170_v30 = vpop.permute.xlu1 %1877 }
 0x2af   : > { %v5121_v60 = vpop.f32.mrf.mxu0  ;;  %v5146_v43 = vsel %vm1957_vm12, %v1494_v62, 0.0  ;;  %v5150_v34 = vadd.f32 %v5010_v51, %v4956_v31  ;;  %v5153_v16 = vadd.f32 %v1568_v56, %v4993_v35  ;;  %vm2032_vm11 = vcmp.eq.s32.totalorder %v4885_v54, 1 }
 0x2b0   : > { %6504 = vst [vmem:[#allocation35_spill] sm:$0xff] %v5121_v60  ;;  %v1970_v32 = vmax.f32 %v5018_v28, %v1966_v38  ;;  %v1983_v5 = vmin.f32 %v5018_v28, %v1966_v38  ;;  %vm6508_vm13 = vcmp.lt.f32.partialorder %v4779_v6, 0.9  ;;  %vm6509_vm12 = vcmp.eq.s32.totalorder %v4849_v61, 1  ;;  %v1572_v38 = vpop.f32.mrf.mxu1 }
 0x2b1   : > { %6507 = vst [vmem:[#allocation37_spill] sm:$0xff] %v5153_v16  ;;  %v1509_v44 = vpop.f32.mrf.mxu0  ;;  %v1807_v49 = vsel %vm6508_vm13, %v5131_v39, 0.0  ;;  %v1967_v19 = vsel %vm6509_vm12, %v5131_v39, 0.0  ;;  %vm1887_vm6 = vcmp.eq.s32.totalorder %v5090_v25, 1  ;;  %vm2104_vm15 = vcmp.eq.s32.totalorder %v4935_v11, 1 }
 0x2b2   : > { %v1811_v51 = vmax.f32 %v5041_v17, %v1807_v49  ;;  %v1824_v37 = vmin.f32 %v5041_v17, %v1807_v49  ;;  %v1971_v21 = vmax.f32 %v5050_v9, %v1967_v19  ;;  %v1984_v28 = vmin.f32 %v5050_v9, %v1967_v19  ;;  %v1574_v36 = vpop.f32.mrf.mxu1 }
 0x2b3   : > { %v5172_v6 = vpop.f32.mrf.mxu0  ;;  %v5176_v61 = vsel %vm2029_vm10, %v1494_v62, 0.0  ;;  %v5180_v56 = vsel %vm2101_vm4, %v1494_v62, 0.0  ;;  %v2038_v17 = vsel %vm2030_vm2, %v5058_v58, 0.0  ;;  %v2039_v9 = vsel %vm2031_vm8, %v5131_v39, 0.0 }
 0x2b4   : > { %6510 = vst [vmem:[#allocation38_spill] sm:$0xff] %v5172_v6  ;;  %v5188_v52 = vmax.f32 %v1810_v29, %v1811_v51  ;;  %v5190_v49 = vmin.f32 %v1823_v12, %v1824_v37  ;;  %v5192_v24 = vmax.f32 %v1970_v32, %v1971_v21  ;;  %v5194_v19 = vmin.f32 %v1983_v5, %v1984_v28  ;;  %v6511_v29 = vld [vmem:[#allocation13_spill] sm:$0xff]  ;;  %v6512_v32 = vld [vmem:[#allocation18_spill] sm:$0xff]  ;;  %v6513_v5 = vld [vmem:[#allocation8_spill] sm:$0xff]  ;;  %v5283_v41 = vpop.f32.mrf.mxu1 }
 0x2b5   : > { %v1513_v27 = vpop.f32.mrf.mxu0  ;;  %vm2176_vm10 = vcmp.eq.s32.totalorder %v4921_v3, 1  ;;  %v5201_v6 = vsel %vm2173_vm7, %v1494_v62, 0.0  ;;  %v5205_v48 = vsel %vm1885_vm9, %v1494_v62, 0.0  ;;  %v2110_v12 = vsel %vm2102_vm5, %v5058_v58, 0.0  ;;  %v6514_v51 = vld [vmem:[#allocation7_spill] sm:$0xff] }
 0x2b6   : > { %vm1888_vm4 = vcmp.eq.s32.totalorder %v5170_v30, 1  ;;  %vm1785_vm2 = vcmp.lt.f32.partialorder %v6511_v29, 0.9  ;;  %vm1961_vm8 = vcmp.eq.s32.totalorder %v6512_v32, 1  ;;  %vm2033_vm13 = vcmp.eq.s32.totalorder %v6513_v5, 1 }
 0x2b7   : > { %vm2105_vm12 = vcmp.eq.s32.totalorder %v6514_v51, 1  ;;  %v5220_v62 = vadd.f32 %v1572_v38, %v4983_v42  ;;  %vm6515_vm5 = vcmp.eq.s32.totalorder %v4901_v2, 1  ;;  %v5225_v37 = vpop.f32.mrf.mxu0  ;;  %v2042_v21 = vmax.f32 %v5022_v13, %v2038_v17 }
 0x2b8   : > { %v2111_v8 = vsel %vm6515_vm5, %v5131_v39, 0.0  ;;  %6516 = vst [vmem:[#allocation13_spill] sm:$0xff] %v5225_v37  ;;  %vm6517_vm7 = vcmp.eq.s32.totalorder %v5012_v26, 1  ;;  %v2043_v50 = vmax.f32 %v5054_v22, %v2039_v9  ;;  %v2056_v10 = vmin.f32 %v5054_v22, %v2039_v9 }
 0x2b9   : > { %v5231_v28 = vsel %vm6517_vm7, %v5058_v58, 0.0  ;;  %v2055_v38 = vmin.f32 %v5022_v13, %v2038_v17  ;;  %v2114_v16 = vmax.f32 %v5026_v40, %v2110_v12  ;;  %v2127_v2 = vmin.f32 %v5026_v40, %v2110_v12  ;;  %v5242_v23 = vpop.f32.mrf.mxu0  ;;  %v6519_v17 = vld [vmem:[#allocation33_spill] sm:$0xff] }
 0x2ba   : > { %v5240_v37 = vadd.f32 %v5072_v47, %v4956_v31  ;;  %6518 = vst [vmem:[#allocation18_spill] sm:$0xff] %v5242_v23  ;;  %v2115_v26 = vmax.f32 %v5063_v15, %v2111_v8  ;;  %v2128_v60 = vmin.f32 %v5063_v15, %v2111_v8  ;;  %v5249_v22 = vsel %vm2174_vm3, %v5058_v58, 0.0  ;;  %v6522_v47 = vld [vmem:[#allocation32_spill] sm:$0xff] }
 0x2bb   : > { %v1510_v13 = vadd.f32 %v1509_v44, %v4960_v4  ;;  %v5257_v9 = vadd.f32 %v1574_v36, %v4993_v35  ;;  %v5262_v15 = vsel %vm2175_vm1, %v5131_v39, 0.0  ;;  %v5264_v12 = vpop.f32.mrf.mxu0  ;;  %v2046_v14 = vmax.f32 %v2042_v21, %v2043_v50 }
 0x2bc   : > { %6521 = vst [vmem:[#allocation7_spill] sm:$0xff] %v5264_v12  ;;  %v2059_v58 = vmin.f32 %v2055_v38, %v2056_v10  ;;  %v5277_v45 = vsel %vm1887_vm6, %v5131_v39, 0.0  ;;  %v2118_v63 = vmax.f32 %v2114_v16, %v2115_v26  ;;  %v2131_v21 = vmin.f32 %v2127_v2, %v2128_v60 }
 0x2bd   : > { %6520 = vst [vmem:[#allocation8_spill] sm:$0xff] %v5257_v9  ;;  %v1808_v44 = vsel %vm1784_vm0, %v1510_v13, 0.0  ;;  %v1968_v8 = vsel %vm1960_vm14, %v1510_v13, 0.0  ;;  %v2040_v50 = vsel %vm2032_vm11, %v1510_v13, 0.0  ;;  %v5281_v10 = vpop.f32.mrf.mxu0  ;;  %v2112_v36 = vsel %vm2104_vm15, %v1510_v13, 0.0 }
 0x2be   : > { %6523 = vst [vmem:[#allocation33_spill] sm:$0xff] %v5281_v10  ;;  %v1812_v39 = vmax.f32 %v5094_v20, %v1808_v44  ;;  %v1825_v54 = vmin.f32 %v5094_v20, %v1808_v44  ;;  %v1972_v40 = vmax.f32 %v5098_v1, %v1968_v8  ;;  %v1985_v60 = vmin.f32 %v5098_v1, %v1968_v8  ;;  %v5314_v8 = vpop.f32.mrf.mxu1 }
 0x2bf   : > { %v5294_v10 = vpop.f32.mrf.mxu0  ;;  %v2044_v16 = vmax.f32 %v5102_v55, %v2040_v50  ;;  %v2057_v2 = vmin.f32 %v5102_v55, %v2040_v50  ;;  %v5300_v11 = vadd.f32 %v1513_v27, %v4960_v4  ;;  %v2116_v26 = vmax.f32 %v5106_v59, %v2112_v36 }
 0x2c0   : > { %6524 = vst [vmem:[#allocation32_spill] sm:$0xff] %v5294_v10  ;;  %v2129_v25 = vmin.f32 %v5106_v59, %v2112_v36  ;;  %v5306_v20 = vsel %vm1888_vm4, %v1510_v13, 0.0  ;;  %v5310_v44 = vsel %vm2176_vm10, %v1510_v13, 0.0  ;;  %v5338_v23 = vpop.f32.mrf.mxu1 }
 0x2c1   : > { %v5312_v1 = vpop.f32.mrf.mxu0  ;;  %v1809_v55 = vsel %vm1785_vm2, %v5300_v11, 0.0  ;;  %v1969_v59 = vsel %vm1961_vm8, %v5300_v11, 0.0  ;;  %v2041_v30 = vsel %vm2033_vm13, %v5300_v11, 0.0  ;;  %v2113_v3 = vsel %vm2105_vm12, %v5300_v11, 0.0 }
 0x2c2   : > { %6525 = vst [vmem:[#allocation39_spill] sm:$0xff] %v5312_v1  ;;  %v1813_v27 = vmax.f32 %v5142_v33, %v1809_v55  ;;  %v1826_v13 = vmin.f32 %v5142_v33, %v1809_v55  ;;  %v1973_v36 = vmax.f32 %v5146_v43, %v1969_v59  ;;  %v1986_v29 = vmin.f32 %v5146_v43, %v1969_v59 }
 0x2c3   : > { %v2045_v50 = vmax.f32 %v5176_v61, %v2041_v30  ;;  %v2058_v32 = vmin.f32 %v5176_v61, %v2041_v30  ;;  %v2117_v38 = vmax.f32 %v5180_v56, %v2113_v3  ;;  %v2130_v5 = vmin.f32 %v5180_v56, %v2113_v3  ;;  %v5336_v12 = vpop.f32.mrf.mxu0 }
 0x2c4   : > { %v1815_v4 = vmax.f32 %v1812_v39, %v1813_v27  ;;  %v1828_v1 = vmin.f32 %v1825_v54, %v1826_v13  ;;  %v1975_v51 = vmax.f32 %v1972_v40, %v1973_v36  ;;  %v1988_v10 = vmin.f32 %v1985_v60, %v1986_v29  ;;  %6526 = vst [vmem:[#allocation40_spill] sm:$0xff] %v5336_v12 }
 0x2c5   : > { %v2047_v33 = vmax.f32 %v2044_v16, %v2045_v50  ;;  %v2060_v55 = vmin.f32 %v2057_v2, %v2058_v32  ;;  %v2119_v9 = vmax.f32 %v2116_v26, %v2117_v38  ;;  %v2132_v43 = vmin.f32 %v2129_v25, %v2130_v5  ;;  %v5344_v16 = vpop.permute.xlu0 %2168  ;;  %v5346_v38 = vpop.f32.mrf.mxu0 }
 0x2c6   : > { %v1816_v59 = vmax.f32 %v5188_v52, %v1815_v4  ;;  %v1829_v61 = vmin.f32 %v5190_v49, %v1828_v1  ;;  %v1976_v30 = vmax.f32 %v5192_v24, %v1975_v51  ;;  %v1989_v56 = vmin.f32 %v5194_v19, %v1988_v10  ;;  %6527 = vst [vmem:[#allocation41_spill] sm:$0xff] %v5346_v38  ;;  %v5348_v25 = vpop.f32.mrf.mxu1  ;;  %v5350_v2 = vpop.permute.xlu1 %1880 }
 0x2c7   : > { %v2048_v39 = vmax.f32 %v2046_v14, %v2047_v33  ;;  %v2061_v54 = vmin.f32 %v2059_v58, %v2060_v55  ;;  %v2120_v40 = vmax.f32 %v2118_v63, %v2119_v9  ;;  %v2133_v60 = vmin.f32 %v2131_v21, %v2132_v43  ;;  %6528 = vst [vmem:[#allocation42_spill] sm:$0xff] %v5348_v25  ;;  %v5354_v5 = vpop.f32.mrf.mxu0 }
 0x2c8   : > { %v1817_v3 = vrot.slane %v1816_v59, 4  ;;  %v1830_v27 = vrot.slane %v1829_v61, 4  ;;  %v1977_v13 = vrot.slane %v1976_v30, 4  ;;  %v1990_v36 = vrot.slane %v1989_v56, 4  ;;  %6529 = vst [vmem:[#allocation43_spill] sm:$0xff] %v5354_v5 }
 0x2c9   : > { %v2049_v4 = vrot.slane %v2048_v39, 4  ;;  %v2062_v52 = vrot.slane %v2061_v54, 4  ;;  %v2121_v49 = vrot.slane %v2120_v40, 4  ;;  %v2134_v24 = vrot.slane %v2133_v60, 4 }
 0x2ca   : > { %v1818_v19 = vmax.f32 %v1816_v59, %v1817_v3  ;;  %v1831_v14 = vmin.f32 %v1829_v61, %v1830_v27  ;;  %v1978_v9 = vmax.f32 %v1976_v30, %v1977_v13  ;;  %v1991_v58 = vmin.f32 %v1989_v56, %v1990_v36  ;;  %v5356_v59 = vpop.f32.mrf.mxu1 }
 0x2cb   : > { %v2050_v10 = vmax.f32 %v2048_v39, %v2049_v4  ;;  %v2063_v63 = vmin.f32 %v2061_v54, %v2062_v52  ;;  %v2122_v21 = vmax.f32 %v2120_v40, %v2121_v49  ;;  %v2135_v26 = vmin.f32 %v2133_v60, %v2134_v24  ;;  %6530 = vst [vmem:[#allocation44_spill] sm:$0xff] %v5356_v59  ;;  %v1836_v54 = vld [vmem:[%s6380_s8] sm:$0x1]  ;;  %v1839_v40 = vld [vmem:[%s6380_s8 + $0xc] sm:$0x1]  ;;  %v6533_v59 = vld [vmem:[#allocation34_spill] sm:$0xff] }
 0x2cc   : > { %vm2177_vm9 = vcmp.eq.s32.totalorder %v5344_v16, 1  ;;  %v1819_v1 = vrot.slane %v1818_v19, 2  ;;  %v1832_v29 = vrot.slane %v1831_v14, 2  ;;  %v1979_v50 = vrot.slane %v1978_v9, 2  ;;  %v1996_v60 = vld [vmem:[%s6380_s8 + $0x4] sm:$0x1] }
 0x2cd   : > { %v1992_v32 = vrot.slane %v1991_v58, 2  ;;  %vm1889_vm3 = vcmp.eq.s32.totalorder %v5350_v2, 1  ;;  %v2051_v51 = vrot.slane %v2050_v10, 2  ;;  %v2064_v33 = vrot.slane %v2063_v63, 2 }
 0x2ce   : > { %v2123_v55 = vrot.slane %v2122_v21, 2  ;;  %v2136_v43 = vrot.slane %v2135_v26, 2  ;;  %v1820_v61 = vmax.f32 %v1818_v19, %v1819_v1  ;;  %v1833_v30 = vmin.f32 %v1831_v14, %v1832_v29  ;;  %v1999_v19 = vld [vmem:[%s6380_s8 + $0x10] sm:$0x1]  ;;  %v5370_v14 = vpop.f32.mrf.mxu0  ;;  %v2068_v1 = vld [vmem:[%s6380_s8 + $0x6] sm:$0x1] }
 0x2cf   : > { %v1980_v56 = vmax.f32 %v1978_v9, %v1979_v50  ;;  %v1993_v39 = vmin.f32 %v1991_v58, %v1992_v32  ;;  %v2052_v3 = vmax.f32 %v2050_v10, %v2051_v51  ;;  %v2065_v27 = vmin.f32 %v2063_v63, %v2064_v33  ;;  %6531 = vst [vmem:[#allocation45_spill] sm:$0xff] %v5370_v14  ;;  %v2071_v51 = vld [vmem:[%s6380_s8 + $0x12] sm:$0x1]  ;;  %v2140_v33 = vld [vmem:[%s6380_s8 + $0x8] sm:$0x1] }
 0x2d0   : > { %v2124_v13 = vmax.f32 %v2122_v21, %v2123_v55  ;;  %v2137_v36 = vmin.f32 %v2135_v26, %v2136_v43  ;;  %v1821_v4 = vrot.slane %v1820_v61, 1  ;;  %v1834_v52 = vrot.slane %v1833_v30, 1  ;;  %v5375_v21 = vpop.f32.mrf.mxu1  ;;  %v2143_v55 = vld [vmem:[%s6380_s8 + $0x14] sm:$0x1] }
 0x2d1   : > { %v1981_v49 = vrot.slane %v1980_v56, 1  ;;  %v1994_v24 = vrot.slane %v1993_v39, 1  ;;  %v2053_v9 = vrot.slane %v2052_v3, 1  ;;  %v2066_v58 = vrot.slane %v2065_v27, 1  ;;  %6532 = vst [vmem:[#allocation46_spill] sm:$0xff] %v5375_v21 }
 0x2d2   : > { %v2125_v10 = vrot.slane %v2124_v13, 1  ;;  %v2138_v63 = vrot.slane %v2137_v36, 1  ;;  %v1822_v26 = vmax.f32 %v1820_v61, %v1821_v4  ;;  %v1835_v29 = vmin.f32 %v1833_v30, %v1834_v52  ;;  %v5386_v4 = vpop.f32.mrf.mxu0  ;;  %v5388_v21 = vpop.f32.mrf.mxu1 }
 0x2d3   : > { %v1982_v50 = vmax.f32 %v1980_v56, %v1981_v49  ;;  %v1995_v32 = vmin.f32 %v1993_v39, %v1994_v24  ;;  %v2054_v43 = vmax.f32 %v2052_v3, %v2053_v9  ;;  %v2067_v14 = vmin.f32 %v2065_v27, %v2066_v58 }
 0x2d4   : > { %v2126_v5 = vmax.f32 %v2124_v13, %v2125_v10  ;;  %v2139_v38 = vmin.f32 %v2137_v36, %v2138_v63  ;;  %v1837_v61 = vmax.f32 %v1836_v54, %v1822_v26  ;;  %v1840_v30 = vmin.f32 %v1839_v40, %v1835_v29  ;;  %v5436_v13 = vpop.f32.mrf.mxu0 }
 0x2d5   : > { %v1997_v56 = vmax.f32 %v1996_v60, %v1982_v50  ;;  %v2000_v39 = vmin.f32 %v1999_v19, %v1995_v32  ;;  %v2069_v52 = vmax.f32 %v2068_v1, %v2054_v43  ;;  %v2072_v49 = vmin.f32 %v2071_v51, %v2067_v14  ;;  %v2293_v19 = vpop.f32.mrf.mxu1  ;;  %v6547_v43 = vld [vmem:[#allocation38_spill] sm:$0xff] }
 0x2d6   : > { %v2141_v24 = vmax.f32 %v2140_v33, %v2126_v5  ;;  %v2144_v12 = vmin.f32 %v2143_v55, %v2139_v38  ;;  %v1899_v25 = vmax.f32 %v6533_v59, %v5277_v45  ;;  %v1912_v3 = vmin.f32 %v6533_v59, %v5277_v45  ;;  %1838 = vst [vmem:[%s6380_s8] sm:$0x1] %v1837_v61  ;;  %v5468_v32 = vpop.f32.mrf.mxu0  ;;  %v6543_v33 = vld [vmem:[#allocation8_spill] sm:$0xff] }
 0x2d7   : > { %1841 = vst [vmem:[%s6380_s8 + $0xc] sm:$0x1] %v1840_v30  ;;  %1998 = vst [vmem:[%s6380_s8 + $0x4] sm:$0x1] %v1997_v56  ;;  %v2185_v45 = vsel %vm2177_vm9, %v5300_v11, 0.0  ;;  %v2188_v38 = vmax.f32 %v5136_v7, %v5310_v44  ;;  %v2201_v5 = vmin.f32 %v5136_v7, %v5310_v44  ;;  %v1897_v54 = vsel %vm1889_vm3, %v5300_v11, 0.0  ;;  %v3550_v51 = vpop.f32.mrf.mxu1 }
 0x2d8   : > { %2001 = vst [vmem:[%s6380_s8 + $0x10] sm:$0x1] %v2000_v39  ;;  %2070 = vst [vmem:[%s6380_s8 + $0x6] sm:$0x1] %v2069_v52  ;;  %v2189_v16 = vmax.f32 %v5201_v6, %v2185_v45  ;;  %v2202_v59 = vmin.f32 %v5201_v6, %v2185_v45  ;;  %v1900_v40 = vmax.f32 %v5113_v18, %v5306_v20  ;;  %v6544_v55 = vld [vmem:[#allocation36_spill] sm:$0xff]  ;;  %v6548_v52 = vld [vmem:[#allocation42_spill] sm:$0xff] }
 0x2d9   : > { %2073 = vst [vmem:[%s6380_s8 + $0x12] sm:$0x1] %v2072_v49  ;;  %2142 = vst [vmem:[%s6380_s8 + $0x8] sm:$0x1] %v2141_v24  ;;  %v1913_v60 = vmin.f32 %v5113_v18, %v5306_v20  ;;  %v1901_v27 = vmax.f32 %v5205_v48, %v1897_v54  ;;  %v6534_v7 = vmax.f32 %v5084_v53, %v5262_v15 }
 0x2da   : > { %2145 = vst [vmem:[%s6380_s8 + $0x14] sm:$0x1] %v2144_v12  ;;  %v1914_v12 = vmin.f32 %v5205_v48, %v1897_v54  ;;  %v6535_v6 = vmax.f32 %v6522_v47, %v5249_v22  ;;  %v6536_v11 = vmin.f32 %v5084_v53, %v5262_v15  ;;  %v6537_v2 = vmin.f32 %v6522_v47, %v5249_v22 }
 0x2db   : > { %v2191_v20 = vmax.f32 %v2188_v38, %v2189_v16  ;;  %v2204_v36 = vmin.f32 %v2201_v5, %v2202_v59  ;;  %v6538_v48 = vmax.f32 %v6519_v17, %v5231_v28  ;;  %v6539_v9 = vmin.f32 %v6519_v17, %v5231_v28  ;;  %v6542_v28 = vld [vmem:[#allocation35_spill] sm:$0xff]  ;;  %v5484_v5 = vpop.f32.mrf.mxu0 }
 0x2dc   : > { %v2190_v44 = vmax.f32 %v6535_v6, %v6534_v7  ;;  %v2203_v18 = vmin.f32 %v6537_v2, %v6536_v11  ;;  %v1903_v1 = vmax.f32 %v1900_v40, %v1901_v27  ;;  %v1916_v10 = vmin.f32 %v1913_v60, %v1914_v12  ;;  %v2296_v27 = vpop.f32.mrf.mxu1 }
 0x2dd   : > { %v1902_v14 = vmax.f32 %v6538_v48, %v1899_v25  ;;  %v1915_v58 = vmin.f32 %v6539_v9, %v1912_v3  ;;  %v6540_v53 = vmax.f32 %v5109_v57, %v5116_v46  ;;  %v1577_v22 = vadd.f32 %v5283_v41, %v4983_v42  ;;  %v6549_v3 = vld [vmem:[#allocation44_spill] sm:$0xff] }
 0x2de   : > { %v2192_v47 = vmax.f32 %v2190_v44, %v2191_v20  ;;  %v2205_v63 = vmin.f32 %v2203_v18, %v2204_v36  ;;  %v6541_v25 = vmax.f32 %v5126_v0, %v5150_v34  ;;  %v1506_v17 = vadd.f32 %v6542_v28, %v4956_v31  ;;  %v6545_v0 = vld [vmem:[#allocation37_spill] sm:$0xff]  ;;  %v6551_v36 = vld [vmem:[#allocation46_spill] sm:$0xff] }
 0x2df   : > { %v1680_v15 = vmax.f32 %v6540_v53, %v5220_v62  ;;  %v1904_v29 = vmax.f32 %v1902_v14, %v1903_v1  ;;  %v1917_v50 = vmin.f32 %v1915_v58, %v1916_v10  ;;  %v1579_v57 = vadd.f32 %v5314_v8, %v4993_v35  ;;  %v6550_v44 = vld [vmem:[#allocation13_spill] sm:$0xff]  ;;  %v5490_v14 = vpop.f32.mrf.mxu1  ;;  %v5497_v10 = vld [vmem:[%s6375_s3] ss:$0 sm:$0xff] }
 0x2e0   : > { %v1667_v26 = vmax.f32 %v6541_v25, %v5240_v37  ;;  %v1583_v46 = vadd.f32 %v5338_v23, %v4983_v42  ;;  %v2193_v62 = vrot.slane %v2192_v47, 4  ;;  %v2206_v41 = vrot.slane %v2205_v63, 4  ;;  %v6553_v25 = vld [vmem:[#allocation7_spill] sm:$0xff]  ;;  %v6554_v28 = vld [vmem:[#allocation33_spill] sm:$0xff] }
 0x2e1   : > { %v6546_v34 = vmax.f32 %v6544_v55, %v6545_v0  ;;  %v1512_v61 = vadd.f32 %v6547_v43, %v4956_v31  ;;  %v1905_v30 = vrot.slane %v1904_v29, 4  ;;  %v1918_v56 = vrot.slane %v1917_v50, 4  ;;  %v1924_v0 = vld [vmem:[%s6380_s8 + $0x2] sm:$0x1]  ;;  %v6556_v43 = vld [vmem:[#allocation31_spill] sm:$0xff] }
 0x2e2   : > { %v1681_v39 = vmax.f32 %v1680_v15, %v1577_v22  ;;  %v1585_v8 = vadd.f32 %v6548_v52, %v4993_v35  ;;  %v2194_v49 = vmax.f32 %v2192_v47, %v2193_v62  ;;  %v2207_v24 = vmin.f32 %v2205_v63, %v2206_v41  ;;  %v3485_v15 = vpop.f32.mrf.mxu0  ;;  %v6552_v63 = vld [vmem:[#allocation18_spill] sm:$0xff] }
 0x2e3   : > { %v1693_v37 = vmax.f32 %v6546_v34, %v6543_v33  ;;  %v1668_v23 = vmax.f32 %v1667_v26, %v1506_v17  ;;  %v1587_v45 = vadd.f32 %v6549_v3, %v4983_v42  ;;  %v1906_v38 = vmax.f32 %v1904_v29, %v1905_v30  ;;  %v6555_v17 = vld [vmem:[#allocation32_spill] sm:$0xff]  ;;  %v1927_v34 = vld [vmem:[%s6380_s8 + $0xe] sm:$0x1]  ;;  %v2309_v30 = vpop.f32.mrf.mxu1 }
 0x2e4   : > { %v1919_v16 = vmin.f32 %v1917_v50, %v1918_v56  ;;  %v1682_v54 = vmax.f32 %v1681_v39, %v1583_v46  ;;  %v2195_v40 = vrot.slane %v2194_v49, 2  ;;  %v2208_v60 = vrot.slane %v2207_v24, 2  ;;  %v2212_v50 = vld [vmem:[%s6380_s8 + $0xa] sm:$0x1] }
 0x2e5   : > { %v1694_v59 = vmax.f32 %v1693_v37, %v1579_v57  ;;  %v1669_v12 = vmax.f32 %v1668_v23, %v1512_v61  ;;  %v1907_v7 = vrot.slane %v1906_v38, 2  ;;  %v1516_v11 = vadd.f32 %v6550_v44, %v4956_v31  ;;  %v2215_v57 = vld [vmem:[%s6380_s8 + $0x16] sm:$0x1]  ;;  %v6560_v44 = vld [vmem:[#allocation43_spill] sm:$0xff] }
 0x2e6   : > { %v1920_v6 = vrot.slane %v1919_v16, 2  ;;  %v2196_v18 = vmax.f32 %v2194_v49, %v2195_v40  ;;  %v2209_v20 = vmin.f32 %v2207_v24, %v2208_v60  ;;  %v1589_v48 = vadd.f32 %v6551_v36, %v4993_v35  ;;  %v3487_v49 = vpop.f32.mrf.mxu0 }
 0x2e7   : > { %v1695_v2 = vmax.f32 %v1694_v59, %v1585_v8  ;;  %v5492_v9 = vmax.f32 %v1682_v54, %v1587_v45  ;;  %v1908_v58 = vmax.f32 %v1906_v38, %v1907_v7  ;;  %v2294_v53 = vadd.f32 %v5497_v10, %v2293_v19  ;;  %v6557_v45 = vld [vmem:[#allocation39_spill] sm:$0xff]  ;;  %v6558_v38 = vld [vmem:[#allocation40_spill] sm:$0xff] }
 0x2e8   : > { %v1921_v1 = vmin.f32 %v1919_v16, %v1920_v6  ;;  %v2197_v22 = vrot.slane %v2196_v18, 1  ;;  %v2210_v47 = vrot.slane %v2209_v20, 1  ;;  %v3468_v26 = vadd.f32 %v6553_v25, %v6552_v63  ;;  %v6559_v6 = vld [vmem:[#allocation41_spill] sm:$0xff] }
 0x2e9   : > { %v3471_v29 = vadd.f32 %v6555_v17, %v6554_v28  ;;  %v1909_v46 = vrot.slane %v1908_v58, 1  ;;  %v1670_v19 = vmax.f32 %v1669_v12, %v1516_v11  ;;  %v2297_v41 = vadd.f32 %v5497_v10, %v2296_v27 }
 0x2ea   : > { %v1922_v62 = vrot.slane %v1921_v1, 1  ;;  %v2198_v33 = vmax.f32 %v2196_v18, %v2197_v22  ;;  %v2211_v55 = vmin.f32 %v2209_v20, %v2210_v47  ;;  %v1696_v37 = vmax.f32 %v1695_v2, %v1589_v48  ;;  %v3554_v2 = vpop.f32.mrf.mxu1  ;;  %v6561_v18 = vld [vmem:[#allocation45_spill] sm:$0xff]  ;;  %v3488_v48 = vpop.f32.mrf.mxu0  ;;  %v3792_v47 = vld [vmem:[%s6378_s6 + $0x120] ss:$20 sps:$4 sm:$0xff]  }
 0x2eb   : > { %v1629_v61 = vadd.f32 %v3471_v29, %v6556_v43  ;;  %v1910_v56 = vmax.f32 %v1908_v58, %v1909_v46  ;;  %v2324_v52 = vmax.f32 %v2294_v53, 0.0  ;;  %v2325_v8 = vmax.f32 %v2297_v41, 0.0 }
 0x2ec   : > { %v1923_v39 = vmin.f32 %v1921_v1, %v1922_v62  ;;  %v2213_v24 = vmax.f32 %v2212_v50, %v2198_v33  ;;  %v2216_v23 = vmin.f32 %v2215_v57, %v2211_v55  ;;  %v1626_v3 = vadd.f32 %v3468_v26, %v6556_v43  ;;  %v2312_v28 = vpop.f32.mrf.mxu1  ;;  %v3795_v33 = vld [vmem:[%s6378_s6 + $0xd4] ss:$20 sps:$4 sm:$0xff]  }
 0x2ed   : > { %v3474_v16 = vadd.f32 %v6558_v38, %v6557_v45  ;;  %v1925_v59 = vmax.f32 %v1924_v0, %v1910_v56  ;;  %v2305_v40 = vadd.f32 %v5497_v10, %v3550_v51  ;;  %v2332_v60 = vpack.c.bf16 %v2325_v8, %v2324_v52  ;;  %v3797_v8 = vld [vmem:[%s6378_s6 + $0xac] ss:$20 sps:$4 sm:$0xff]   ;;  %v3798_v45 = vld [vmem:[%s6378_s6 + $0xa8] ss:$20 sps:$4 sm:$0xff]  }
 0x2ee   : > { %v1928_v54 = vmin.f32 %v1927_v34, %v1923_v39  ;;  %2214 = vst [vmem:[%s6380_s8 + $0xa] sm:$0x1] %v2213_v24  ;;  %2217 = vst [vmem:[%s6380_s8 + $0x16] sm:$0x1] %v2216_v23  ;;  %v1671_v27 = vrot.slane %v1670_v19, 4  ;;  %v1703_v12 = vmax.f32 %v1626_v3, %v1629_v61  ;;  %v3477_v11 = vadd.f32 %v6560_v44, %v6559_v6 }
 0x2ef   : > { %v1634_v7 = vadd.f32 %v3474_v16, %v6556_v43  ;;  %1926 = vst [vmem:[%s6380_s8 + $0x2] sm:$0x1] %v1925_v59  ;;  %v2302_v51 = vadd.f32 %v5497_v10, %v5388_v21  ;;  %2369 = vmatmul.mubr.bf16.vlgmr.msra.gmra.mxu0 %v2332_v60  ;;  %v3480_v20 = vadd.f32 %v5386_v4, %v6561_v18  ;;  %v1684_v58 = vrot.slane %v5492_v9, 4 }
 0x2f0   : > { %1929 = vst [vmem:[%s6380_s8 + $0xe] sm:$0x1] %v1928_v54  ;;  %v3483_v36 = vadd.f32 %v5468_v32, %v5436_v13  ;;  %v1637_v53 = vadd.f32 %v3477_v11, %v6556_v43  ;;  %v6562_v22 = vmov 0   ;;  %2507 = vmatpush1.bf16.msra.mxu0 %v3792_v47  ;;  %v1697_v21 = vrot.slane %v1696_v37, 4  ;;  %v3793_v13 = vld [vmem:[%s6378_s6 + $0xfc] ss:$20 sps:$4 sm:$0xff]  }
 0x2f1   : > { %v1704_v1 = vmax.f32 %v1703_v12, %v1634_v7  ;;  %2378 = vmatprep.mubr.bf16.mxu0 %v6562_v22  ;;  %v2327_v63 = vmax.f32 %v2305_v40, 0.0  ;;  %v1642_v4 = vadd.f32 %v3480_v20, %v6556_v43  ;;  %v3486_v25 = vadd.f32 %v3485_v15, %v5484_v5  ;;  %2508 = vmatprep.subr.bf16.mxu0 %v3793_v13  ;;  %v3794_v5 = vld [vmem:[%s6378_s6 + $0xf8] ss:$20 sps:$4 sm:$0xff]  }
 0x2f2   : > { %v1672_v32 = vmax.f32 %v1670_v19, %v1671_v27  ;;  %v1645_v17 = vadd.f32 %v3483_v36, %v6556_v43  ;;  %v3489_v29 = vadd.f32 %v3488_v48, %v3487_v49  ;;  %v2326_v50 = vmax.f32 %v2302_v51, 0.0  ;;  %v3799_v54 = vld [vmem:[%s6378_s6 + $0x84] ss:$20 sps:$4 sm:$0xff]  }
 0x2f3   : > { %v1705_v26 = vmax.f32 %v1704_v1, %v1637_v53  ;;  %v1685_v57 = vmax.f32 %v5492_v9, %v1684_v58  ;;  %v1650_v62 = vadd.f32 %v3486_v25, %v6556_v43  ;;  %v2310_v41 = vadd.f32 %v5497_v10, %v2309_v30  ;;  %v3796_v30 = vld [vmem:[%s6378_s6 + $0xd0] ss:$20 sps:$4 sm:$0xff]   ;;  %v3802_v1 = vld [vmem:[%s6378_s6 + $0x58] ss:$20 sps:$4 sm:$0xff]  }
 0x2f4   : > { %2509 = vmatpush1.bf16.msra.mxu0 %v3794_v5  ;;  %v2333_v15 = vpack.c.bf16 %v2327_v63, %v2326_v50  ;;  %v2313_v19 = vadd.f32 %v5497_v10, %v2312_v28  ;;  %v1673_v55 = vrot.slane %v1672_v32, 2  ;;  %v1698_v9 = vmax.f32 %v1696_v37, %v1697_v21  ;;  %v6563_v21 = vld [vmem:[#allocation9_spill] sm:$0xff] }
 0x2f5   : > { %v1706_v46 = vmax.f32 %v1705_v26, %v1642_v4  ;;  %2510 = vmatprep.subr.bf16.mxu0 %v3795_v33  ;;  %v1653_v34 = vadd.f32 %v3489_v29, %v6556_v43  ;;  %v1686_v61 = vrot.slane %v1685_v57, 2  ;;  %v2328_v39 = vmax.f32 %v2310_v41, 0.0  ;;  %v3805_v26 = vld [vmem:[%s6378_s6 + $0xc] ss:$20 sps:$4 sm:$0xff]   ;;  %v3806_v50 = vld [vmem:[%s6378_s6 + $0x8] ss:$20 sps:$4 sm:$0xff]  }
 0x2f6   : > { %v2329_v52 = vmax.f32 %v2313_v19, 0.0  ;;  %v1674_v37 = vmax.f32 %v1672_v32, %v1673_v55  ;;  %v1699_v49 = vrot.slane %v1698_v9, 2  ;;  %v2318_v38 = vadd.f32 %v5497_v10, %v5490_v14  ;;  %v3800_v14 = vld [vmem:[%s6378_s6 + $0x80] ss:$20 sps:$4 sm:$0xff]   ;;  %v3804_v32 = vld [vmem:[%s6378_s6 + $0x30] ss:$20 sps:$4 sm:$0xff]  }
 0x2f7   : > { %v1707_v0 = vmax.f32 %v1706_v46, %v1645_v17  ;;  %2379 = vmatmul.mubr.bf16.gmra.mxu0 %v2333_v15  ;;  %v1687_v23 = vmax.f32 %v1685_v57, %v1686_v61  ;;  %v2321_v16 = vadd.f32 %v5497_v10, %v3554_v2  ;;  %v3887_v60 = vmov 1966171168   ;;  %v3801_v2 = vld [vmem:[%s6378_s6 + $0x5c] ss:$20 sps:$4 sm:$0xff]   ;;  %v3807_v46 = vld [vmem:[%s6378_s6 + $0x264] ss:$20 sps:$4 sm:$0xff]  }
 0x2f8   : > { %2388 = vmatprep.mubr.bf16.mxu0 %v6562_v22  ;;  %2511 = vmatpush1.bf16.msra.mxu0 %v3796_v30  ;;  %v2334_v59 = vpack.c.bf16 %v2329_v52, %v2328_v39  ;;  %v1675_v40 = vrot.slane %v1674_v37, 1  ;;  %v1725_v27 = vunpack.c.l.s4 %v3887_v60  ;;  %v1700_v12 = vmax.f32 %v1698_v9, %v1699_v49  ;;  %v3412_v57 = vld [vmem:[%s6380_s8 + $0x18] ss:$2 sm:$0xf]  ;;  %v3808_v19 = vld [vmem:[%s6378_s6 + $0x260] ss:$20 sps:$4 sm:$0xff]  }
 0x2f9   : > { %v1708_v56 = vmax.f32 %v1707_v0, %v1650_v62  ;;  %2512 = vmatprep.subr.bf16.mxu0 %v3797_v8  ;;  %v1688_v6 = vrot.slane %v1687_v23, 1  ;;  %v2330_v10 = vmax.f32 %v2318_v38, 0.0  ;;  %v2331_v11 = vmax.f32 %v2321_v16, 0.0  ;;  %v3809_v33 = vld [vmem:[%s6378_s6 + $0x23c] ss:$20 sps:$4 sm:$0xff]   ;;  %v6587_v43 = vld [vmem:[#allocation25_spill] sm:$0xff] }
 0x2fa   : > { %v1676_v51 = vmax.f32 %v1674_v37, %v1675_v40  ;;  %v1726_v18 = vunpack.c.0.s8 %v1725_v27  ;;  %v1701_v20 = vrot.slane %v1700_v12, 1  ;;  %v6565_v5 = vlaneseq  ;;  %v3810_v55 = vld [vmem:[%s6378_s6 + $0x238] ss:$20 sps:$4 sm:$0xff]   ;;  %v3811_v9 = vld [vmem:[%s6378_s6 + $0x214] ss:$20 sps:$4 sm:$0xff]  }
 0x2fb   : > { %v1709_v24 = vmax.f32 %v1708_v56, %v1653_v34  ;;  %v1689_v48 = vmax.f32 %v1687_v23, %v1688_v6  ;;  %v2335_v53 = vpack.c.bf16 %v2331_v11, %v2330_v10  ;;  %v6566_v15 = vmov 0  ;;  %v3812_v0 = vld [vmem:[%s6378_s6 + $0x210] ss:$20 sps:$4 sm:$0xff]   ;;  %v3813_v34 = vld [vmem:[%s6378_s6 + $0x1ec] ss:$20 sps:$4 sm:$0xff]  }
 0x2fc   : > { %2513 = vmatpush1.bf16.msra.mxu0 %v3798_v45  ;;  %v5596_v63 = vsub.s32 %v1726_v18, %v6563_v21  ;;  %v1702_v4 = vmax.f32 %v1700_v12, %v1701_v20  ;;  %vm5617_vm1 = vcmp.lt.s32.totalorder %v6565_v5, 512  ;;  %v3814_v61 = vld [vmem:[%s6378_s6 + $0x1e8] ss:$20 sps:$4 sm:$0xff]   ;;  %v3815_v56 = vld [vmem:[%s6378_s6 + $0x1c4] ss:$20 sps:$4 sm:$0xff]   ;;  %v6569_v16 = vld [vmem:[#allocation10_spill] sm:$0xff] }
 0x2fd   : > { %v1710_v3 = vrot.slane %v1709_v24, 4  ;;  %2514 = vmatprep.subr.bf16.mxu0 %v3799_v54  ;;  %v1722_v47 = vcombine.low %v1676_v51, %v1689_v48  ;;  %v6567_v15 = vsel %vm5617_vm1, 4294967295, %v6566_v15  ;;  %v3816_v30 = vld [vmem:[%s6378_s6 + $0x1c0] ss:$20 sps:$4 sm:$0xff]   ;;  %v3817_v39 = vld [vmem:[%s6378_s6 + $0x19c] ss:$20 sps:$4 sm:$0xff]  }
 0x2fe   : > { %6564 = vst [vmem:[#allocation34_spill] sm:$0xff] %v5596_v63  ;;  %6568 = vst [vmem:[#allocation35_spill] sm:$0xff] %v6567_v15  ;;  %v3818_v52 = vld [vmem:[%s6378_s6 + $0x198] ss:$20 sps:$4 sm:$0xff]   ;;  %v3819_v8 = vld [vmem:[%s6378_s6 + $0x174] ss:$20 sps:$4 sm:$0xff]  }
 0x2ff   : > { %v1711_v7 = vmax.f32 %v1709_v24, %v1710_v3  ;;  %2389 = vmatmul.mubr.bf16.gmra.mxu0 %v2334_v59  ;;  %v1730_v28 = vrot.slane %v1722_v47, %v5596_v63  ;;  %v3820_v37 = vld [vmem:[%s6378_s6 + $0x170] ss:$20 sps:$4 sm:$0xff]   ;;  %v3821_v49 = vld [vmem:[%s6378_s6 + $0x14c] ss:$20 sps:$4 sm:$0xff]   ;;  %v3822_v24 = vld [vmem:[%s6378_s6 + $0x148] ss:$20 sps:$4 sm:$0xff]  }
 0x300   : > { %2398 = vmatprep.mubr.bf16.mxu0 %v6562_v22  ;;  %2515 = vmatpush1.bf16.msra.mxu0 %v3800_v14  ;;  %v3803_v22 = vld [vmem:[%s6378_s6 + $0x34] ss:$20 sps:$4 sm:$0xff]   ;;  %v6570_v54 = vld [vmem:[#allocation11_spill] sm:$0xff] }
 0x301   : > { %v1712_v44 = vrot.slane %v1711_v7, 2  ;;  %2516 = vmatprep.subr.bf16.mxu0 %v3801_v2  ;;  %v3823_v23 = vld [vmem:[%s6378_s6 + $0x268] ss:$20 sps:$4 sm:$0xff]   ;;  %v3825_v21 = vld [vmem:[%s6378_s6 + $0x240] ss:$20 sps:$4 sm:$0xff]  }
 0x303   : > { %v1713_v36 = vmax.f32 %v1711_v7, %v1712_v44 }
 0x304   : > { %2517 = vmatpush1.bf16.msra.mxu0 %v3802_v1 }
 0x305   : > { %v1714_v58 = vrot.slane %v1713_v36, 1  ;;  %2518 = vmatprep.subr.bf16.mxu0 %v3803_v22 }
 0x307   : > { %v1715_v25 = vmax.f32 %v1713_v36, %v1714_v58  ;;  %2399 = vmatmul.mubr.bf16.gmra.mxu0 %v2335_v53  ;;  %v3824_v53 = vld [vmem:[%s6378_s6 + $0x128] ss:$20 sps:$4 sm:$0xff]  }
 0x308   : > { %2519 = vmatpush1.bf16.msra.mxu0 %v3804_v32 }
 0x309   : > { %v1723_v13 = vcombine.low %v1702_v4, %v1715_v25  ;;  %2520 = vmatprep.subr.bf16.mxu0 %v3805_v26 }
 0x30b   : > { %v1737_v17 = vrot.slane %v1723_v13, %v5596_v63 }
 0x30c   : > { %2521 = vmatpush1.bf16.msra.mxu0 %v3806_v50  ;;  %v3827_v50 = vld [vmem:[%s6378_s6 + $0x218] ss:$20 sps:$4 sm:$0xff]  }
 0x30d   : > { %v1738_v29 = vcombine.low %v1730_v28, %v1737_v17  ;;  %2522 = vmatprep.subr.bf16.mxu0 %v3807_v46  ;;  %v3826_v28 = vld [vmem:[%s6378_s6 + $0x100] ss:$20 sps:$4 sm:$0xff]  }
 0x30f   : > { %v1745_v62 = vrot.slane %v1738_v29, %v5596_v63 }
 0x310   : > { %2523 = vmatpush2.bf16.msra.mxu0 %v3808_v19  ;;  %v3828_v19 = vld [vmem:[%s6378_s6 + $0xd8] ss:$20 sps:$4 sm:$0xff]  }
 0x311   : > { %v1747_v41 = vmax.f32 %v3412_v57, %v1745_v62  ;;  %2524 = vmatprep.subr.bf16.mxu0 %v3809_v33 }
 0x313   : > { %3413 = vst.msk [vmem:[%s6380_s8 + $0x18] ss:$2 sm:$0xf] %vm5617_vm1, %v1747_v41 }
 0x314   : > { %2525 = vmatpush2.bf16.msra.mxu0 %v3810_v55 }
 0x315   : > { %2526 = vmatprep.subr.bf16.mxu0 %v3811_v9  ;;  %v3829_v9 = vld [vmem:[%s6378_s6 + $0x1f0] ss:$20 sps:$4 sm:$0xff]  }
 0x318   : > { %2527 = vmatpush2.bf16.msra.mxu0 %v3812_v0 }
 0x319   : > { %2528 = vmatprep.subr.bf16.mxu0 %v3813_v34 }
 0x31c   : > { %2529 = vmatpush2.bf16.msra.mxu0 %v3814_v61 }
 0x31d   : > { %2530 = vmatprep.subr.bf16.mxu0 %v3815_v56 }
 0x320   : > { %2531 = vmatpush2.bf16.msra.mxu0 %v3816_v30 }
 0x321   : > { %2532 = vmatprep.subr.bf16.mxu0 %v3817_v39  ;;  %v3830_v39 = vld [vmem:[%s6378_s6 + $0xb0] ss:$20 sps:$4 sm:$0xff]  }
 0x324   : > { %2533 = vmatpush2.bf16.msra.mxu0 %v3818_v52 }
 0x325   : > { %2534 = vmatprep.subr.bf16.mxu0 %v3819_v8 }
 0x328   : > { %2535 = vmatpush2.bf16.msra.mxu0 %v3820_v37  ;;  %v3831_v37 = vld [vmem:[%s6378_s6 + $0x1c8] ss:$20 sps:$4 sm:$0xff]  }
 0x329   : > { %2536 = vmatprep.subr.bf16.mxu0 %v3821_v49 }
 0x32c   : > { %2537 = vmatpush2.bf16.msra.mxu0 %v3822_v24 }
 0x32d   : > { %3495 = vmatprep.subr.bf16.mxu0 %v3823_v23 }
 0x3af   : > { %v2370_v3 = vpop.f32.mrf.mxu0 }
 0x3b0   : > { %v2371_v60 = vadd.f32 %v2370_v3, %v6570_v54 }
 0x3b1   : > { %v2372_v45 = vpop.f32.mrf.mxu0 }
 0x3b2   : > { %v2373_v59 = vadd.f32 %v2372_v45, %v6569_v16  ;;  %v2409_v10 = vmax.f32 %v2371_v60, 0.0 }
 0x3b3   : > { %v2374_v38 = vpop.f32.mrf.mxu0 }
 0x3b4   : > { %v2375_v40 = vadd.f32 %v2374_v38, %v6570_v54  ;;  %v2410_v44 = vmax.f32 %v2373_v59, 0.0  ;;  %v3832_v38 = vld [vmem:[%s6378_s6 + $0x88] ss:$20 sps:$4 sm:$0xff]  }
 0x3b5   : > { %v2376_v27 = vpop.f32.mrf.mxu0 }
 0x3b6   : > { %v2377_v12 = vadd.f32 %v2376_v27, %v6569_v16  ;;  %v2411_v7 = vmax.f32 %v2375_v40, 0.0  ;;  %v3833_v40 = vld [vmem:[%s6378_s6 + $0x1a0] ss:$20 sps:$4 sm:$0xff]  }
 0x3b7   : > { %v2380_v6 = vpop.f32.mrf.mxu0 }
 0x3b8   : > { %v2412_v14 = vmax.f32 %v2377_v12, 0.0  ;;  %v5680_v51 = vpack.c.bf16 %v2411_v7, %v2409_v10  ;;  %v2381_v48 = vadd.f32 %v2380_v6, %v6570_v54  ;;  %v3835_v6 = vld [vmem:[%s6378_s6 + $0x178] ss:$20 sps:$4 sm:$0xff]   ;;  %v3838_v10 = vld [vmem:[%s6378_s6 + $0x10] ss:$20 sps:$4 sm:$0xff]  }
 0x3b9   : > { %v2382_v11 = vpop.f32.mrf.mxu0 }
 0x3ba   : > { %v5678_v2 = vpack.c.bf16 %v2412_v14, %v2410_v44  ;;  %v2383_v20 = vadd.f32 %v2382_v11, %v6569_v16  ;;  %v2413_v13 = vmax.f32 %v2381_v48, 0.0  ;;  %v3836_v44 = vld [vmem:[%s6378_s6 + $0x38] ss:$20 sps:$4 sm:$0xff]   ;;  %v3837_v14 = vld [vmem:[%s6378_s6 + $0x150] ss:$20 sps:$4 sm:$0xff]   ;;  %v5755_v11 = vpop.permute.xlu1 %2846 }
 0x3bb   : > { %v2384_v18 = vpop.f32.mrf.mxu0 }
 0x3bc   : > { %v2385_v36 = vadd.f32 %v2384_v18, %v6570_v54  ;;  %2465 = vmatprep.mubr.bf16.mxu1 %v5678_v2  ;;  %2538 = vmatprep.mubr.bf16.mxu0 %v5678_v2  ;;  %v2414_v4 = vmax.f32 %v2383_v20, 0.0 }
 0x3bd   : > { %v2386_v58 = vpop.f32.mrf.mxu0  ;;  %2466 = vmatmul.mubr.bf16.vlgmr.msra.gmra.mxu1 %v5680_v51  ;;  %2539 = vmatmul.mubr.bf16.vlgmr.msra.gmra.mxu0 %v5680_v51 }
 0x3be   : > { %v2387_v1 = vadd.f32 %v2386_v58, %v6569_v16  ;;  %3563 = vmatpush3.bf16.msra.mxu1 %v3824_v53  ;;  %3496 = vmatpush3.bf16.msra.mxu0 %v3824_v53  ;;  %v2415_v22 = vmax.f32 %v2385_v36, 0.0 }
 0x3bf   : > { %v2390_v47 = vpop.f32.mrf.mxu0  ;;  %3556 = vmatprep.subr.bf16.mxu1 %v3825_v21  ;;  %3497 = vmatprep.subr.bf16.mxu0 %v3825_v21 }
 0x3c0   : > { %v2416_v25 = vmax.f32 %v2387_v1, 0.0  ;;  %v5701_v17 = vpack.c.bf16 %v2415_v22, %v2413_v13  ;;  %v2391_v62 = vadd.f32 %v2390_v47, %v6570_v54 }
 0x3c1   : > { %v2392_v32 = vpop.f32.mrf.mxu0 }
 0x3c2   : > { %v5696_v26 = vpack.c.bf16 %v2416_v25, %v2414_v4  ;;  %3564 = vmatpush3.bf16.msra.mxu1 %v3826_v28  ;;  %3498 = vmatpush3.bf16.msra.mxu0 %v3826_v28  ;;  %v2393_v57 = vadd.f32 %v2392_v32, %v6569_v16  ;;  %v2417_v61 = vmax.f32 %v2391_v62, 0.0 }
 0x3c3   : > { %v2394_v29 = vpop.f32.mrf.mxu0  ;;  %3557 = vmatprep.subr.bf16.mxu1 %v3827_v50  ;;  %3499 = vmatprep.subr.bf16.mxu0 %v3827_v50 }
 0x3c4   : > { %v2395_v46 = vadd.f32 %v2394_v29, %v6570_v54  ;;  %2475 = vmatprep.mubr.bf16.mxu1 %v5696_v26  ;;  %2548 = vmatprep.mubr.bf16.mxu0 %v5696_v26  ;;  %v2418_v0 = vmax.f32 %v2393_v57, 0.0 }
 0x3c5   : > { %v2396_v5 = vpop.f32.mrf.mxu0  ;;  %2476 = vmatmul.mubr.bf16.gmra.mxu1 %v5701_v17  ;;  %2549 = vmatmul.mubr.bf16.gmra.mxu0 %v5701_v17 }
 0x3c6   : > { %v2397_v41 = vadd.f32 %v2396_v5, %v6569_v16  ;;  %3565 = vmatpush3.bf16.msra.mxu1 %v3828_v19  ;;  %3500 = vmatpush3.bf16.msra.mxu0 %v3828_v19  ;;  %v2419_v33 = vmax.f32 %v2395_v46, 0.0 }
 0x3c7   : > { %v2400_v55 = vpop.f32.mrf.mxu0  ;;  %3558 = vmatprep.subr.bf16.mxu1 %v3829_v9  ;;  %3501 = vmatprep.subr.bf16.mxu0 %v3829_v9 }
 0x3c8   : > { %v2420_v34 = vmax.f32 %v2397_v41, 0.0  ;;  %v2429_v52 = vpack.c.bf16 %v2419_v33, %v2417_v61  ;;  %v2401_v23 = vadd.f32 %v2400_v55, %v6570_v54  ;;  %v6571_v33 = vld [vmem:[#allocation12_spill] sm:$0xff]  ;;  %v6574_v61 = vld [vmem:[#allocation19_spill] sm:$0xff] }
 0x3c9   : > { %v2402_v56 = vpop.f32.mrf.mxu0  ;;  %vm2763_vm0 = vcmp.lt.f32.partialorder %v6571_v33, 0.9  ;;  %vm3010_vm6 = vcmp.eq.s32.totalorder %v6574_v61, 1 }
 0x3ca   : > { %v2430_v30 = vpack.c.bf16 %v2420_v34, %v2418_v0  ;;  %3566 = vmatpush3.bf16.msra.mxu1 %v3830_v39  ;;  %3502 = vmatpush3.bf16.msra.mxu0 %v3830_v39  ;;  %v2403_v49 = vadd.f32 %v2402_v56, %v6569_v16  ;;  %v2421_v27 = vmax.f32 %v2401_v23, 0.0  ;;  %v6572_v0 = vld [vmem:[#allocation17_spill] sm:$0xff]  ;;  %v6573_v34 = vld [vmem:[#allocation4_spill] sm:$0xff]  ;;  %v6575_v56 = vld [vmem:[#allocation30_spill] sm:$0xff]  ;;  %v3132_v39 = vpop.permute.xlu0 %3131 }
 0x3cb   : > { %v2404_v8 = vpop.f32.mrf.mxu0  ;;  %3559 = vmatprep.subr.bf16.mxu1 %v3831_v37  ;;  %3503 = vmatprep.subr.bf16.mxu0 %v3831_v37  ;;  %vm2866_vm14 = vcmp.eq.s32.totalorder %v6572_v0, 1  ;;  %v6577_v37 = vld [vmem:[#allocation23_spill] sm:$0xff]  ;;  %v6578_v23 = vld [vmem:[#allocation14_spill] sm:$0xff]  ;;  %vm3154_vm11 = vcmp.eq.s32.totalorder %v3132_v39, 1 }
 0x3cc   : > { %v2405_v24 = vadd.f32 %v2404_v8, %v6570_v54  ;;  %2485 = vmatprep.mubr.bf16.mxu1 %v2430_v30  ;;  %2558 = vmatprep.mubr.bf16.mxu0 %v2430_v30  ;;  %v2422_v60 = vmax.f32 %v2403_v49, 0.0  ;;  %v6576_v8 = vld [vmem:[#allocation27_spill] sm:$0xff]  ;;  %vm2762_vm10 = vcmp.lt.f32.partialorder %v6577_v37, 0.9  ;;  %vm2764_vm8 = vcmp.lt.f32.partialorder %v6578_v23, 0.9 }
 0x3cd   : > { %v2406_v3 = vpop.f32.mrf.mxu0  ;;  %2486 = vmatmul.mubr.bf16.gmra.mxu1 %v2429_v52  ;;  %2559 = vmatmul.mubr.bf16.gmra.mxu0 %v2429_v52 }
 0x3ce   : > { %v2407_v45 = vadd.f32 %v2406_v3, %v6569_v16  ;;  %3567 = vmatpush3.bf16.msra.mxu1 %v3832_v38  ;;  %3504 = vmatpush3.bf16.msra.mxu0 %v3832_v38  ;;  %v2423_v59 = vmax.f32 %v2405_v24, 0.0  ;;  %v3834_v16 = vld [vmem:[%s6378_s6 + $0x60] ss:$20 sps:$4 sm:$0xff]   ;;  %v6579_v3 = vld [vmem:[#allocation15_spill] sm:$0xff] }
 0x3cf   : > { %3560 = vmatprep.subr.bf16.mxu1 %v3833_v40  ;;  %3505 = vmatprep.subr.bf16.mxu0 %v3833_v40 }
 0x3d0   : > { %v2424_v54 = vmax.f32 %v2407_v45, 0.0  ;;  %v2431_v7 = vpack.c.bf16 %v2423_v59, %v2421_v27  ;;  %v6580_v27 = vld [vmem:[#allocation5_spill] sm:$0xff] }
 0x3d2   : > { %v2432_v12 = vpack.c.bf16 %v2424_v54, %v2422_v60  ;;  %3568 = vmatpush3.bf16.msra.mxu1 %v3834_v16  ;;  %3506 = vmatpush3.bf16.msra.mxu0 %v3834_v16 }
 0x3d3   : > { %3561 = vmatprep.subr.bf16.mxu1 %v3835_v6  ;;  %3507 = vmatprep.subr.bf16.mxu0 %v3835_v6 }
 0x3d4   : > { %2495 = vmatprep.mubr.bf16.mxu1 %v2432_v12  ;;  %2568 = vmatprep.mubr.bf16.mxu0 %v2432_v12 }
 0x3d5   : > { %2496 = vmatmul.mubr.bf16.gmra.mxu1 %v2431_v7  ;;  %2569 = vmatmul.mubr.bf16.gmra.mxu0 %v2431_v7 }
 0x3d6   : > { %3569 = vmatpush3.bf16.msra.mxu1 %v3836_v44  ;;  %3508 = vmatpush3.bf16.msra.mxu0 %v3836_v44 }
 0x3d7   : > { %2611 = vmatprep.mubr.bf16.mxu0 %v5678_v2  ;;  %2619 = vmatprep.mubr.bf16.mxu1 %v5696_v26  ;;  %v5757_v2 = vpop.permute.xlu1 %2849 }
 0x3d8   : > { %3562 = vmatprep.subr.bf16.mxu1 %v3837_v14  ;;  %3509 = vmatprep.subr.bf16.mxu0 %v3837_v14  ;;  %vm2868_vm13 = vcmp.eq.s32.totalorder %v5757_v2, 1 }
 0x3da   : > { %3570 = vmatpush3.bf16.msra.mxu1 %v3838_v10  ;;  %3510 = vmatpush3.bf16.msra.mxu0 %v3838_v10 }
 0x3db   : > { %v5759_v18 = vpop.permute.xlu1 %2852 }
 0x3dd   : > { %2612 = vmatmul.mubr.bf16.vlgmr.msra.gmra.mxu0 %v5680_v51  ;;  %2620 = vmatmul.mubr.bf16.vlgmr.msra.gmra.mxu1 %v5701_v17 }
 0x3de   : > { %2627 = vmatprep.mubr.bf16.mxu1 %v2430_v30 }
 0x3df   : > { %v5761_v20 = vpop.permute.xlu1 %2855 }
 0x3e3   : > { %v5763_v36 = vpop.permute.xlu1 %2858 }
 0x3e5   : > { %2628 = vmatmul.mubr.bf16.gmra.mxu1 %v2429_v52 }
 0x3e6   : > { %2635 = vmatprep.mubr.bf16.mxu1 %v2432_v12  ;;  %v6581_v12 = vld [vmem:[#allocation24_spill] sm:$0xff] }
 0x3e7   : > { %v5765_v48 = vpop.permute.xlu1 %2861  ;;  %vm2765_vm7 = vcmp.lt.f32.partialorder %v6581_v12, 0.9 }
 0x3eb   : > { %v5767_v58 = vpop.permute.xlu1 %2864 }
 0x3ed   : > { %2636 = vmatmul.mubr.bf16.gmra.mxu1 %v2431_v7 }
 0x3ef   : > { %v2916_v51 = vpop.permute.xlu1 %2915 }
 0x3f0   : > { %vm2938_vm2 = vcmp.eq.s32.totalorder %v2916_v51, 1 }
 0x3f3   : > { %v5769_v1 = vpop.permute.xlu1 %2921 }
 0x3f7   : > { %v5771_v53 = vpop.permute.xlu1 %2924 }
 0x3f8   : > { %vm2941_vm15 = vcmp.eq.s32.totalorder %v5771_v53, 1 }
 0x3fb   : > { %v5773_v22 = vpop.permute.xlu1 %2930 }
 0x3ff   : > { %v5775_v47 = vpop.permute.xlu1 %2936 }
 0x403   : > { %v5777_v21 = vpop.permute.xlu1 %2990 }
 0x404   : > { %vm3011_vm5 = vcmp.eq.s32.totalorder %v5777_v21, 1 }
 0x407   : > { %v5779_v4 = vpop.permute.xlu1 %2993 }
 0x40b   : > { %v5781_v25 = vpop.permute.xlu1 %2999 }
 0x40c   : > { %vm3014_vm12 = vcmp.eq.s32.totalorder %v5781_v25, 1 }
 0x40f   : > { %v5783_v13 = vpop.permute.xlu1 %3005 }
 0x413   : > { %v3060_v32 = vpop.permute.xlu1 %3059 }
 0x414   : > { %vm3082_vm9 = vcmp.eq.s32.totalorder %v3060_v32, 1 }
 0x417   : > { %v5785_v26 = vpop.permute.xlu1 %3065 }
 0x41b   : > { %v5787_v28 = vpop.permute.xlu1 %3068 }
 0x41f   : > { %v5789_v17 = vpop.permute.xlu1 %3074 }
 0x423   : > { %v5791_v29 = vpop.permute.xlu1 %3080 }
 0x427   : > { %v5793_v46 = vpop.permute.xlu1 %3134 }
 0x428   : > { %vm3155_vm4 = vcmp.eq.s32.totalorder %v5793_v46, 1 }
 0x42b   : > { %v5800_v52 = vpop.permute.xlu1 %3137 }
 0x42c   : > { %vm3156_vm3 = vcmp.eq.s32.totalorder %v5800_v52, 1 }
 0x47d   : > { %v2467_v50 = vpop.f32.mrf.mxu1  ;;  %v2540_v57 = vpop.f32.mrf.mxu0 }
 0x47e   : > { %v2468_v30 = vadd.f32 %v2467_v50, %v6575_v56  ;;  %v2541_v54 = vadd.f32 %v2540_v57, %v4983_v42  ;;  %v6582_v50 = vld [vmem:[#allocation28_spill] sm:$0xff] }
 0x47f   : > { %v2469_v62 = vpop.f32.mrf.mxu1  ;;  %v2542_v5 = vpop.f32.mrf.mxu0 }
 0x480   : > { %v5816_v40 = vsel %vm2762_vm10, %v2468_v30, 0.0  ;;  %v5820_v60 = vsel %vm2866_vm14, %v2468_v30, 0.0  ;;  %v5828_v16 = vsel %vm2938_vm2, %v2468_v30, 0.0  ;;  %v5832_v7 = vsel %vm3010_vm6, %v2468_v30, 0.0 }
 0x481   : > { %v2471_v41 = vpop.f32.mrf.mxu1  ;;  %v2544_v19 = vpop.f32.mrf.mxu0  ;;  %vm3086_vm14 = vcmp.eq.s32.totalorder %v6582_v50, 1  ;;  %vm2869_vm10 = vcmp.eq.s32.totalorder %v5759_v18, 1  ;;  %v5841_v51 = vsel %vm3082_vm9, %v2468_v30, 0.0  ;;  %v5844_v57 = vsel %vm3154_vm11, %v2468_v30, 0.0 }
 0x482   : > { %v2472_v45 = vadd.f32 %v2471_v41, %v6575_v56  ;;  %v2545_v6 = vadd.f32 %v2544_v19, %v4983_v42  ;;  %v2470_v41 = vadd.f32 %v2469_v62, %v4956_v31  ;;  %v2543_v0 = vadd.f32 %v2542_v5, %v4993_v35 }
 0x483   : > { %v2473_v55 = vpop.f32.mrf.mxu1  ;;  %v2546_v9 = vpop.f32.mrf.mxu0  ;;  %vm6584_vm2 = vcmp.eq.s32.totalorder %v5755_v11, 1  ;;  %vm6585_vm11 = vcmp.eq.s32.totalorder %v6573_v34, 1  ;;  %vm6586_vm9 = vcmp.eq.s32.totalorder %v6576_v8, 1 }
 0x484   : > { %v2474_v44 = vadd.f32 %v2473_v55, %v4956_v31  ;;  %v2547_v19 = vadd.f32 %v2546_v9, %v4993_v35  ;;  %v6583_v55 = vld [vmem:[#allocation20_spill] sm:$0xff]  ;;  %v5852_v61 = vsel %vm2763_vm0, %v2472_v45, 0.0  ;;  %v5856_v32 = vsel %vm6584_vm2, %v2472_v45, 0.0 }
 0x485   : > { %v2477_v49 = vpop.f32.mrf.mxu1  ;;  %v2550_v24 = vpop.f32.mrf.mxu0  ;;  %vm3013_vm6 = vcmp.eq.s32.totalorder %v6583_v55, 1  ;;  %v5861_v62 = vsel %vm6585_vm11, %v2472_v45, 0.0  ;;  %v5865_v9 = vsel %vm3011_vm5, %v2472_v45, 0.0  ;;  %v5869_v5 = vsel %vm6586_vm9, %v2472_v45, 0.0 }
 0x486   : > { %v2478_v39 = vadd.f32 %v2477_v49, %v6575_v56  ;;  %v2551_v33 = vadd.f32 %v2550_v24, %v4983_v42  ;;  %v2666_v11 = vmax.f32 %v2541_v54, %v2545_v6  ;;  %v5874_v37 = vsel %vm3155_vm4, %v2472_v45, 0.0  ;;  %v5885_v24 = vpop.permute.xlu0 %3140 }
 0x487   : > { %v2479_v38 = vpop.f32.mrf.mxu1  ;;  %v2552_v59 = vpop.f32.mrf.mxu0  ;;  %v2653_v49 = vmax.f32 %v2470_v41, %v2474_v44  ;;  %vm2767_vm0 = vcmp.lt.f32.partialorder %v6587_v43, 0.9  ;;  %vm2871_vm5 = vcmp.eq.s32.totalorder %v5763_v36, 1  ;;  %v2679_v21 = vmax.f32 %v2543_v0, %v2547_v19 }
 0x488   : > { %v2480_v34 = vadd.f32 %v2479_v38, %v4956_v31  ;;  %v2553_v8 = vadd.f32 %v2552_v59, %v4993_v35  ;;  %v5890_v38 = vpop.permute.xlu1 %3143  ;;  %v5894_v54 = vsel %vm2764_vm8, %v2478_v39, 0.0  ;;  %v5898_v6 = vsel %vm2868_vm13, %v2478_v39, 0.0 }
 0x489   : > { %v2481_v14 = vpop.f32.mrf.mxu1  ;;  %v2554_v10 = vpop.f32.mrf.mxu0  ;;  %vm6588_vm4 = vcmp.eq.s32.totalorder %v5769_v1, 1  ;;  %vm6589_vm9 = vcmp.eq.s32.totalorder %v5779_v4, 1  ;;  %vm6592_vm2 = vcmp.eq.s32.totalorder %v5785_v26, 1  ;;  %v5915_v41 = vmax.f32 %v2666_v11, %v2551_v33 }
 0x48a   : > { %v5883_v46 = vadd.f32 %v2481_v14, %v6575_v56  ;;  %v5902_v59 = vsel %vm6588_vm4, %v2478_v39, 0.0  ;;  %v5906_v44 = vsel %vm6589_vm9, %v2478_v39, 0.0  ;;  %v6591_v14 = vld [vmem:[#allocation21_spill] sm:$0xff]  ;;  %v5913_v23 = vsel %vm6592_vm2, %v2478_v39, 0.0 }
 0x48b   : > { %v2483_v30 = vpop.f32.mrf.mxu1  ;;  %v2556_v15 = vpop.f32.mrf.mxu0  ;;  %6590 = vst [vmem:[#allocation8_spill] sm:$0xff] %v5906_v44  ;;  %vm3015_vm11 = vcmp.eq.s32.totalorder %v6591_v14, 1  ;;  %6593 = vst [vmem:[#allocation36_spill] sm:$0xff] %v5913_v23  ;;  %v5919_v2 = vsel %vm3156_vm3, %v2478_v39, 0.0  ;;  %vm6595_vm8 = vcmp.lt.f32.partialorder %v6579_v3, 0.9  ;;  %v5924_v4 = vmax.f32 %v2653_v49, %v2480_v34 }
 0x48c   : > { %6594 = vst [vmem:[#allocation37_spill] sm:$0xff] %v5919_v2  ;;  %v5927_v19 = vadd.f32 %v2554_v10, %v4983_v42  ;;  %vm3158_vm13 = vcmp.eq.s32.totalorder %v5890_v38, 1  ;;  %vm3085_vm3 = vcmp.eq.s32.totalorder %v5787_v28, 1  ;;  %v5933_v52 = vmax.f32 %v2679_v21, %v2553_v8  ;;  %v5946_v39 = vpop.permute.xlu0 %3146 }
 0x48d   : > { %v2487_v63 = vpop.f32.mrf.mxu1  ;;  %v2560_v23 = vpop.f32.mrf.mxu0  ;;  %v5938_v3 = vsel %vm2765_vm7, %v5883_v46, 0.0  ;;  %vm6597_vm2 = vcmp.eq.s32.totalorder %v5761_v20, 1  ;;  %vm6598_vm4 = vcmp.eq.s32.totalorder %v6580_v27, 1  ;;  %v5951_v11 = vsel %vm2869_vm10, %v5883_v46, 0.0 }
 0x48e   : > { %v5888_v45 = vadd.f32 %v2487_v63, %v6575_v56  ;;  %6596 = vst [vmem:[#allocation38_spill] sm:$0xff] %v5938_v3  ;;  %6599 = vst [vmem:[#allocation42_spill] sm:$0xff] %v5951_v11  ;;  %v5956_v12 = vsel %vm2941_vm15, %v5883_v46, 0.0  ;;  %vm3157_vm7 = vcmp.eq.s32.totalorder %v5885_v24, 1  ;;  %v5970_v18 = vsel %vm3013_vm6, %v5883_v46, 0.0 }
 0x48f   : > { %v5908_v63 = vpop.f32.mrf.mxu1  ;;  %6600 = vst [vmem:[#allocation44_spill] sm:$0xff] %v5956_v12  ;;  %6602 = vst [vmem:[#allocation46_spill] sm:$0xff] %v5970_v18  ;;  %v5973_v53 = vadd.f32 %v2483_v30, %v4956_v31  ;;  %v5976_v34 = vadd.f32 %v2556_v15, %v4993_v35  ;;  %v2561_v25 = vadd.f32 %v2560_v23, %v4983_v42  ;;  %vm3159_vm15 = vcmp.eq.s32.totalorder %v5946_v39, 1  ;;  %v5990_v18 = vpop.permute.xlu1 %3149 }
 0x490   : > { %v2790_v1 = vsel %vm6595_vm8, %v5888_v45, 0.0  ;;  %v2878_v10 = vsel %vm6597_vm2, %v5888_v45, 0.0  ;;  %v3022_v20 = vsel %vm3014_vm12, %v5888_v45, 0.0  ;;  %v3094_v27 = vsel %vm3086_vm14, %v5888_v45, 0.0 }
 0x491   : > { %v2794_v0 = vmax.f32 %v5816_v40, %v2790_v1  ;;  %v2807_v26 = vmin.f32 %v5816_v40, %v2790_v1  ;;  %v2491_v33 = vpop.f32.mrf.mxu1  ;;  %v2950_v40 = vsel %vm6598_vm4, %v5888_v45, 0.0  ;;  %v2882_v21 = vmax.f32 %v5820_v60, %v2878_v10 }
 0x492   : > { %v2895_v50 = vmin.f32 %v5820_v60, %v2878_v10  ;;  %v2954_v8 = vmax.f32 %v5828_v16, %v2950_v40  ;;  %v5983_v1 = vadd.f32 %v2491_v33, %v6575_v56  ;;  %v2967_v30 = vmin.f32 %v5828_v16, %v2950_v40 }
 0x493   : > { %v5965_v49 = vpop.f32.mrf.mxu1  ;;  %v3039_v15 = vmin.f32 %v5832_v7, %v3022_v20  ;;  %v3098_v23 = vmax.f32 %v5841_v51, %v3094_v27  ;;  %v3111_v60 = vmin.f32 %v5841_v51, %v3094_v27  ;;  %vm6603_vm12 = vcmp.eq.s32.totalorder %v5773_v22, 1 }
 0x494   : > { %6601 = vst [vmem:[#allocation13_spill] sm:$0xff] %v5965_v49  ;;  %v3026_v49 = vmax.f32 %v5832_v7, %v3022_v20  ;;  %v2791_v33 = vsel %vm2767_vm0, %v5983_v1, 0.0  ;;  %v2879_v10 = vsel %vm2871_vm5, %v5983_v1, 0.0  ;;  %v2951_v16 = vsel %vm6603_vm12, %v5983_v1, 0.0  ;;  %v6605_v7 = vld [vmem:[#allocation16_spill] sm:$0xff]  ;;  %v6606_v20 = vld [vmem:[#allocation6_spill] sm:$0xff] }
 0x495   : > { %v2497_v55 = vpop.f32.mrf.mxu1  ;;  %vm2768_vm14 = vcmp.lt.f32.partialorder %v6605_v7, 0.9  ;;  %vm2944_vm10 = vcmp.eq.s32.totalorder %v6606_v20, 1  ;;  %vm2872_vm6 = vcmp.eq.s32.totalorder %v5765_v48, 1  ;;  %v2795_v51 = vmax.f32 %v5852_v61, %v2791_v33 }
 0x496   : > { %v2808_v43 = vmin.f32 %v5852_v61, %v2791_v33  ;;  %v2883_v27 = vmax.f32 %v5856_v32, %v2879_v10  ;;  %v2896_v36 = vmin.f32 %v5856_v32, %v2879_v10  ;;  %vm3016_vm0 = vcmp.eq.s32.totalorder %v5783_v13, 1  ;;  %v2562_v33 = vpop.f32.mrf.mxu0 }
 0x497   : > { %v6002_v40 = vpop.f32.mrf.mxu1  ;;  %v2955_v22 = vmax.f32 %v5861_v62, %v2951_v16  ;;  %v3023_v12 = vsel %vm3015_vm11, %v5983_v1, 0.0  ;;  %vm6607_vm5 = vcmp.eq.s32.totalorder %v5789_v17, 1  ;;  %vm3160_vm9 = vcmp.eq.s32.totalorder %v5990_v18, 1 }
 0x498   : > { %6604 = vst [vmem:[#allocation18_spill] sm:$0xff] %v6002_v40  ;;  %v2968_v40 = vmin.f32 %v5861_v62, %v2951_v16  ;;  %v3095_v11 = vsel %vm6607_vm5, %v5983_v1, 0.0  ;;  %v6021_v3 = vmax.f32 %v2794_v0, %v2795_v51  ;;  %v6023_v32 = vmin.f32 %v2807_v26, %v2808_v43  ;;  %v6608_v62 = vld [vmem:[#allocation29_spill] sm:$0xff]  ;;  %v6610_v51 = vld [vmem:[#allocation22_spill] sm:$0xff] }
 0x499   : > { %v2501_v61 = vpop.f32.mrf.mxu1  ;;  %v6025_v10 = vmax.f32 %v2882_v21, %v2883_v27  ;;  %v6027_v2 = vmin.f32 %v2895_v50, %v2896_v36  ;;  %vm3088_vm8 = vcmp.eq.s32.totalorder %v6608_v62, 1  ;;  %v6030_v14 = vmax.f32 %v2954_v8, %v2955_v22  ;;  %v6614_v62 = vld [vmem:[#allocation37_spill] sm:$0xff] }
 0x49a   : > { %v6032_v16 = vmin.f32 %v2967_v30, %v2968_v40  ;;  %v3027_v17 = vmax.f32 %v5865_v9, %v3023_v12  ;;  %v3040_v44 = vmin.f32 %v5865_v9, %v3023_v12  ;;  %v6039_v0 = vsel %vm3158_vm13, %v5888_v45, 0.0  ;;  %v6609_v30 = vld [vmem:[#allocation26_spill] sm:$0xff]  ;;  %v2564_v40 = vpop.f32.mrf.mxu0 }
 0x49b   : > { %v2490_v26 = vadd.f32 %v5908_v63, %v4956_v31  ;;  %v3099_v21 = vmax.f32 %v5869_v5, %v3095_v11  ;;  %v3112_v50 = vmin.f32 %v5869_v5, %v3095_v11  ;;  %v6045_v8 = vpop.f32.mrf.mxu1  ;;  %vm2769_vm11 = vcmp.lt.f32.partialorder %v6609_v30, 0.9  ;;  %v6617_v30 = vld [vmem:[#allocation44_spill] sm:$0xff] }
 0x49c   : > { %vm2873_vm2 = vcmp.eq.s32.totalorder %v5767_v58, 1  ;;  %vm2945_vm4 = vcmp.eq.s32.totalorder %v5775_v47, 1  ;;  %v6053_v9 = vsel %vm3085_vm3, %v5883_v46, 0.0  ;;  %v2668_v45 = vmax.f32 %v5915_v41, %v5927_v19  ;;  %v6115_v36 = vpop.f32.mrf.mxu0 }
 0x49d   : > { %v6057_v38 = vmax.f32 %v3026_v49, %v3027_v17  ;;  %v6059_v63 = vmin.f32 %v3039_v15, %v3040_v44  ;;  %v6064_v5 = vsel %vm3157_vm7, %v5883_v46, 0.0  ;;  %v2655_v11 = vmax.f32 %v5924_v4, %v5973_v53  ;;  %v6612_v17 = vld [vmem:[#allocation8_spill] sm:$0xff] }
 0x49e   : > { %v6068_v12 = vmax.f32 %v3098_v23, %v3099_v21  ;;  %v6070_v28 = vmin.f32 %v3111_v60, %v3112_v50  ;;  %vm3017_vm13 = vcmp.eq.s32.totalorder %v6610_v51, 1  ;;  %vm3089_vm3 = vcmp.eq.s32.totalorder %v5791_v29, 1 }
 0x49f   : > { %v6076_v41 = vmax.f32 %v2668_v45, %v2561_v25  ;;  %v2498_v24 = vadd.f32 %v2497_v55, %v6575_v56  ;;  %v6083_v19 = vmax.f32 %v2655_v11, %v2490_v26  ;;  %v6086_v49 = vadd.f32 %v2562_v33, %v4993_v35  ;;  %v6093_v25 = vpop.f32.mrf.mxu1 }
 0x4a0   : > { %v6091_v53 = vsel %vm3159_vm15, %v5983_v1, 0.0  ;;  %v6096_v15 = vadd.f32 %v2564_v40, %v4983_v42  ;;  %v6109_v27 = vadd.f32 %v2501_v61, %v6575_v56 }
 0x4a1   : > { %v2792_v55 = vsel %vm2768_vm14, %v2498_v24, 0.0  ;;  %v2880_v23 = vsel %vm2872_vm6, %v2498_v24, 0.0  ;;  %v2952_v60 = vsel %vm2944_vm10, %v2498_v24, 0.0  ;;  %v3024_v1 = vsel %vm3016_vm0, %v2498_v24, 0.0  ;;  %v6129_v33 = vpop.f32.mrf.mxu1 }
 0x4a2   : > { %v2796_v43 = vmax.f32 %v5894_v54, %v2792_v55  ;;  %v2809_v39 = vmin.f32 %v5894_v54, %v2792_v55  ;;  %v2884_v20 = vmax.f32 %v5898_v6, %v2880_v23  ;;  %v2897_v22 = vmin.f32 %v5898_v6, %v2880_v23  ;;  %6611 = vst [vmem:[#allocation7_spill] sm:$0xff] %v6129_v33  ;;  %v6613_v6 = vld [vmem:[#allocation36_spill] sm:$0xff]  ;;  %v6615_v55 = vld [vmem:[#allocation38_spill] sm:$0xff] }
 0x4a3   : > { %v2956_v54 = vmax.f32 %v5902_v59, %v2952_v60  ;;  %v2969_v13 = vmin.f32 %v5902_v59, %v2952_v60  ;;  %v6123_v56 = vsel %vm3088_vm8, %v2498_v24, 0.0  ;;  %v6127_v61 = vsel %vm3160_vm9, %v2498_v24, 0.0  ;;  %v6148_v24 = vpop.f32.mrf.mxu0  ;;  %v6164_v48 = vpop.f32.mrf.mxu1  ;;  %v6619_v59 = vld [vmem:[#allocation46_spill] sm:$0xff] }
 0x4a4   : > { %v3028_v26 = vmax.f32 %v6612_v17, %v3024_v1  ;;  %v3041_v21 = vmin.f32 %v6612_v17, %v3024_v1  ;;  %v2793_v18 = vsel %vm2769_vm11, %v6109_v27, 0.0  ;;  %v2881_v11 = vsel %vm2873_vm2, %v6109_v27, 0.0  ;;  %v6616_v1 = vld [vmem:[#allocation42_spill] sm:$0xff]  ;;  %6618 = vst [vmem:[#allocation33_spill] sm:$0xff] %v6164_v48 }
 0x4a5   : > { %v2953_v40 = vsel %vm2945_vm4, %v6109_v27, 0.0  ;;  %v2797_v23 = vmax.f32 %v6615_v55, %v2793_v18  ;;  %v2810_v60 = vmin.f32 %v6615_v55, %v2793_v18  ;;  %v2885_v17 = vmax.f32 %v6616_v1, %v2881_v11 }
 0x4a6   : > { %v2898_v44 = vmin.f32 %v6616_v1, %v2881_v11  ;;  %v2957_v45 = vmax.f32 %v6617_v30, %v2953_v40  ;;  %v2970_v4 = vmin.f32 %v6617_v30, %v2953_v40  ;;  %v3025_v58 = vsel %vm3017_vm13, %v6109_v27, 0.0  ;;  %v6168_v30 = vpop.f32.mrf.mxu0 }
 0x4a7   : > { %v6162_v47 = vsel %vm3089_vm3, %v6109_v27, 0.0  ;;  %v2799_v18 = vmax.f32 %v2796_v43, %v2797_v23  ;;  %v2812_v55 = vmin.f32 %v2809_v39, %v2810_v60  ;;  %v2887_v46 = vmax.f32 %v2884_v20, %v2885_v17  ;;  %v6176_v20 = vpop.f32.mrf.mxu1 }
 0x4a8   : > { %v2900_v7 = vmin.f32 %v2897_v22, %v2898_v44  ;;  %v2959_v11 = vmax.f32 %v2956_v54, %v2957_v45  ;;  %v2972_v1 = vmin.f32 %v2969_v13, %v2970_v4  ;;  %v3029_v50 = vmax.f32 %v6619_v59, %v3025_v58  ;;  %6620 = vst [vmem:[#allocation32_spill] sm:$0xff] %v6176_v20  ;;  %v6178_v45 = vpop.permute.xlu0 %3152 }
 0x4a9   : > { %v3042_v40 = vmin.f32 %v6619_v59, %v3025_v58  ;;  %v2800_v51 = vmax.f32 %v6021_v3, %v2799_v18  ;;  %v2813_v29 = vmin.f32 %v6023_v32, %v2812_v55  ;;  %v2888_v33 = vmax.f32 %v6025_v10, %v2887_v46  ;;  %v6185_v17 = vpop.f32.mrf.mxu1 }
 0x4aa   : > { %v2901_v48 = vmin.f32 %v6027_v2, %v2900_v7  ;;  %v2960_v43 = vmax.f32 %v6030_v14, %v2959_v11  ;;  %v2973_v44 = vmin.f32 %v6032_v16, %v2972_v1  ;;  %v3031_v39 = vmax.f32 %v3028_v26, %v3029_v50  ;;  %v6182_v26 = vpop.f32.mrf.mxu0  ;;  %6621 = vst [vmem:[#allocation39_spill] sm:$0xff] %v6185_v17 }
 0x4ab   : > { %v3044_v4 = vmin.f32 %v3041_v21, %v3042_v40  ;;  %v2801_v22 = vrot.slane %v2800_v51, 4  ;;  %v2814_v54 = vrot.slane %v2813_v29, 4  ;;  %v2889_v13 = vrot.slane %v2888_v33, 4 }
 0x4ac   : > { %v2902_v59 = vrot.slane %v2901_v48, 4  ;;  %v2961_v3 = vrot.slane %v2960_v43, 4  ;;  %v2974_v32 = vrot.slane %v2973_v44, 4  ;;  %v3032_v10 = vmax.f32 %v6057_v38, %v3031_v39 }
 0x4ad   : > { %v3045_v2 = vmin.f32 %v6059_v63, %v3044_v4  ;;  %v2802_v46 = vmax.f32 %v2800_v51, %v2801_v22  ;;  %v2815_v14 = vmin.f32 %v2813_v29, %v2814_v54  ;;  %v2890_v7 = vmax.f32 %v2888_v33, %v2889_v13  ;;  %v6192_v13 = vpop.f32.mrf.mxu1 }
 0x4ae   : > { %v2903_v16 = vmin.f32 %v2901_v48, %v2902_v59  ;;  %v2962_v21 = vmax.f32 %v2960_v43, %v2961_v3  ;;  %v2975_v50 = vmin.f32 %v2973_v44, %v2974_v32  ;;  %v3033_v23 = vrot.slane %v3032_v10, 4  ;;  %v6187_v43 = vpop.f32.mrf.mxu0  ;;  %v2820_v44 = vld [vmem:[%s6380_s8 + $0x1] sm:$0x1]  ;;  %6622 = vst [vmem:[#allocation40_spill] sm:$0xff] %v6192_v13  ;;  %v2823_v32 = vld [vmem:[%s6380_s8 + $0xd] sm:$0x1] }
 0x4af   : > { %v3046_v60 = vrot.slane %v3045_v2, 4  ;;  %vm3161_vm7 = vcmp.eq.s32.totalorder %v6178_v45, 1  ;;  %v2803_v58 = vrot.slane %v2802_v46, 2  ;;  %v2816_v18 = vrot.slane %v2815_v14, 2 }
 0x4b0   : > { %v2891_v55 = vrot.slane %v2890_v7, 2  ;;  %v2904_v38 = vrot.slane %v2903_v16, 2  ;;  %v2963_v11 = vrot.slane %v2962_v21, 2  ;;  %v2976_v63 = vrot.slane %v2975_v50, 2 }
 0x4b1   : > { %v3034_v1 = vmax.f32 %v3032_v10, %v3033_v23  ;;  %v3047_v40 = vmin.f32 %v3045_v2, %v3046_v60  ;;  %v2804_v33 = vmax.f32 %v2802_v46, %v2803_v58  ;;  %v2817_v48 = vmin.f32 %v2815_v14, %v2816_v18  ;;  %v2908_v46 = vld [vmem:[%s6380_s8 + $0x3] sm:$0x1]  ;;  %v2911_v14 = vld [vmem:[%s6380_s8 + $0xf] sm:$0x1] }
 0x4b2   : > { %v2892_v51 = vmax.f32 %v2890_v7, %v2891_v55  ;;  %v2905_v29 = vmin.f32 %v2903_v16, %v2904_v38  ;;  %v2964_v39 = vmax.f32 %v2962_v21, %v2963_v11  ;;  %v2977_v4 = vmin.f32 %v2975_v50, %v2976_v63  ;;  %v2980_v55 = vld [vmem:[%s6380_s8 + $0x5] sm:$0x1]  ;;  %v2983_v38 = vld [vmem:[%s6380_s8 + $0x11] sm:$0x1]  ;;  %v6209_v11 = vpop.f32.mrf.mxu0 }
 0x4b3   : > { %v3035_v22 = vrot.slane %v3034_v1, 2  ;;  %v3048_v54 = vrot.slane %v3047_v40, 2  ;;  %v2805_v59 = vrot.slane %v2804_v33, 1  ;;  %v2818_v3 = vrot.slane %v2817_v48, 1 }
 0x4b4   : > { %v2893_v10 = vrot.slane %v2892_v51, 1  ;;  %v2906_v2 = vrot.slane %v2905_v29, 1  ;;  %v2965_v7 = vrot.slane %v2964_v39, 1  ;;  %v2978_v16 = vrot.slane %v2977_v4, 1 }
 0x4b5   : > { %v3036_v21 = vmax.f32 %v3034_v1, %v3035_v22  ;;  %v3049_v50 = vmin.f32 %v3047_v40, %v3048_v54  ;;  %v2806_v23 = vmax.f32 %v2804_v33, %v2805_v59  ;;  %v2819_v60 = vmin.f32 %v2817_v48, %v2818_v3  ;;  %v6211_v1 = vpop.f32.mrf.mxu1  ;;  %v3055_v22 = vld [vmem:[%s6380_s8 + $0x13] sm:$0x1] }
 0x4b6   : > { %v2894_v58 = vmax.f32 %v2892_v51, %v2893_v10  ;;  %v2907_v18 = vmin.f32 %v2905_v29, %v2906_v2  ;;  %v2966_v63 = vmax.f32 %v2964_v39, %v2965_v7  ;;  %v2979_v13 = vmin.f32 %v2977_v4, %v2978_v16  ;;  %v3052_v29 = vld [vmem:[%s6380_s8 + $0x7] sm:$0x1] }
 0x4b7   : > { %v3037_v17 = vrot.slane %v3036_v21, 1  ;;  %v3050_v20 = vrot.slane %v3049_v50, 1  ;;  %v2821_v40 = vmax.f32 %v2820_v44, %v2806_v23  ;;  %v2824_v33 = vmin.f32 %v2823_v32, %v2819_v60 }
 0x4b8   : > { %v2909_v48 = vmax.f32 %v2908_v46, %v2894_v58  ;;  %v2912_v51 = vmin.f32 %v2911_v14, %v2907_v18  ;;  %v2981_v54 = vmax.f32 %v2980_v55, %v2966_v63  ;;  %v2984_v59 = vmin.f32 %v2983_v38, %v2979_v13  ;;  %v3512_v13 = vpop.f32.mrf.mxu0 }
 0x4b9   : > { %v3038_v39 = vmax.f32 %v3036_v21, %v3037_v17  ;;  %v3051_v4 = vmin.f32 %v3049_v50, %v3050_v20  ;;  %v3185_v3 = vmin.f32 %v6614_v62, %v6127_v61  ;;  %2822 = vst [vmem:[%s6380_s8 + $0x1] sm:$0x1] %v2821_v40  ;;  %2825 = vst [vmem:[%s6380_s8 + $0xd] sm:$0x1] %v2824_v33  ;;  %v3169_v44 = vsel %vm3161_vm7, %v6109_v27, 0.0 }
 0x4ba   : > { %2910 = vst [vmem:[%s6380_s8 + $0x3] sm:$0x1] %v2909_v48  ;;  %2913 = vst [vmem:[%s6380_s8 + $0xf] sm:$0x1] %v2912_v51  ;;  %v3101_v20 = vmax.f32 %v6053_v9, %v6162_v47  ;;  %v3114_v17 = vmin.f32 %v6053_v9, %v6162_v47  ;;  %v3173_v2 = vmax.f32 %v6064_v5, %v3169_v44  ;;  %v6248_v9 = vpop.f32.mrf.mxu1  ;;  %v6623_v47 = vld [vmem:[#allocation13_spill] sm:$0xff]  ;;  %v3514_v38 = vpop.f32.mrf.mxu0 }
 0x4bb   : > { %2982 = vst [vmem:[%s6380_s8 + $0x5] sm:$0x1] %v2981_v54  ;;  %2985 = vst [vmem:[%s6380_s8 + $0x11] sm:$0x1] %v2984_v59  ;;  %v3053_v32 = vmax.f32 %v3052_v29, %v3038_v39  ;;  %v3056_v10 = vmin.f32 %v3055_v22, %v3051_v4  ;;  %v3186_v46 = vmin.f32 %v6064_v5, %v3169_v44 }
 0x4bc   : > { %v2494_v27 = vadd.f32 %v6623_v47, %v4956_v31  ;;  %v2567_v45 = vadd.f32 %v6115_v36, %v4993_v35  ;;  %v6624_v14 = vmax.f32 %v6613_v6, %v6123_v56  ;;  %v6625_v16 = vmin.f32 %v6613_v6, %v6123_v56  ;;  %v6293_v48 = vpop.f32.mrf.mxu1  ;;  %v3515_v59 = vpop.f32.mrf.mxu0 }
 0x4bd   : > { %v6626_v50 = vmax.f32 %v5874_v37, %v6091_v53  ;;  %v6627_v5 = vmax.f32 %v5844_v57, %v6039_v0  ;;  %v6628_v60 = vmin.f32 %v5874_v37, %v6091_v53  ;;  %v6629_v36 = vmin.f32 %v5844_v57, %v6039_v0  ;;  %3054 = vst [vmem:[%s6380_s8 + $0x7] sm:$0x1] %v3053_v32 }
 0x4be   : > { %v3103_v7 = vmax.f32 %v6624_v14, %v3101_v20  ;;  %v3116_v21 = vmin.f32 %v6625_v16, %v3114_v17  ;;  %3057 = vst [vmem:[%s6380_s8 + $0x13] sm:$0x1] %v3056_v10  ;;  %v6630_v56 = vmax.f32 %v6614_v62, %v6127_v61  ;;  %v3188_v18 = vmin.f32 %v3185_v3, %v3186_v46  ;;  %v6632_v61 = vld [vmem:[#allocation18_spill] sm:$0xff]  ;;  %v3530_v3 = vpop.f32.mrf.mxu1  ;;  %v6633_v10 = vld [vmem:[#allocation7_spill] sm:$0xff] }
 0x4bf   : > { %v3174_v23 = vmax.f32 %v6627_v5, %v6626_v50  ;;  %v3187_v58 = vmin.f32 %v6629_v36, %v6628_v60  ;;  %v6631_v37 = vmax.f32 %v5933_v52, %v5976_v34  ;;  %v2571_v57 = vadd.f32 %v6148_v24, %v4983_v42  ;;  %v6636_v5 = vld [vmem:[#allocation32_spill] sm:$0xff]  ;;  %v3127_v60 = vld [vmem:[%s6380_s8 + $0x15] sm:$0x1] }
 0x4c0   : > { %v3175_v6 = vmax.f32 %v6630_v56, %v3173_v2  ;;  %v3104_v0 = vmax.f32 %v6068_v12, %v3103_v7  ;;  %v3117_v55 = vmin.f32 %v6070_v28, %v3116_v21  ;;  %v2670_v63 = vmax.f32 %v6076_v41, %v6096_v15  ;;  %v3532_v16 = vpop.f32.mrf.mxu1 }
 0x4c1   : > { %v2682_v53 = vmax.f32 %v6631_v37, %v6086_v49  ;;  %v2500_v62 = vadd.f32 %v6632_v61, %v4956_v31  ;;  %v3189_v33 = vmin.f32 %v3187_v58, %v3188_v18  ;;  %v2657_v52 = vmax.f32 %v6083_v19, %v2494_v27 }
 0x4c2   : > { %v3176_v40 = vmax.f32 %v3174_v23, %v3175_v6  ;;  %v2573_v34 = vadd.f32 %v6168_v30, %v4993_v35  ;;  %v3105_v49 = vrot.slane %v3104_v0, 4  ;;  %v3118_v12 = vrot.slane %v3117_v55, 4 }
 0x4c3   : > { %v2683_v24 = vmax.f32 %v2682_v53, %v2567_v45  ;;  %v2575_v28 = vadd.f32 %v6182_v26, %v4983_v42  ;;  %v3190_v41 = vrot.slane %v3189_v33, 4  ;;  %v2671_v15 = vmax.f32 %v2670_v63, %v2571_v57  ;;  %v3196_v57 = vld [vmem:[%s6380_s8 + $0xb] sm:$0x1] }
 0x4c4   : > { %v3177_v51 = vrot.slane %v3176_v40, 4  ;;  %v3106_v29 = vmax.f32 %v3104_v0, %v3105_v49  ;;  %v3119_v22 = vmin.f32 %v3117_v55, %v3118_v12  ;;  %v2504_v54 = vadd.f32 %v6045_v8, %v4956_v31  ;;  %v3199_v0 = vld [vmem:[%s6380_s8 + $0x17] sm:$0x1]  ;;  %v6637_v49 = vld [vmem:[#allocation39_spill] sm:$0xff]  ;;  %v6638_v12 = vld [vmem:[#allocation40_spill] sm:$0xff] }
 0x4c5   : > { %v2658_v39 = vmax.f32 %v2657_v52, %v2500_v62  ;;  %v3191_v4 = vmin.f32 %v3189_v33, %v3190_v41  ;;  %v3513_v30 = vadd.f32 %v3512_v13, %v6209_v11  ;;  %v2684_v20 = vmax.f32 %v2683_v24, %v2573_v34  ;;  %v6634_v11 = vld [vmem:[#allocation31_spill] sm:$0xff] }
 0x4c6   : > { %v3178_v19 = vmax.f32 %v3176_v40, %v3177_v51  ;;  %v3107_v17 = vrot.slane %v3106_v29, 2  ;;  %v3120_v44 = vrot.slane %v3119_v22, 2  ;;  %v2577_v42 = vadd.f32 %v6187_v43, %v4993_v35  ;;  %v6635_v43 = vld [vmem:[#allocation33_spill] sm:$0xff]  ;;  %v3533_v40 = vpop.f32.mrf.mxu1 }
 0x4c7   : > { %v3192_v32 = vrot.slane %v3191_v4, 2  ;;  %v3519_v2 = vadd.f32 %v6633_v10, %v6093_v25  ;;  %v3516_v46 = vadd.f32 %v3515_v59, %v3514_v38  ;;  %v2672_v47 = vmax.f32 %v2671_v15, %v2575_v28  ;;  %v3124_v25 = vld [vmem:[%s6380_s8 + $0x9] sm:$0x1] }
 0x4c8   : > { %v3179_v26 = vrot.slane %v3178_v19, 2  ;;  %v3108_v31 = vmax.f32 %v3106_v29, %v3107_v17  ;;  %v3121_v8 = vmin.f32 %v3119_v22, %v3120_v44  ;;  %v2659_v27 = vmax.f32 %v2658_v39, %v2504_v54 }
 0x4c9   : > { %v3193_v14 = vmin.f32 %v3191_v4, %v3192_v32  ;;  %v2614_v13 = vadd.f32 %v3513_v30, %v6634_v11  ;;  %v2617_v7 = vadd.f32 %v3516_v46, %v6634_v11  ;;  %v2685_v35 = vmax.f32 %v2684_v20, %v2577_v42 }
 0x4ca   : > { %v3180_v45 = vmax.f32 %v3178_v19, %v3179_v26  ;;  %v3109_v21 = vrot.slane %v3108_v31, 1  ;;  %v3122_v50 = vrot.slane %v3121_v8, 1  ;;  %v3522_v23 = vadd.f32 %v6636_v5, %v6635_v43 }
 0x4cb   : > { %v3194_v58 = vrot.slane %v3193_v14, 1  ;;  %v2622_v56 = vadd.f32 %v3519_v2, %v6634_v11  ;;  %v2692_v6 = vmax.f32 %v2614_v13, %v2617_v7  ;;  %v2673_v53 = vrot.slane %v2672_v47, 4 }
 0x4cc   : > { %v3181_v36 = vrot.slane %v3180_v45, 1  ;;  %v3110_v18 = vmax.f32 %v3108_v31, %v3109_v21  ;;  %v3123_v37 = vmin.f32 %v3121_v8, %v3122_v50  ;;  %v2660_v55 = vrot.slane %v2659_v27, 4 }
 0x4cd   : > { %v3195_v63 = vmin.f32 %v3193_v14, %v3194_v58  ;;  %v2625_v61 = vadd.f32 %v3522_v23, %v6634_v11  ;;  %v2693_v62 = vmax.f32 %v2692_v6, %v2622_v56  ;;  %v2686_v34 = vrot.slane %v2685_v35, 4 }
 0x4ce   : > { %v3182_v38 = vmax.f32 %v3180_v45, %v3181_v36  ;;  %v3125_v33 = vmax.f32 %v3124_v25, %v3110_v18  ;;  %v3128_v52 = vmin.f32 %v3127_v60, %v3123_v37  ;;  %v3525_v24 = vadd.f32 %v6638_v12, %v6637_v49  ;;  %v3438_v25 = vld [vmem:[%s6380_s8 + $0x19] ss:$2 sm:$0xf] }
 0x4cf   : > { %v3200_v51 = vmin.f32 %v3199_v0, %v3195_v63  ;;  %v2694_v41 = vmax.f32 %v2693_v62, %v2625_v61  ;;  %v3528_v15 = vadd.f32 %v6248_v9, %v6211_v1  ;;  %v2661_v29 = vmax.f32 %v2659_v27, %v2660_v55 }
 0x4d0   : > { %v3197_v28 = vmax.f32 %v3196_v57, %v3182_v38  ;;  %3126 = vst [vmem:[%s6380_s8 + $0x9] sm:$0x1] %v3125_v33  ;;  %3129 = vst [vmem:[%s6380_s8 + $0x15] sm:$0x1] %v3128_v52  ;;  %v2630_v22 = vadd.f32 %v3525_v24, %v6634_v11  ;;  %v3531_v54 = vadd.f32 %v3530_v3, %v6293_v48 }
 0x4d1   : > { %v3534_v59 = vadd.f32 %v3533_v40, %v3532_v16  ;;  %3201 = vst [vmem:[%s6380_s8 + $0x17] sm:$0x1] %v3200_v51  ;;  %v2633_v1 = vadd.f32 %v3528_v15, %v6634_v11  ;;  %v2674_v9 = vmax.f32 %v2672_v47, %v2673_v53  ;;  %v2662_v4 = vrot.slane %v2661_v29, 2 }
 0x4d2   : > { %3198 = vst [vmem:[%s6380_s8 + $0xb] sm:$0x1] %v3197_v28  ;;  %v2695_v39 = vmax.f32 %v2694_v41, %v2630_v22  ;;  %v2638_v19 = vadd.f32 %v3531_v54, %v6634_v11  ;;  %v2687_v30 = vmax.f32 %v2685_v35, %v2686_v34  ;;  %v6639_v35 = vld [vmem:[#allocation34_spill] sm:$0xff] }
 0x4d3   : > { %v2641_v48 = vadd.f32 %v3534_v59, %v6634_v11  ;;  %v2675_v3 = vrot.slane %v2674_v9, 2  ;;  %v2663_v44 = vmax.f32 %v2661_v29, %v2662_v4 }
 0x4d4   : > { %v2696_v20 = vmax.f32 %v2695_v39, %v2633_v1  ;;  %v2688_v42 = vrot.slane %v2687_v30, 2 }
 0x4d5   : > { %v2676_v32 = vmax.f32 %v2674_v9, %v2675_v3  ;;  %v2664_v2 = vrot.slane %v2663_v44, 1 }
 0x4d6   : > { %v2697_v17 = vmax.f32 %v2696_v20, %v2638_v19  ;;  %v2689_v46 = vmax.f32 %v2687_v30, %v2688_v42 }
 0x4d7   : > { %v2677_v8 = vrot.slane %v2676_v32, 1  ;;  %v2665_v27 = vmax.f32 %v2663_v44, %v2664_v2 }
 0x4d8   : > { %v2698_v26 = vmax.f32 %v2697_v17, %v2641_v48  ;;  %v2690_v45 = vrot.slane %v2689_v46, 1 }
 0x4d9   : > { %v2678_v13 = vmax.f32 %v2676_v32, %v2677_v8 }
 0x4da   : > { %v2699_v10 = vrot.slane %v2698_v26, 4  ;;  %v2691_v21 = vmax.f32 %v2689_v46, %v2690_v45 }
 0x4db   : > { %v2711_v16 = vcombine.low %v2665_v27, %v2678_v13 }
 0x4dc   : > { %v2700_v31 = vmax.f32 %v2698_v26, %v2699_v10 }
 0x4dd   : > { %v2719_v43 = vrot.slane %v2711_v16, %v6639_v35 }
 0x4de   : > { %v2701_v47 = vrot.slane %v2700_v31, 2 }
 0x4e0   : > { %v2702_v14 = vmax.f32 %v2700_v31, %v2701_v47 }
 0x4e2   : > { %v2703_v7 = vrot.slane %v2702_v14, 1 }
 0x4e4   : > { %v2704_v11 = vmax.f32 %v2702_v14, %v2703_v7 }
 0x4e6   : > { %v2712_v50 = vcombine.low %v2691_v21, %v2704_v11 }
 0x4e8   : > { %v2726_v5 = vrot.slane %v2712_v50, %v6639_v35 }
 0x4ea   : > { %v2727_v23 = vcombine.low %v2719_v43, %v2726_v5 }
 0x4ec   : > { %v2734_v60 = vrot.slane %v2727_v23, %v6639_v35 }
 0x4ee   : > { %v2736_v36 = vmax.f32 %v3438_v25, %v2734_v60 }
 0x4f0   : > { %3439 = vst.msk [vmem:[%s6380_s8 + $0x19] ss:$2 sm:$0xf] %vm5617_vm1, %v2736_v36 }
 0x4f1 PF: > { %s18_s9 = sadd.s32 1, %s3877_s9   ;;  %s6641_s27 = smov %s3865_s28 }
 0x4f2   : > { %p15_p10 = scmp.ge.s32.totalorder %s18_s9, 6   ;;  %s6642_s28 = smov %s3972_s14 }
 0x4f3   : > { %s6643_s29 = smov %s3873_s30  ;;  %s6644_s30 = smov %s6646_s10 }
 0x4f4   :  { %17 = sbr.rel (!%p15_p10) target bundleno = 3 (0x3), region = 182 }

</bundles_post_ra>
